<compile_context>
chip_gen: v7x
topology: tpu7x:2x2x1
jax: 0.10.0
libtpu: 0.0.40
codegen_flags: <defaults>
</compile_context>

<pallas_src>
from functools import partial

import jax
import jax.numpy as jnp
from jax import lax
from jax.experimental import pallas as pl
from jax.experimental.pallas import tpu as pltpu

LN_EPS = 1e-5          # torch.nn.LayerNorm default eps
NEG_BIG = -1e30        # finite "-inf" for masked (padded) keys


# ----------------------------- shared helpers ---------------------------------

def _layernorm(x, gamma, beta):
    # x: (N, D) f32, gamma/beta: (1, D) f32
    mu = jnp.mean(x, axis=-1, keepdims=True)
    var = jnp.mean((x - mu) ** 2, axis=-1, keepdims=True)
    return (x - mu) * lax.rsqrt(var + LN_EPS) * gamma + beta


def _gelu_exact(x):
    # matches torch.nn.functional.gelu (approximate='none')
    return 0.5 * x * (1.0 + lax.erf(x * (1.0 / jnp.sqrt(jnp.float32(2.0)))))


def _ref_ln(x, g, b):
    mu = x.mean(-1, keepdims=True)
    var = ((x - mu) ** 2).mean(-1, keepdims=True)
    return (x - mu) / jnp.sqrt(var + LN_EPS) * g + b


# --------------------------------- kernels -------------------------------------

def cross_kernel(q_ref, lat_ref, ctx_ref,
                 lnc_g_ref, lnc_b_ref,
                 wkv_ref, wout_ref, bout_ref,
                 flng_ref, flnb_ref, w1a_ref, b1a_ref, w1g_ref, b1g_ref,
                 w2_ref, b2_ref,
                 o_ref,
                 m_scr, l_scr, acc_scr,
                 *, heads, dim_head, block_nk, nk_valid, needs_mask):
    """Flash cross-attend over kv tiles + GEGLU FF.  One (batch, q-tile) slab."""
    kv = pl.program_id(2)
    inner = heads * dim_head

    @pl.when(kv == 0)
    def _():
        m_scr[...] = jnp.full_like(m_scr, -jnp.inf)
        l_scr[...] = jnp.zeros_like(l_scr)
        acc_scr[...] = jnp.zeros_like(acc_scr)

    # LN(context tile) -> fused k,v projection (data streamed in bf16).
    cn = _layernorm(ctx_ref[0].astype(jnp.float32),
                    lnc_g_ref[...], lnc_b_ref[...]).astype(jnp.bfloat16)
    kvp = jnp.dot(cn, wkv_ref[...], preferred_element_type=jnp.float32)   # (tk, 2*inner)

    if needs_mask:
        idx = kv * block_nk + lax.broadcasted_iota(jnp.int32, (1, block_nk), 1)
        bias = jnp.where(idx < nk_valid, 0.0, NEG_BIG).astype(jnp.float32)
    else:
        bias = None

    for h in range(heads):                                   # heads is small; static unroll
        sl = slice(h * dim_head, (h + 1) * dim_head)
        sl_v = slice(inner + h * dim_head, inner + (h + 1) * dim_head)
        qh = q_ref[:, sl]                                    # bf16, scale already folded in
        kh = kvp[:, sl].astype(jnp.bfloat16)
        vh = kvp[:, sl_v].astype(jnp.bfloat16)
        s = lax.dot_general(qh, kh, (((1,), (1,)), ((), ())),
                            preferred_element_type=jnp.float32)          # (tq, tk)
        if bias is not None:
            s = s + bias
        m_prev = m_scr[:, h:h + 1]
        m_new = jnp.maximum(m_prev, jnp.max(s, axis=-1, keepdims=True))
        alpha = jnp.exp(m_prev - m_new)
        p = jnp.exp(s - m_new)
        l_scr[:, h:h + 1] = alpha * l_scr[:, h:h + 1] + jnp.sum(p, axis=-1, keepdims=True)
        acc_scr[:, sl] = alpha * acc_scr[:, sl] + jnp.dot(
            p.astype(jnp.bfloat16), vh, preferred_element_type=jnp.float32)
        m_scr[:, h:h + 1] = m_new

    # Last kv tile: normalize, single packed output projection, residual, GEGLU FF.
    @pl.when(kv == pl.num_programs(2) - 1)
    def _():
        x = lat_ref[...].astype(jnp.float32)                 # loaded only here (perf review)
        parts = []
        for h in range(heads):
            sl = slice(h * dim_head, (h + 1) * dim_head)
            inv_l = pl.reciprocal(l_scr[:, h:h + 1], approx=True)
            parts.append((acc_scr[:, sl] * inv_l).astype(jnp.bfloat16))
        packed = parts[0] if heads == 1 else jnp.concatenate(parts, axis=-1)  # (tq, inner)
        x1 = x + jnp.dot(packed, wout_ref[...],
                         preferred_element_type=jnp.float32) + bout_ref[...]

        xn2 = _layernorm(x1, flng_ref[...], flnb_ref[...]).astype(jnp.bfloat16)
        a = jnp.dot(xn2, w1a_ref[...], preferred_element_type=jnp.float32) + b1a_ref[...]
        g = jnp.dot(xn2, w1g_ref[...], preferred_element_type=jnp.float32) + b1g_ref[...]
        gated = (a * _gelu_exact(g)).astype(jnp.bfloat16)
        x2 = x1 + jnp.dot(gated, w2_ref[...],
                          preferred_element_type=jnp.float32) + b2_ref[...]
        o_ref[0] = x2.astype(o_ref.dtype)


def self_layers_kernel(x0_ref,
                       alng_ref, alnb_ref, wqkv_ref, wout_ref, bout_ref,
                       flng_ref, flnb_ref, w1a_ref, b1a_ref, w1g_ref, b1g_ref,
                       w2_ref, b2_ref,
                       o_ref, x_acc,
                       *, heads, dim_head, b_tile, nq):
    """All latent (self-attn + GEGLU FF) layers for a B_tile batch slab.

    The latents stay resident in VMEM scratch across the layer grid axis; the
    batch slab is folded into the matmul M dim for all weight matmuls.
    """
    l = pl.program_id(1)
    inner = heads * dim_head
    d = x_acc.shape[-1]
    rows = b_tile * nq

    @pl.when(l == 0)
    def _():
        x_acc[...] = x0_ref[...].astype(jnp.float32)

    xf = x_acc[...].reshape(rows, d)                          # (B_tile*Nq, D)

    # ---- self-attention (context == normed x, as in PyTorch PreNorm+Attention) ----
    xn = _layernorm(xf, alng_ref[0], alnb_ref[0]).astype(jnp.bfloat16)
    qkv = jnp.dot(xn, wqkv_ref[0], preferred_element_type=jnp.float32)    # (rows, 3*inner)
    qkv3 = qkv.reshape(b_tile, nq, 3 * inner)

    parts = []
    for h in range(heads):                                    # heads is small; static unroll
        q_sl = slice(h * dim_head, (h + 1) * dim_head)
        k_sl = slice(inner + h * dim_head, inner + (h + 1) * dim_head)
        v_sl = slice(2 * inner + h * dim_head, 2 * inner + (h + 1) * dim_head)
        qh = qkv3[:, :, q_sl].astype(jnp.bfloat16)            # (B_tile, Nq, dh), q pre-scaled
        kh = qkv3[:, :, k_sl].astype(jnp.bfloat16)
        vh = qkv3[:, :, v_sl].astype(jnp.bfloat16)
        s = jnp.einsum('bqd,bkd->bqk', qh, kh,
                       preferred_element_type=jnp.float32)    # (B_tile, Nq, Nq)
        m = jnp.max(s, axis=-1, keepdims=True)
        p = jnp.exp(s - m)
        lsum = jnp.sum(p, axis=-1, keepdims=True)
        oh = jnp.einsum('bqk,bkd->bqd', p.astype(jnp.bfloat16), vh,
                        preferred_element_type=jnp.float32)
        oh = oh * pl.reciprocal(lsum, approx=True)
        parts.append(oh.reshape(rows, dim_head).astype(jnp.bfloat16))
    packed = parts[0] if heads == 1 else jnp.concatenate(parts, axis=-1)   # (rows, inner)
    xf = xf + jnp.dot(packed, wout_ref[0],
                      preferred_element_type=jnp.float32) + bout_ref[0]

    # ---- GEGLU feed-forward ----
    xn2 = _layernorm(xf, flng_ref[0], flnb_ref[0]).astype(jnp.bfloat16)
    a = jnp.dot(xn2, w1a_ref[0], preferred_element_type=jnp.float32) + b1a_ref[0]
    g = jnp.dot(xn2, w1g_ref[0], preferred_element_type=jnp.float32) + b1g_ref[0]
    gated = (a * _gelu_exact(g)).astype(jnp.bfloat16)
    xf = xf + jnp.dot(gated, w2_ref[0], preferred_element_type=jnp.float32) + b2_ref[0]

    x_acc[...] = xf.reshape(b_tile, nq, d)

    @pl.when(l == pl.num_programs(1) - 1)
    def _():
        o_ref[...] = xf.reshape(b_tile, nq, d).astype(o_ref.dtype)


# ------------------------------ sizing helpers ---------------------------------

def _vmem_limit_bytes():
    """Derive the scoped-VMEM limit from the device (v5e/v6e 128 MiB, v7x 64 MiB)."""
    try:
        cap = int(pltpu.get_tpu_info().vmem_capacity_bytes)
    except Exception:
        cap = 64 * 1024 * 1024
    return min(cap * 3 // 4, 96 * 1024 * 1024)


def _pick_kv_tile(nk, dk, budget_bytes):
    """bf16-friendly kv tile (multiple of 16) whose double-buffered bf16 footprint
    fits `budget_bytes`; nk is padded up to a tile multiple (padded keys masked)."""
    max_rows = max(16, budget_bytes // max(1, dk * 2 * 2))
    tile = max(16, min(((nk + 15) // 16) * 16, 4096, (max_rows // 16) * 16))
    nk_pad = ((nk + tile - 1) // tile) * tile
    return tile, nk_pad


def _pick_q_tile(nq, max_tile=256):
    """Tile the query rows (extra 'parallel' axis for v7x's 2nd TensorCore)."""
    if nq <= max_tile or nq % 8 != 0:
        return nq
    for t in range(max_tile - (max_tile % 8), 7, -8):
        if nq % t == 0:
            return t
    return nq


def _pick_batch_tile(b, nq, d, inner, hid, vmem_limit):
    """Largest batch slab (divisor of b, <=8, leaves >=2 grid blocks when possible)
    whose rough f32 working set fits comfortably in VMEM."""
    per_elem = nq * (16 * d + 16 * inner + 12 * hid)   # rough live bytes / batch element
    max_bt = max(1, min(8, vmem_limit // (3 * max(per_elem, 1))))
    best = 1
    for t in range(1, min(b, max_bt) + 1):
        if b % t == 0 and (b // t >= 2 or b == 1):
            best = t
    return best


# ------------------------------ pallas wrappers ---------------------------------

def cross_block(latents, q, data, c, *, heads, dim_head):
    Nq, Dq = latents.shape
    B, Nk, Dk = data.shape
    inner = heads * dim_head
    ff = c["ff"]
    hid = ff["w2"].shape[0]

    vmem_limit = _vmem_limit_bytes()
    block_nk, nk_pad = _pick_kv_tile(Nk, Dk, vmem_limit // 8)
    needs_mask = nk_pad != Nk
    if needs_mask:
        data = jnp.pad(data, ((0, 0), (0, nk_pad - Nk), (0, 0)))
    n_kv = nk_pad // block_nk

    tq = _pick_q_tile(Nq)
    n_q = Nq // tq

    def const(shape):
        return pl.BlockSpec(shape, lambda b, qi, kv: (0,) * len(shape))

    kernel = partial(cross_kernel, heads=heads, dim_head=dim_head,
                     block_nk=block_nk, nk_valid=Nk, needs_mask=needs_mask)
    return pl.pallas_call(
        kernel,
        out_shape=jax.ShapeDtypeStruct((B, Nq, Dq), jnp.float32),
        grid=(B, n_q, n_kv),
        in_specs=[
            pl.BlockSpec((tq, inner), lambda b, qi, kv: (qi, 0)),          # q (bf16, pre-scaled)
            pl.BlockSpec((tq, Dq), lambda b, qi, kv: (qi, 0)),             # latents (residual)
            pl.BlockSpec((1, block_nk, Dk), lambda b, qi, kv: (b, kv, 0)),  # data kv tile (bf16)
            const((1, Dk)), const((1, Dk)),                                # ln_ctx gamma/beta
            const((Dk, 2 * inner)),                                        # wkv (bf16)
            const((inner, Dq)),                                            # wout (bf16)
            const((1, Dq)),                                                # bout
            const((1, Dq)), const((1, Dq)),                                # ff ln gamma/beta
            const((Dq, hid)), const((1, hid)),                             # w1 value half
            const((Dq, hid)), const((1, hid)),                             # w1 gate half
            const((hid, Dq)), const((1, Dq)),                              # w2, b2
        ],
        out_specs=pl.BlockSpec((1, tq, Dq), lambda b, qi, kv: (b, qi, 0)),
        scratch_shapes=[
            pltpu.VMEM((tq, heads), jnp.float32),     # running max (per head column)
            pltpu.VMEM((tq, heads), jnp.float32),     # running sum
            pltpu.VMEM((tq, inner), jnp.float32),     # packed running p@v (lane-dense)
        ],
        compiler_params=pltpu.CompilerParams(
            dimension_semantics=("parallel", "parallel", "arbitrary"),
            vmem_limit_bytes=vmem_limit),
    )(q, latents, data,
      c["ln_c_g"], c["ln_c_b"], c["wkv"], c["wout"], c["bout"],
      ff["ln_g"], ff["ln_b"], ff["w1a"], ff["b1a"], ff["w1g"], ff["b1g"],
      ff["w2"], ff["b2"])


def self_layers_block(x, s, *, heads, dim_head):
    B, Nq, D = x.shape
    L = s["wqkv"].shape[0]
    inner = heads * dim_head
    hid = s["w2"].shape[1]
    vmem_limit = _vmem_limit_bytes()
    bt = _pick_batch_tile(B, Nq, D, inner, hid, vmem_limit)
    if Nq % 8 != 0:          # keep the (bt, Nq, D) <-> (bt*Nq, D) reshape sublane-aligned
        bt = 1

    def per_layer(shape):
        return pl.BlockSpec((1,) + shape, lambda b, l: (l,) + (0,) * len(shape))

    kernel = partial(self_layers_kernel, heads=heads, dim_head=dim_head,
                     b_tile=bt, nq=Nq)
    return pl.pallas_call(
        kernel,
        out_shape=jax.ShapeDtypeStruct((B, Nq, D), x.dtype),
        grid=(B // bt, L),
        in_specs=[
            pl.BlockSpec((bt, Nq, D), lambda b, l: (b, 0, 0)),   # layer-0 input slab
            per_layer((1, D)), per_layer((1, D)),                # attn ln gamma/beta
            per_layer((D, 3 * inner)),                           # fused wqkv (q pre-scaled)
            per_layer((inner, D)),                               # wout (full, packed heads)
            per_layer((1, D)),                                   # bout
            per_layer((1, D)), per_layer((1, D)),                # ff ln gamma/beta
            per_layer((D, hid)), per_layer((1, hid)),            # w1 value half
            per_layer((D, hid)), per_layer((1, hid)),            # w1 gate half
            per_layer((hid, D)), per_layer((1, D)),              # w2, b2
        ],
        out_specs=pl.BlockSpec((bt, Nq, D), lambda b, l: (b, 0, 0)),
        scratch_shapes=[pltpu.VMEM((bt, Nq, D), jnp.float32)],   # resident latents
        compiler_params=pltpu.CompilerParams(
            dimension_semantics=("parallel", "arbitrary"),
            vmem_limit_bytes=vmem_limit),
    )(x, s["ln_a_g"], s["ln_a_b"], s["wqkv"], s["wout"], s["bout"],
      s["ln_f_g"], s["ln_f_b"], s["w1a"], s["b1a"], s["w1g"], s["b1g"],
      s["w2"], s["b2"])


def perceiver_io_encoder(data, prep, cfg):
    data = data.astype(jnp.bfloat16)   # stream the dominant HBM traffic at half width
    x = cross_block(prep["latents"], prep["cross"]["q"], data, prep["cross"],
                    heads=cfg["cross_heads"], dim_head=cfg["cross_dim_head"])
    if prep["self_layers"] is not None:
        x = self_layers_block(x, prep["self_layers"],
                              heads=cfg["latent_heads"],
                              dim_head=cfg["latent_dim_head"])
    return x


# -------------------- weight prep (fuse / scale / bf16 / stack) -----------------

def prepare_params(params, cfg):
    latent_dim = params["latents"].shape[-1]

    def ff_prep(ff_p):
        hid = ff_p["w2"].shape[0]
        return dict(
            ln_g=ff_p["ln_g"], ln_b=ff_p["ln_b"],
            w1a=ff_p["w1"][:, :hid].astype(jnp.bfloat16),
            w1g=ff_p["w1"][:, hid:].astype(jnp.bfloat16),
            b1a=ff_p["b1"][:, :hid], b1g=ff_p["b1"][:, hid:],
            w2=ff_p["w2"].astype(jnp.bfloat16), b2=ff_p["b2"])

    ch, cdh = cfg["cross_heads"], cfg["cross_dim_head"]
    ca = params["cross_attn"]
    lat = params["latents"]

    # Hoisted, batch-independent query projection: q = LN(latents) @ (wq * scale).
    lat_n = _ref_ln(lat, ca["ln_q_g"], ca["ln_q_b"])
    q = jnp.dot(lat_n.astype(jnp.bfloat16),
                (ca["wq"] * (cdh ** -0.5)).astype(jnp.bfloat16),
                preferred_element_type=jnp.float32).astype(jnp.bfloat16)

    cross = dict(
        q=q,
        ln_c_g=ca["ln_c_g"], ln_c_b=ca["ln_c_b"],
        wkv=ca["wkv"].astype(jnp.bfloat16),
        wout=ca["wout"].astype(jnp.bfloat16),
        bout=ca["bout"],
        ff=ff_prep(params["cross_ff"]))

    lh, ldh = cfg["latent_heads"], cfg["latent_dim_head"]
    layers = params["layers"]
    self_p = None
    if layers:
        hid = layers[0][1]["w2"].shape[0]

        def stk(fn, dtype=None):
            arr = jnp.stack([fn(a, f) for a, f in layers], axis=0)
            return arr if dtype is None else arr.astype(dtype)

        self_p = dict(
            ln_a_g=stk(lambda a, f: a["ln_q_g"]),
            ln_a_b=stk(lambda a, f: a["ln_q_b"]),
            wqkv=stk(lambda a, f: jnp.concatenate(
                [a["wq"] * (ldh ** -0.5), a["wkv"]], axis=1), jnp.bfloat16),
            wout=stk(lambda a, f: a["wout"], jnp.bfloat16),
            bout=stk(lambda a, f: a["bout"]),
            ln_f_g=stk(lambda a, f: f["ln_g"]),
            ln_f_b=stk(lambda a, f: f["ln_b"]),
            w1a=stk(lambda a, f: f["w1"][:, :hid], jnp.bfloat16),
            w1g=stk(lambda a, f: f["w1"][:, hid:], jnp.bfloat16),
            b1a=stk(lambda a, f: f["b1"][:, :hid]),
            b1g=stk(lambda a, f: f["b1"][:, hid:]),
            w2=stk(lambda a, f: f["w2"], jnp.bfloat16),
            b2=stk(lambda a, f: f["b2"]))

    return dict(latents=params["latents"], cross=cross, self_layers=self_p)


# ---------------------------- deterministic params ------------------------------

def init_params(key, *, num_layers, dim, num_latents, latent_dim,
                cross_heads, latent_heads, cross_dim_head, latent_dim_head, mult=4):
    keys = iter(jax.random.split(key, 128))

    def rn(shape, scale=0.02):
        return jax.random.normal(next(keys), shape, jnp.float32) * scale

    def ln(d):
        return 1.0 + rn((1, d)), rn((1, d))        # gamma, beta

    params = {"latents": jax.random.normal(next(keys), (num_latents, latent_dim),
                                           jnp.float32)}

    ci = cross_heads * cross_dim_head
    gq, bq = ln(latent_dim)
    gc, bc = ln(dim)
    params["cross_attn"] = dict(
        ln_q_g=gq, ln_q_b=bq, ln_c_g=gc, ln_c_b=bc,
        wq=rn((latent_dim, ci)), wkv=rn((dim, 2 * ci)),
        wout=rn((ci, latent_dim)), bout=rn((1, latent_dim)))

    hid = latent_dim * mult

    def ff_params():
        g, b = ln(latent_dim)
        return dict(ln_g=g, ln_b=b,
                    w1=rn((latent_dim, 2 * hid)), b1=rn((1, 2 * hid)),
                    w2=rn((hid, latent_dim)), b2=rn((1, latent_dim)))

    params["cross_ff"] = ff_params()

    li = latent_heads * latent_dim_head
    layers = []
    for _ in range(num_layers):
        g, b = ln(latent_dim)
        attn = dict(ln_q_g=g, ln_q_b=b,
                    wq=rn((latent_dim, li)), wkv=rn((latent_dim, 2 * li)),
                    wout=rn((li, latent_dim)), bout=rn((1, latent_dim)))
        layers.append((attn, ff_params()))
    params["layers"] = layers
    return params


# ------------------------- pure-JAX reference (sanity) ---------------------------

def _ref_attn(x, ctx, p, heads, dim_head):
    lnc_g = p.get("ln_c_g", p["ln_q_g"])
    lnc_b = p.get("ln_c_b", p["ln_q_b"])
    xn = _ref_ln(x, p["ln_q_g"], p["ln_q_b"])
    cn = _ref_ln(ctx, lnc_g, lnc_b)
    q = xn @ p["wq"]
    kv = cn @ p["wkv"]
    inner = heads * dim_head
    k, v = kv[..., :inner], kv[..., inner:]
    B, Nq, _ = q.shape
    Nk = k.shape[1]
    qh = q.reshape(B, Nq, heads, dim_head).transpose(0, 2, 1, 3)
    kh = k.reshape(B, Nk, heads, dim_head).transpose(0, 2, 1, 3)
    vh = v.reshape(B, Nk, heads, dim_head).transpose(0, 2, 1, 3)
    sim = jnp.einsum('bhid,bhjd->bhij', qh, kh) * dim_head ** -0.5
    attn = jax.nn.softmax(sim, axis=-1)
    o = jnp.einsum('bhij,bhjd->bhid', attn, vh)
    o = o.transpose(0, 2, 1, 3).reshape(B, Nq, inner)
    return o @ p["wout"] + p["bout"] + x


def _ref_ff(x, p):
    hidden = p["w2"].shape[0]
    xn = _ref_ln(x, p["ln_g"], p["ln_b"])
    h = xn @ p["w1"] + p["b1"]
    a, g = h[..., :hidden], h[..., hidden:]
    gated = a * (0.5 * g * (1.0 + lax.erf(g / jnp.sqrt(2.0))))
    return gated @ p["w2"] + p["b2"] + x


def reference_forward(data, params, cfg):
    B = data.shape[0]
    x = jnp.broadcast_to(params["latents"][None], (B,) + params["latents"].shape)
    x = _ref_attn(x, data, params["cross_attn"], cfg["cross_heads"], cfg["cross_dim_head"])
    x = _ref_ff(x, params["cross_ff"])
    for attn_p, ff_p in params["layers"]:
        x = _ref_attn(x, x, attn_p, cfg["latent_heads"], cfg["latent_dim_head"])
        x = _ref_ff(x, ff_p)
    return x


# ------------------------------------ main ----------------------------------------

if __name__ == "__main__":
    cfg = dict(num_layers=2, dim=32, num_latents=8, latent_dim=32,
               cross_heads=1, latent_heads=2, cross_dim_head=16, latent_dim_head=16)
    key = jax.random.PRNGKey(0)
    pkey, dkey = jax.random.split(key)
    params = init_params(pkey, **cfg, mult=4)
    prep = prepare_params(params, cfg)

    batch, seq = 4, 16   # batch=4 exercises the batch-blocked self-layer path (B_tile=2)
    data = jax.random.normal(dkey, (batch, seq, cfg["dim"]), jnp.float32)

    fwd = jax.jit(lambda d: perceiver_io_encoder(d, prep, cfg))
    out = jax.block_until_ready(fwd(data))

    assert out.shape == (batch, cfg["num_latents"], cfg["latent_dim"]), out.shape
    ref = reference_forward(data, params, cfg)
    max_err = float(jnp.max(jnp.abs(out - ref)))
    # bf16 data/weights on the MXU + approx reciprocal -> loosened tolerance vs fp32 ref.
    assert max_err < 3e-2, f"max abs err {max_err}"

    print("KERNEL_OK")
</pallas_src>

<mosaic_0001>
module attributes {stable_mosaic.version = 11 : i64} {
  func.func @cross_kernel(%arg0: i32, %arg1: i32, %arg2: i32, %arg3: memref<8x16xbf16, #tpu.memory_space<vmem>>, %arg4: memref<8x32xf32, #tpu.memory_space<vmem>>, %arg5: memref<1x16x32xbf16, #tpu.memory_space<vmem>>, %arg6: memref<1x32xf32, #tpu.memory_space<vmem>>, %arg7: memref<1x32xf32, #tpu.memory_space<vmem>>, %arg8: memref<32x32xbf16, #tpu.memory_space<vmem>>, %arg9: memref<16x32xbf16, #tpu.memory_space<vmem>>, %arg10: memref<1x32xf32, #tpu.memory_space<vmem>>, %arg11: memref<1x32xf32, #tpu.memory_space<vmem>>, %arg12: memref<1x32xf32, #tpu.memory_space<vmem>>, %arg13: memref<32x128xbf16, #tpu.memory_space<vmem>>, %arg14: memref<1x128xf32, #tpu.memory_space<vmem>>, %arg15: memref<32x128xbf16, #tpu.memory_space<vmem>>, %arg16: memref<1x128xf32, #tpu.memory_space<vmem>>, %arg17: memref<128x32xbf16, #tpu.memory_space<vmem>>, %arg18: memref<1x32xf32, #tpu.memory_space<vmem>>, %arg19: memref<1x8x32xf32, #tpu.memory_space<vmem>>, %arg20: memref<8x1xf32, #tpu.memory_space<vmem>>, %arg21: memref<8x1xf32, #tpu.memory_space<vmem>>, %arg22: memref<8x16xf32, #tpu.memory_space<vmem>>) attributes {dimension_semantics = [#tpu.dimension_semantics<parallel>, #tpu.dimension_semantics<parallel>, #tpu.dimension_semantics<arbitrary>], iteration_bounds = array<i64: 4, 1, 1>, scalar_prefetch = 0 : i64, scratch_operands = 3 : i64, tpu.core_type = #tpu.core_type<tc>, window_params = [{transform_indices = @transform_0, window_bounds = array<i64: 8, 16>}, {transform_indices = @transform_1, window_bounds = array<i64: 8, 32>}, {transform_indices = @transform_2, window_bounds = array<i64: 1, 16, 32>}, {pipeline_mode = #tpu.pipeline_mode<synchronous>, transform_indices = @transform_3, window_bounds = array<i64: 1, 32>}, {pipeline_mode = #tpu.pipeline_mode<synchronous>, transform_indices = @transform_4, window_bounds = array<i64: 1, 32>}, {pipeline_mode = #tpu.pipeline_mode<synchronous>, transform_indices = @transform_5, window_bounds = array<i64: 32, 32>}, {pipeline_mode = #tpu.pipeline_mode<synchronous>, transform_indices = @transform_6, window_bounds = array<i64: 16, 32>}, {pipeline_mode = #tpu.pipeline_mode<synchronous>, transform_indices = @transform_7, window_bounds = array<i64: 1, 32>}, {pipeline_mode = #tpu.pipeline_mode<synchronous>, transform_indices = @transform_8, window_bounds = array<i64: 1, 32>}, {pipeline_mode = #tpu.pipeline_mode<synchronous>, transform_indices = @transform_9, window_bounds = array<i64: 1, 32>}, {pipeline_mode = #tpu.pipeline_mode<synchronous>, transform_indices = @transform_10, window_bounds = array<i64: 32, 128>}, {pipeline_mode = #tpu.pipeline_mode<synchronous>, transform_indices = @transform_11, window_bounds = array<i64: 1, 128>}, {pipeline_mode = #tpu.pipeline_mode<synchronous>, transform_indices = @transform_12, window_bounds = array<i64: 32, 128>}, {pipeline_mode = #tpu.pipeline_mode<synchronous>, transform_indices = @transform_13, window_bounds = array<i64: 1, 128>}, {pipeline_mode = #tpu.pipeline_mode<synchronous>, transform_indices = @transform_14, window_bounds = array<i64: 128, 32>}, {pipeline_mode = #tpu.pipeline_mode<synchronous>, transform_indices = @transform_15, window_bounds = array<i64: 1, 32>}, {transform_indices = @transform_16, window_bounds = array<i64: 1, 8, 32>}]} {
    %c0_i32 = arith.constant 0 : i32
    %0 = arith.cmpi eq, %arg2, %c0_i32 : i32
    %1 = arith.extui %0 : i1 to i32
    %c0_i32_0 = arith.constant 0 : i32
    %2 = arith.cmpi ne, %1, %c0_i32_0 : i32
    scf.if %2 {
      %cst_34 = arith.constant 0xFF800000 : f32
      %65 = vector.broadcast %cst_34 : f32 to vector<8x1xf32>
      %c0_35 = arith.constant 0 : index
      %c0_36 = arith.constant 0 : index
      %66 = vector.load %arg20[%c0_35, %c0_36] : memref<8x1xf32, #tpu.memory_space<vmem>>, vector<8x1xf32>
      tpu.vector_store %arg20[%c0_35, %c0_36], %65 {strides = array<i32>} : memref<8x1xf32, #tpu.memory_space<vmem>>, vector<8x1xf32>,
      %cst_37 = arith.constant 0.000000e+00 : f32
      %67 = vector.broadcast %cst_37 : f32 to vector<8x1xf32>
      %c0_38 = arith.constant 0 : index
      %c0_39 = arith.constant 0 : index
      %68 = vector.load %arg21[%c0_38, %c0_39] : memref<8x1xf32, #tpu.memory_space<vmem>>, vector<8x1xf32>
      tpu.vector_store %arg21[%c0_38, %c0_39], %67 {strides = array<i32>} : memref<8x1xf32, #tpu.memory_space<vmem>>, vector<8x1xf32>,
      %cst_40 = arith.constant 0.000000e+00 : f32
      %69 = vector.broadcast %cst_40 : f32 to vector<8x16xf32>
      %c0_41 = arith.constant 0 : index
      %c0_42 = arith.constant 0 : index
      %70 = vector.load %arg22[%c0_41, %c0_42] : memref<8x16xf32, #tpu.memory_space<vmem>>, vector<8x16xf32>
      tpu.vector_store %arg22[%c0_41, %c0_42], %69 {strides = array<i32>} : memref<8x16xf32, #tpu.memory_space<vmem>>, vector<8x16xf32>,
    } else {
    }
    %c0 = arith.constant 0 : index
    %c0_1 = arith.constant 0 : index
    %c0_2 = arith.constant 0 : index
    %3 = vector.load %arg5[%c0, %c0_1, %c0_2] : memref<1x16x32xbf16, #tpu.memory_space<vmem>>, vector<1x16x32xbf16>
    %4 = vector.shape_cast %3 : vector<1x16x32xbf16> to vector<16x32xbf16>
    %5 = arith.extf %4 : vector<16x32xbf16> to vector<16x32xf32>
    %c0_3 = arith.constant 0 : index
    %c0_4 = arith.constant 0 : index
    %6 = vector.load %arg6[%c0_3, %c0_4] : memref<1x32xf32, #tpu.memory_space<vmem>>, vector<1x32xf32>
    %c0_5 = arith.constant 0 : index
    %c0_6 = arith.constant 0 : index
    %7 = vector.load %arg7[%c0_5, %c0_6] : memref<1x32xf32, #tpu.memory_space<vmem>>, vector<1x32xf32>
    %cst = arith.constant dense<0.000000e+00> : vector<16xf32>
    %8 = vector.multi_reduction <add>, %5, %cst [1] : vector<16x32xf32> to vector<16xf32>
    %9 = vector.shape_cast %8 : vector<16xf32> to vector<16x1xf32>
    %cst_7 = arith.constant 3.200000e+01 : f32
    %10 = vector.broadcast %cst_7 : f32 to vector<16x1xf32>
    %11 = arith.divf %9, %10 : vector<16x1xf32>
    %12 = vector.broadcast %11 : vector<16x1xf32> to vector<16x32xf32>
    %13 = arith.subf %5, %12 : vector<16x32xf32>
    %14 = arith.mulf %13, %13 : vector<16x32xf32>
    %cst_8 = arith.constant dense<0.000000e+00> : vector<16xf32>
    %15 = vector.multi_reduction <add>, %14, %cst_8 [1] : vector<16x32xf32> to vector<16xf32>
    %16 = vector.shape_cast %15 : vector<16xf32> to vector<16x1xf32>
    %cst_9 = arith.constant 3.200000e+01 : f32
    %17 = vector.broadcast %cst_9 : f32 to vector<16x1xf32>
    %18 = arith.divf %16, %17 : vector<16x1xf32>
    %19 = vector.broadcast %11 : vector<16x1xf32> to vector<16x32xf32>
    %20 = arith.subf %5, %19 : vector<16x32xf32>
    %cst_10 = arith.constant 9.99999974E-6 : f32
    %21 = vector.broadcast %cst_10 : f32 to vector<16x1xf32>
    %22 = arith.addf %18, %21 : vector<16x1xf32>
    %23 = math.rsqrt %22 : vector<16x1xf32>
    %24 = vector.broadcast %23 : vector<16x1xf32> to vector<16x32xf32>
    %25 = arith.mulf %20, %24 : vector<16x32xf32>
    %26 = vector.broadcast %6 : vector<1x32xf32> to vector<16x32xf32>
    %27 = arith.mulf %25, %26 : vector<16x32xf32>
    %28 = vector.broadcast %7 : vector<1x32xf32> to vector<16x32xf32>
    %29 = arith.addf %27, %28 : vector<16x32xf32>
    %30 = arith.truncf %29 : vector<16x32xf32> to vector<16x32xbf16>
    %c0_11 = arith.constant 0 : index
    %c0_12 = arith.constant 0 : index
    %31 = vector.load %arg8[%c0_11, %c0_12] : memref<32x32xbf16, #tpu.memory_space<vmem>>, vector<32x32xbf16>
    %cst_13 = arith.constant dense<0.000000e+00> : vector<16x32xf32>
    %32 = tpu.matmul %30, %31, %cst_13 {dimension_numbers = #tpu.dot_dimension_numbers<[1], [0], [0], [1], [0, 0, 1, 1], [], []>} : vector<16x32xbf16>, vector<32x32xbf16>, vector<16x32xf32> -> vector<16x32xf32>
    %c0_14 = arith.constant 0 : index
    %c0_15 = arith.constant 0 : index
    %33 = vector.load %arg3[%c0_14, %c0_15] : memref<8x16xbf16, #tpu.memory_space<vmem>>, vector<8x16xbf16>
    %34 = vector.extract_strided_slice %32 {offsets = [0, 0], sizes = [16, 16], strides = [1, 1]} : vector<16x32xf32> to vector<16x16xf32>
    %35 = arith.truncf %34 : vector<16x16xf32> to vector<16x16xbf16>
    %36 = vector.extract_strided_slice %32 {offsets = [0, 16], sizes = [16, 16], strides = [1, 1]} : vector<16x32xf32> to vector<16x16xf32>
    %37 = arith.truncf %36 : vector<16x16xf32> to vector<16x16xbf16>
    %cst_16 = arith.constant dense<0.000000e+00> : vector<8x16xf32>
    %38 = tpu.matmul %33, %35, %cst_16 {dimension_numbers = #tpu.dot_dimension_numbers<[1], [1], [0], [0], [0, 0, 1, 0], [], []>} : vector<8x16xbf16>, vector<16x16xbf16>, vector<8x16xf32> -> vector<8x16xf32>
    %c0_17 = arith.constant 0 : index
    %c0_18 = arith.constant 0 : index
    %39 = vector.load %arg20[%c0_17, %c0_18] : memref<8x1xf32, #tpu.memory_space<vmem>>, vector<8x1xf32>
    %cst_19 = arith.constant dense<0xFF800000> : vector<8xf32>
    %40 = vector.multi_reduction <maximumf>, %38, %cst_19 [1] : vector<8x16xf32> to vector<8xf32>
    %41 = vector.shape_cast %40 : vector<8xf32> to vector<8x1xf32>
    %42 = arith.maximumf %39, %41 : vector<8x1xf32>
    %43 = arith.subf %39, %42 : vector<8x1xf32>
    %44 = math.exp %43 : vector<8x1xf32>
    %45 = vector.broadcast %42 : vector<8x1xf32> to vector<8x16xf32>
    %46 = arith.subf %38, %45 : vector<8x16xf32>
    %47 = math.exp %46 : vector<8x16xf32>
    %c0_20 = arith.constant 0 : index
    %c0_21 = arith.constant 0 : index
    %48 = vector.load %arg21[%c0_20, %c0_21] : memref<8x1xf32, #tpu.memory_space<vmem>>, vector<8x1xf32>
    %49 = arith.mulf %44, %48 : vector<8x1xf32>
    %cst_22 = arith.constant dense<0.000000e+00> : vector<8xf32>
    %50 = vector.multi_reduction <add>, %47, %cst_22 [1] : vector<8x16xf32> to vector<8xf32>
    %51 = vector.shape_cast %50 : vector<8xf32> to vector<8x1xf32>
    %52 = arith.addf %49, %51 : vector<8x1xf32>
    %c0_23 = arith.constant 0 : index
    %c0_24 = arith.constant 0 : index
    %53 = vector.load %arg21[%c0_23, %c0_24] : memref<8x1xf32, #tpu.memory_space<vmem>>, vector<8x1xf32>
    tpu.vector_store %arg21[%c0_23, %c0_24], %52 {strides = array<i32>} : memref<8x1xf32, #tpu.memory_space<vmem>>, vector<8x1xf32>,
    %c0_25 = arith.constant 0 : index
    %c0_26 = arith.constant 0 : index
    %54 = vector.load %arg22[%c0_25, %c0_26] : memref<8x16xf32, #tpu.memory_space<vmem>>, vector<8x16xf32>
    %55 = vector.broadcast %44 : vector<8x1xf32> to vector<8x16xf32>
    %56 = arith.mulf %55, %54 : vector<8x16xf32>
    %57 = arith.truncf %47 : vector<8x16xf32> to vector<8x16xbf16>
    %cst_27 = arith.constant dense<0.000000e+00> : vector<8x16xf32>
    %58 = tpu.matmul %57, %37, %cst_27 {dimension_numbers = #tpu.dot_dimension_numbers<[1], [0], [0], [1], [0, 0, 1, 1], [], []>} : vector<8x16xbf16>, vector<16x16xbf16>, vector<8x16xf32> -> vector<8x16xf32>
    %59 = arith.addf %56, %58 : vector<8x16xf32>
    %c0_28 = arith.constant 0 : index
    %c0_29 = arith.constant 0 : index
    %60 = vector.load %arg22[%c0_28, %c0_29] : memref<8x16xf32, #tpu.memory_space<vmem>>, vector<8x16xf32>
    tpu.vector_store %arg22[%c0_28, %c0_29], %59 {strides = array<i32>} : memref<8x16xf32, #tpu.memory_space<vmem>>, vector<8x16xf32>,
    %c0_30 = arith.constant 0 : index
    %c0_31 = arith.constant 0 : index
    %61 = vector.load %arg20[%c0_30, %c0_31] : memref<8x1xf32, #tpu.memory_space<vmem>>, vector<8x1xf32>
    tpu.vector_store %arg20[%c0_30, %c0_31], %42 {strides = array<i32>} : memref<8x1xf32, #tpu.memory_space<vmem>>, vector<8x1xf32>,
    %c0_i32_32 = arith.constant 0 : i32
    %62 = arith.cmpi eq, %arg2, %c0_i32_32 : i32
    %63 = arith.extui %62 : i1 to i32
    %c0_i32_33 = arith.constant 0 : i32
    %64 = arith.cmpi ne, %63, %c0_i32_33 : i32
    scf.if %64 {
      %c0_34 = arith.constant 0 : index
      %c0_35 = arith.constant 0 : index
      %65 = vector.load %arg4[%c0_34, %c0_35] : memref<8x32xf32, #tpu.memory_space<vmem>>, vector<8x32xf32>
      %c0_36 = arith.constant 0 : index
      %c0_37 = arith.constant 0 : index
      %66 = vector.load %arg21[%c0_36, %c0_37] : memref<8x1xf32, #tpu.memory_space<vmem>>, vector<8x1xf32>
      %67 = tpu.reciprocal %66 {approx = true} : vector<8x1xf32> -> vector<8x1xf32>
      %c0_38 = arith.constant 0 : index
      %c0_39 = arith.constant 0 : index
      %68 = vector.load %arg22[%c0_38, %c0_39] : memref<8x16xf32, #tpu.memory_space<vmem>>, vector<8x16xf32>
      %69 = vector.broadcast %67 : vector<8x1xf32> to vector<8x16xf32>
      %70 = arith.mulf %68, %69 : vector<8x16xf32>
      %71 = arith.truncf %70 : vector<8x16xf32> to vector<8x16xbf16>
      %c0_40 = arith.constant 0 : index
      %c0_41 = arith.constant 0 : index
      %72 = vector.load %arg9[%c0_40, %c0_41] : memref<16x32xbf16, #tpu.memory_space<vmem>>, vector<16x32xbf16>
      %cst_42 = arith.constant dense<0.000000e+00> : vector<8x32xf32>
      %73 = tpu.matmul %71, %72, %cst_42 {dimension_numbers = #tpu.dot_dimension_numbers<[1], [0], [0], [1], [0, 0, 1, 1], [], []>} : vector<8x16xbf16>, vector<16x32xbf16>, vector<8x32xf32> -> vector<8x32xf32>
      %74 = arith.addf %65, %73 : vector<8x32xf32>
      %c0_43 = arith.constant 0 : index
      %c0_44 = arith.constant 0 : index
      %75 = vector.load %arg10[%c0_43, %c0_44] : memref<1x32xf32, #tpu.memory_space<vmem>>, vector<1x32xf32>
      %76 = vector.broadcast %75 : vector<1x32xf32> to vector<8x32xf32>
      %77 = arith.addf %74, %76 : vector<8x32xf32>
      %c0_45 = arith.constant 0 : index
      %c0_46 = arith.constant 0 : index
      %78 = vector.load %arg11[%c0_45, %c0_46] : memref<1x32xf32, #tpu.memory_space<vmem>>, vector<1x32xf32>
      %c0_47 = arith.constant 0 : index
      %c0_48 = arith.constant 0 : index
      %79 = vector.load %arg12[%c0_47, %c0_48] : memref<1x32xf32, #tpu.memory_space<vmem>>, vector<1x32xf32>
      %cst_49 = arith.constant dense<0.000000e+00> : vector<8xf32>
      %80 = vector.multi_reduction <add>, %77, %cst_49 [1] : vector<8x32xf32> to vector<8xf32>
      %81 = vector.shape_cast %80 : vector<8xf32> to vector<8x1xf32>
      %cst_50 = arith.constant 3.200000e+01 : f32
      %82 = vector.broadcast %cst_50 : f32 to vector<8x1xf32>
      %83 = arith.divf %81, %82 : vector<8x1xf32>
      %84 = vector.broadcast %83 : vector<8x1xf32> to vector<8x32xf32>
      %85 = arith.subf %77, %84 : vector<8x32xf32>
      %86 = arith.mulf %85, %85 : vector<8x32xf32>
      %cst_51 = arith.constant dense<0.000000e+00> : vector<8xf32>
      %87 = vector.multi_reduction <add>, %86, %cst_51 [1] : vector<8x32xf32> to vector<8xf32>
      %88 = vector.shape_cast %87 : vector<8xf32> to vector<8x1xf32>
      %cst_52 = arith.constant 3.200000e+01 : f32
      %89 = vector.broadcast %cst_52 : f32 to vector<8x1xf32>
      %90 = arith.divf %88, %89 : vector<8x1xf32>
      %91 = vector.broadcast %83 : vector<8x1xf32> to vector<8x32xf32>
      %92 = arith.subf %77, %91 : vector<8x32xf32>
      %cst_53 = arith.constant 9.99999974E-6 : f32
      %93 = vector.broadcast %cst_53 : f32 to vector<8x1xf32>
      %94 = arith.addf %90, %93 : vector<8x1xf32>
      %95 = math.rsqrt %94 : vector<8x1xf32>
      %96 = vector.broadcast %95 : vector<8x1xf32> to vector<8x32xf32>
      %97 = arith.mulf %92, %96 : vector<8x32xf32>
      %98 = vector.broadcast %78 : vector<1x32xf32> to vector<8x32xf32>
      %99 = arith.mulf %97, %98 : vector<8x32xf32>
      %100 = vector.broadcast %79 : vector<1x32xf32> to vector<8x32xf32>
      %101 = arith.addf %99, %100 : vector<8x32xf32>
      %102 = arith.truncf %101 : vector<8x32xf32> to vector<8x32xbf16>
      %c0_54 = arith.constant 0 : index
      %c0_55 = arith.constant 0 : index
      %103 = vector.load %arg13[%c0_54, %c0_55] : memref<32x128xbf16, #tpu.memory_space<vmem>>, vector<32x128xbf16>
      %cst_56 = arith.constant dense<0.000000e+00> : vector<8x128xf32>
      %104 = tpu.matmul %102, %103, %cst_56 {dimension_numbers = #tpu.dot_dimension_numbers<[1], [0], [0], [1], [0, 0, 1, 1], [], []>} : vector<8x32xbf16>, vector<32x128xbf16>, vector<8x128xf32> -> vector<8x128xf32>
      %c0_57 = arith.constant 0 : index
      %c0_58 = arith.constant 0 : index
      %105 = vector.load %arg14[%c0_57, %c0_58] : memref<1x128xf32, #tpu.memory_space<vmem>>, vector<1x128xf32>
      %106 = vector.broadcast %105 : vector<1x128xf32> to vector<8x128xf32>
      %107 = arith.addf %104, %106 : vector<8x128xf32>
      %c0_59 = arith.constant 0 : index
      %c0_60 = arith.constant 0 : index
      %108 = vector.load %arg15[%c0_59, %c0_60] : memref<32x128xbf16, #tpu.memory_space<vmem>>, vector<32x128xbf16>
      %cst_61 = arith.constant dense<0.000000e+00> : vector<8x128xf32>
      %109 = tpu.matmul %102, %108, %cst_61 {dimension_numbers = #tpu.dot_dimension_numbers<[1], [0], [0], [1], [0, 0, 1, 1], [], []>} : vector<8x32xbf16>, vector<32x128xbf16>, vector<8x128xf32> -> vector<8x128xf32>
      %c0_62 = arith.constant 0 : index
      %c0_63 = arith.constant 0 : index
      %110 = vector.load %arg16[%c0_62, %c0_63] : memref<1x128xf32, #tpu.memory_space<vmem>>, vector<1x128xf32>
      %111 = vector.broadcast %110 : vector<1x128xf32> to vector<8x128xf32>
      %112 = arith.addf %109, %111 : vector<8x128xf32>
      %cst_64 = arith.constant 5.000000e-01 : f32
      %113 = vector.broadcast %cst_64 : f32 to vector<8x128xf32>
      %114 = arith.mulf %113, %112 : vector<8x128xf32>
      %cst_65 = arith.constant 2.000000e+00 : f32
      %115 = math.sqrt %cst_65 : f32
      %cst_66 = arith.constant 1.000000e+00 : f32
      %116 = arith.divf %cst_66, %115 : f32
      %117 = vector.broadcast %116 : f32 to vector<8x128xf32>
      %118 = arith.mulf %112, %117 : vector<8x128xf32>
      %119 = math.erf %118 : vector<8x128xf32>
      %cst_67 = arith.constant 1.000000e+00 : f32
      %120 = vector.broadcast %cst_67 : f32 to vector<8x128xf32>
      %121 = arith.addf %120, %119 : vector<8x128xf32>
      %122 = arith.mulf %114, %121 : vector<8x128xf32>
      %123 = arith.mulf %107, %122 : vector<8x128xf32>
      %124 = arith.truncf %123 : vector<8x128xf32> to vector<8x128xbf16>
      %c0_68 = arith.constant 0 : index
      %c0_69 = arith.constant 0 : index
      %125 = vector.load %arg17[%c0_68, %c0_69] : memref<128x32xbf16, #tpu.memory_space<vmem>>, vector<128x32xbf16>
      %cst_70 = arith.constant dense<0.000000e+00> : vector<8x32xf32>
      %126 = tpu.matmul %124, %125, %cst_70 {dimension_numbers = #tpu.dot_dimension_numbers<[1], [0], [0], [1], [0, 0, 1, 1], [], []>} : vector<8x128xbf16>, vector<128x32xbf16>, vector<8x32xf32> -> vector<8x32xf32>
      %127 = arith.addf %77, %126 : vector<8x32xf32>
      %c0_71 = arith.constant 0 : index
      %c0_72 = arith.constant 0 : index
      %128 = vector.load %arg18[%c0_71, %c0_72] : memref<1x32xf32, #tpu.memory_space<vmem>>, vector<1x32xf32>
      %129 = vector.broadcast %128 : vector<1x32xf32> to vector<8x32xf32>
      %130 = arith.addf %127, %129 : vector<8x32xf32>
      %c0_73 = arith.constant 0 : index
      %c0_74 = arith.constant 0 : index
      %c0_75 = arith.constant 0 : index
      %131 = vector.load %arg19[%c0_73, %c0_74, %c0_75] : memref<1x8x32xf32, #tpu.memory_space<vmem>>, vector<1x8x32xf32>
      %132 = vector.shape_cast %131 : vector<1x8x32xf32> to vector<8x32xf32>
      %133 = vector.shape_cast %130 : vector<8x32xf32> to vector<1x8x32xf32>
      tpu.vector_store %arg19[%c0_73, %c0_74, %c0_75], %133 {strides = array<i32>} : memref<1x8x32xf32, #tpu.memory_space<vmem>>, vector<1x8x32xf32>,
    } else {
    }
    return
  }
  func.func @transform_0(%arg0: i32, %arg1: i32, %arg2: i32) -> (i32, i32) {
    %c0_i32 = arith.constant 0 : i32
    %c0_i32_0 = arith.constant 0 : i32
    return %arg1, %c0_i32 : i32, i32
  }
  func.func @transform_1(%arg0: i32, %arg1: i32, %arg2: i32) -> (i32, i32) {
    %c0_i32 = arith.constant 0 : i32
    %c0_i32_0 = arith.constant 0 : i32
    return %arg1, %c0_i32 : i32, i32
  }
  func.func @transform_2(%arg0: i32, %arg1: i32, %arg2: i32) -> (i32, i32, i32) {
    %c0_i32 = arith.constant 0 : i32
    %c0_i32_0 = arith.constant 0 : i32
    return %arg0, %arg2, %c0_i32 : i32, i32, i32
  }
  func.func @transform_3(%arg0: i32, %arg1: i32, %arg2: i32) -> (i32, i32) {
    %c0_i32 = arith.constant 0 : i32
    %c0_i32_0 = arith.constant 0 : i32
    %c0_i32_1 = arith.constant 0 : i32
    return %c0_i32, %c0_i32_0 : i32, i32
  }
  func.func @transform_4(%arg0: i32, %arg1: i32, %arg2: i32) -> (i32, i32) {
    %c0_i32 = arith.constant 0 : i32
    %c0_i32_0 = arith.constant 0 : i32
    %c0_i32_1 = arith.constant 0 : i32
    return %c0_i32, %c0_i32_0 : i32, i32
  }
  func.func @transform_5(%arg0: i32, %arg1: i32, %arg2: i32) -> (i32, i32) {
    %c0_i32 = arith.constant 0 : i32
    %c0_i32_0 = arith.constant 0 : i32
    %c0_i32_1 = arith.constant 0 : i32
    return %c0_i32, %c0_i32_0 : i32, i32
  }
  func.func @transform_6(%arg0: i32, %arg1: i32, %arg2: i32) -> (i32, i32) {
    %c0_i32 = arith.constant 0 : i32
    %c0_i32_0 = arith.constant 0 : i32
    %c0_i32_1 = arith.constant 0 : i32
    return %c0_i32, %c0_i32_0 : i32, i32
  }
  func.func @transform_7(%arg0: i32, %arg1: i32, %arg2: i32) -> (i32, i32) {
    %c0_i32 = arith.constant 0 : i32
    %c0_i32_0 = arith.constant 0 : i32
    %c0_i32_1 = arith.constant 0 : i32
    return %c0_i32, %c0_i32_0 : i32, i32
  }
  func.func @transform_8(%arg0: i32, %arg1: i32, %arg2: i32) -> (i32, i32) {
    %c0_i32 = arith.constant 0 : i32
    %c0_i32_0 = arith.constant 0 : i32
    %c0_i32_1 = arith.constant 0 : i32
    return %c0_i32, %c0_i32_0 : i32, i32
  }
  func.func @transform_9(%arg0: i32, %arg1: i32, %arg2: i32) -> (i32, i32) {
    %c0_i32 = arith.constant 0 : i32
    %c0_i32_0 = arith.constant 0 : i32
    %c0_i32_1 = arith.constant 0 : i32
    return %c0_i32, %c0_i32_0 : i32, i32
  }
  func.func @transform_10(%arg0: i32, %arg1: i32, %arg2: i32) -> (i32, i32) {
    %c0_i32 = arith.constant 0 : i32
    %c0_i32_0 = arith.constant 0 : i32
    %c0_i32_1 = arith.constant 0 : i32
    return %c0_i32, %c0_i32_0 : i32, i32
  }
  func.func @transform_11(%arg0: i32, %arg1: i32, %arg2: i32) -> (i32, i32) {
    %c0_i32 = arith.constant 0 : i32
    %c0_i32_0 = arith.constant 0 : i32
    %c0_i32_1 = arith.constant 0 : i32
    return %c0_i32, %c0_i32_0 : i32, i32
  }
  func.func @transform_12(%arg0: i32, %arg1: i32, %arg2: i32) -> (i32, i32) {
    %c0_i32 = arith.constant 0 : i32
    %c0_i32_0 = arith.constant 0 : i32
    %c0_i32_1 = arith.constant 0 : i32
    return %c0_i32, %c0_i32_0 : i32, i32
  }
  func.func @transform_13(%arg0: i32, %arg1: i32, %arg2: i32) -> (i32, i32) {
    %c0_i32 = arith.constant 0 : i32
    %c0_i32_0 = arith.constant 0 : i32
    %c0_i32_1 = arith.constant 0 : i32
    return %c0_i32, %c0_i32_0 : i32, i32
  }
  func.func @transform_14(%arg0: i32, %arg1: i32, %arg2: i32) -> (i32, i32) {
    %c0_i32 = arith.constant 0 : i32
    %c0_i32_0 = arith.constant 0 : i32
    %c0_i32_1 = arith.constant 0 : i32
    return %c0_i32, %c0_i32_0 : i32, i32
  }
  func.func @transform_15(%arg0: i32, %arg1: i32, %arg2: i32) -> (i32, i32) {
    %c0_i32 = arith.constant 0 : i32
    %c0_i32_0 = arith.constant 0 : i32
    %c0_i32_1 = arith.constant 0 : i32
    return %c0_i32, %c0_i32_0 : i32, i32
  }
  func.func @transform_16(%arg0: i32, %arg1: i32, %arg2: i32) -> (i32, i32, i32) {
    %c0_i32 = arith.constant 0 : i32
    %c0_i32_0 = arith.constant 0 : i32
    return %arg0, %arg1, %c0_i32 : i32, i32, i32
  }
}

module attributes {stable_mosaic.version = 11 : i64} {
  func.func @self_layers_kernel(%arg0: i32, %arg1: i32, %arg2: memref<2x8x32xf32, #tpu.memory_space<vmem>>, %arg3: memref<1x1x32xf32, #tpu.memory_space<vmem>>, %arg4: memref<1x1x32xf32, #tpu.memory_space<vmem>>, %arg5: memref<1x32x96xbf16, #tpu.memory_space<vmem>>, %arg6: memref<1x32x32xbf16, #tpu.memory_space<vmem>>, %arg7: memref<1x1x32xf32, #tpu.memory_space<vmem>>, %arg8: memref<1x1x32xf32, #tpu.memory_space<vmem>>, %arg9: memref<1x1x32xf32, #tpu.memory_space<vmem>>, %arg10: memref<1x32x128xbf16, #tpu.memory_space<vmem>>, %arg11: memref<1x1x128xf32, #tpu.memory_space<vmem>>, %arg12: memref<1x32x128xbf16, #tpu.memory_space<vmem>>, %arg13: memref<1x1x128xf32, #tpu.memory_space<vmem>>, %arg14: memref<1x128x32xbf16, #tpu.memory_space<vmem>>, %arg15: memref<1x1x32xf32, #tpu.memory_space<vmem>>, %arg16: memref<2x8x32xf32, #tpu.memory_space<vmem>>, %arg17: memref<2x8x32xf32, #tpu.memory_space<vmem>>) attributes {dimension_semantics = [#tpu.dimension_semantics<parallel>, #tpu.dimension_semantics<arbitrary>], iteration_bounds = array<i64: 2, 2>, scalar_prefetch = 0 : i64, scratch_operands = 1 : i64, tpu.core_type = #tpu.core_type<tc>, window_params = [{transform_indices = @transform_0, window_bounds = array<i64: 2, 8, 32>}, {transform_indices = @transform_1, window_bounds = array<i64: 1, 1, 32>}, {transform_indices = @transform_2, window_bounds = array<i64: 1, 1, 32>}, {transform_indices = @transform_3, window_bounds = array<i64: 1, 32, 96>}, {transform_indices = @transform_4, window_bounds = array<i64: 1, 32, 32>}, {transform_indices = @transform_5, window_bounds = array<i64: 1, 1, 32>}, {transform_indices = @transform_6, window_bounds = array<i64: 1, 1, 32>}, {transform_indices = @transform_7, window_bounds = array<i64: 1, 1, 32>}, {transform_indices = @transform_8, window_bounds = array<i64: 1, 32, 128>}, {transform_indices = @transform_9, window_bounds = array<i64: 1, 1, 128>}, {transform_indices = @transform_10, window_bounds = array<i64: 1, 32, 128>}, {transform_indices = @transform_11, window_bounds = array<i64: 1, 1, 128>}, {transform_indices = @transform_12, window_bounds = array<i64: 1, 128, 32>}, {transform_indices = @transform_13, window_bounds = array<i64: 1, 1, 32>}, {transform_indices = @transform_14, window_bounds = array<i64: 2, 8, 32>}]} {
    %c0_i32 = arith.constant 0 : i32
    %0 = arith.cmpi eq, %arg1, %c0_i32 : i32
    %1 = arith.extui %0 : i1 to i32
    %c0_i32_0 = arith.constant 0 : i32
    %2 = arith.cmpi ne, %1, %c0_i32_0 : i32
    scf.if %2 {
      %c0_72 = arith.constant 0 : index
      %c0_73 = arith.constant 0 : index
      %c0_74 = arith.constant 0 : index
      %153 = vector.load %arg2[%c0_72, %c0_73, %c0_74] : memref<2x8x32xf32, #tpu.memory_space<vmem>>, vector<2x8x32xf32>
      %c0_75 = arith.constant 0 : index
      %c0_76 = arith.constant 0 : index
      %c0_77 = arith.constant 0 : index
      %154 = vector.load %arg17[%c0_75, %c0_76, %c0_77] : memref<2x8x32xf32, #tpu.memory_space<vmem>>, vector<2x8x32xf32>
      tpu.vector_store %arg17[%c0_75, %c0_76, %c0_77], %153 {strides = array<i32>} : memref<2x8x32xf32, #tpu.memory_space<vmem>>, vector<2x8x32xf32>,
    } else {
    }
    %c0 = arith.constant 0 : index
    %c0_1 = arith.constant 0 : index
    %c0_2 = arith.constant 0 : index
    %3 = vector.load %arg17[%c0, %c0_1, %c0_2] : memref<2x8x32xf32, #tpu.memory_space<vmem>>, vector<2x8x32xf32>
    %4 = vector.shape_cast %3 : vector<2x8x32xf32> to vector<16x32xf32>
    %c0_3 = arith.constant 0 : index
    %c0_4 = arith.constant 0 : index
    %c0_5 = arith.constant 0 : index
    %5 = vector.load %arg3[%c0_3, %c0_4, %c0_5] : memref<1x1x32xf32, #tpu.memory_space<vmem>>, vector<1x1x32xf32>
    %6 = vector.shape_cast %5 : vector<1x1x32xf32> to vector<1x32xf32>
    %c0_6 = arith.constant 0 : index
    %c0_7 = arith.constant 0 : index
    %c0_8 = arith.constant 0 : index
    %7 = vector.load %arg4[%c0_6, %c0_7, %c0_8] : memref<1x1x32xf32, #tpu.memory_space<vmem>>, vector<1x1x32xf32>
    %8 = vector.shape_cast %7 : vector<1x1x32xf32> to vector<1x32xf32>
    %cst = arith.constant dense<0.000000e+00> : vector<16xf32>
    %9 = vector.multi_reduction <add>, %4, %cst [1] : vector<16x32xf32> to vector<16xf32>
    %10 = vector.shape_cast %9 : vector<16xf32> to vector<16x1xf32>
    %cst_9 = arith.constant 3.200000e+01 : f32
    %11 = vector.broadcast %cst_9 : f32 to vector<16x1xf32>
    %12 = arith.divf %10, %11 : vector<16x1xf32>
    %13 = vector.broadcast %12 : vector<16x1xf32> to vector<16x32xf32>
    %14 = arith.subf %4, %13 : vector<16x32xf32>
    %15 = arith.mulf %14, %14 : vector<16x32xf32>
    %cst_10 = arith.constant dense<0.000000e+00> : vector<16xf32>
    %16 = vector.multi_reduction <add>, %15, %cst_10 [1] : vector<16x32xf32> to vector<16xf32>
    %17 = vector.shape_cast %16 : vector<16xf32> to vector<16x1xf32>
    %cst_11 = arith.constant 3.200000e+01 : f32
    %18 = vector.broadcast %cst_11 : f32 to vector<16x1xf32>
    %19 = arith.divf %17, %18 : vector<16x1xf32>
    %20 = vector.broadcast %12 : vector<16x1xf32> to vector<16x32xf32>
    %21 = arith.subf %4, %20 : vector<16x32xf32>
    %cst_12 = arith.constant 9.99999974E-6 : f32
    %22 = vector.broadcast %cst_12 : f32 to vector<16x1xf32>
    %23 = arith.addf %19, %22 : vector<16x1xf32>
    %24 = math.rsqrt %23 : vector<16x1xf32>
    %25 = vector.broadcast %24 : vector<16x1xf32> to vector<16x32xf32>
    %26 = arith.mulf %21, %25 : vector<16x32xf32>
    %27 = vector.broadcast %6 : vector<1x32xf32> to vector<16x32xf32>
    %28 = arith.mulf %26, %27 : vector<16x32xf32>
    %29 = vector.broadcast %8 : vector<1x32xf32> to vector<16x32xf32>
    %30 = arith.addf %28, %29 : vector<16x32xf32>
    %31 = arith.truncf %30 : vector<16x32xf32> to vector<16x32xbf16>
    %c0_13 = arith.constant 0 : index
    %c0_14 = arith.constant 0 : index
    %c0_15 = arith.constant 0 : index
    %32 = vector.load %arg5[%c0_13, %c0_14, %c0_15] : memref<1x32x96xbf16, #tpu.memory_space<vmem>>, vector<1x32x96xbf16>
    %33 = vector.shape_cast %32 : vector<1x32x96xbf16> to vector<32x96xbf16>
    %cst_16 = arith.constant dense<0.000000e+00> : vector<16x96xf32>
    %34 = tpu.matmul %31, %33, %cst_16 {dimension_numbers = #tpu.dot_dimension_numbers<[1], [0], [0], [1], [0, 0, 1, 1], [], []>} : vector<16x32xbf16>, vector<32x96xbf16>, vector<16x96xf32> -> vector<16x96xf32>
    %35 = vector.shape_cast %34 : vector<16x96xf32> to vector<2x8x96xf32>
    %36 = vector.extract_strided_slice %35 {offsets = [0, 0, 0], sizes = [2, 8, 16], strides = [1, 1, 1]} : vector<2x8x96xf32> to vector<2x8x16xf32>
    %37 = arith.truncf %36 : vector<2x8x16xf32> to vector<2x8x16xbf16>
    %38 = vector.extract_strided_slice %35 {offsets = [0, 0, 32], sizes = [2, 8, 16], strides = [1, 1, 1]} : vector<2x8x96xf32> to vector<2x8x16xf32>
    %39 = arith.truncf %38 : vector<2x8x16xf32> to vector<2x8x16xbf16>
    %40 = vector.extract_strided_slice %35 {offsets = [0, 0, 64], sizes = [2, 8, 16], strides = [1, 1, 1]} : vector<2x8x96xf32> to vector<2x8x16xf32>
    %41 = arith.truncf %40 : vector<2x8x16xf32> to vector<2x8x16xbf16>
    "tpu.trace_start"() <{level = 10 : i32, message = "bqd,bkd->bqk"}> : () -> ()
    %cst_17 = arith.constant dense<0.000000e+00> : vector<2x8x8xf32>
    %42 = tpu.matmul %37, %39, %cst_17 {dimension_numbers = #tpu.dot_dimension_numbers<[2], [2], [1], [1], [0, 0, 0, 1, 1, 1], [0], [0]>} : vector<2x8x16xbf16>, vector<2x8x16xbf16>, vector<2x8x8xf32> -> vector<2x8x8xf32>
    "tpu.trace_stop"() : () -> ()
    %cst_18 = arith.constant dense<0xFF800000> : vector<2x8xf32>
    %43 = vector.multi_reduction <maximumf>, %42, %cst_18 [2] : vector<2x8x8xf32> to vector<2x8xf32>
    %44 = vector.shape_cast %43 : vector<2x8xf32> to vector<2x8x1xf32>
    %45 = vector.broadcast %44 : vector<2x8x1xf32> to vector<2x8x8xf32>
    %46 = arith.subf %42, %45 : vector<2x8x8xf32>
    %47 = math.exp %46 : vector<2x8x8xf32>
    %cst_19 = arith.constant dense<0.000000e+00> : vector<2x8xf32>
    %48 = vector.multi_reduction <add>, %47, %cst_19 [2] : vector<2x8x8xf32> to vector<2x8xf32>
    %49 = vector.shape_cast %48 : vector<2x8xf32> to vector<2x8x1xf32>
    %50 = arith.truncf %47 : vector<2x8x8xf32> to vector<2x8x8xbf16>
    "tpu.trace_start"() <{level = 10 : i32, message = "bqk,bkd->bqd"}> : () -> ()
    %cst_20 = arith.constant dense<0.000000e+00> : vector<2x8x16xf32>
    %51 = tpu.matmul %50, %41, %cst_20 {dimension_numbers = #tpu.dot_dimension_numbers<[2], [1], [1], [2], [0, 0, 0, 1, 1, 2], [0], [0]>} : vector<2x8x8xbf16>, vector<2x8x16xbf16>, vector<2x8x16xf32> -> vector<2x8x16xf32>
    "tpu.trace_stop"() : () -> ()
    %52 = tpu.reciprocal %49 {approx = true} : vector<2x8x1xf32> -> vector<2x8x1xf32>
    %53 = vector.broadcast %52 : vector<2x8x1xf32> to vector<2x8x16xf32>
    %54 = arith.mulf %51, %53 : vector<2x8x16xf32>
    %55 = vector.shape_cast %54 : vector<2x8x16xf32> to vector<16x16xf32>
    %56 = arith.truncf %55 : vector<16x16xf32> to vector<16x16xbf16>
    %57 = vector.extract_strided_slice %35 {offsets = [0, 0, 16], sizes = [2, 8, 16], strides = [1, 1, 1]} : vector<2x8x96xf32> to vector<2x8x16xf32>
    %58 = arith.truncf %57 : vector<2x8x16xf32> to vector<2x8x16xbf16>
    %59 = vector.extract_strided_slice %35 {offsets = [0, 0, 48], sizes = [2, 8, 16], strides = [1, 1, 1]} : vector<2x8x96xf32> to vector<2x8x16xf32>
    %60 = arith.truncf %59 : vector<2x8x16xf32> to vector<2x8x16xbf16>
    %61 = vector.extract_strided_slice %35 {offsets = [0, 0, 80], sizes = [2, 8, 16], strides = [1, 1, 1]} : vector<2x8x96xf32> to vector<2x8x16xf32>
    %62 = arith.truncf %61 : vector<2x8x16xf32> to vector<2x8x16xbf16>
    "tpu.trace_start"() <{level = 10 : i32, message = "bqd,bkd->bqk"}> : () -> ()
    %cst_21 = arith.constant dense<0.000000e+00> : vector<2x8x8xf32>
    %63 = tpu.matmul %58, %60, %cst_21 {dimension_numbers = #tpu.dot_dimension_numbers<[2], [2], [1], [1], [0, 0, 0, 1, 1, 1], [0], [0]>} : vector<2x8x16xbf16>, vector<2x8x16xbf16>, vector<2x8x8xf32> -> vector<2x8x8xf32>
    "tpu.trace_stop"() : () -> ()
    %cst_22 = arith.constant dense<0xFF800000> : vector<2x8xf32>
    %64 = vector.multi_reduction <maximumf>, %63, %cst_22 [2] : vector<2x8x8xf32> to vector<2x8xf32>
    %65 = vector.shape_cast %64 : vector<2x8xf32> to vector<2x8x1xf32>
    %66 = vector.broadcast %65 : vector<2x8x1xf32> to vector<2x8x8xf32>
    %67 = arith.subf %63, %66 : vector<2x8x8xf32>
    %68 = math.exp %67 : vector<2x8x8xf32>
    %cst_23 = arith.constant dense<0.000000e+00> : vector<2x8xf32>
    %69 = vector.multi_reduction <add>, %68, %cst_23 [2] : vector<2x8x8xf32> to vector<2x8xf32>
    %70 = vector.shape_cast %69 : vector<2x8xf32> to vector<2x8x1xf32>
    %71 = arith.truncf %68 : vector<2x8x8xf32> to vector<2x8x8xbf16>
    "tpu.trace_start"() <{level = 10 : i32, message = "bqk,bkd->bqd"}> : () -> ()
    %cst_24 = arith.constant dense<0.000000e+00> : vector<2x8x16xf32>
    %72 = tpu.matmul %71, %62, %cst_24 {dimension_numbers = #tpu.dot_dimension_numbers<[2], [1], [1], [2], [0, 0, 0, 1, 1, 2], [0], [0]>} : vector<2x8x8xbf16>, vector<2x8x16xbf16>, vector<2x8x16xf32> -> vector<2x8x16xf32>
    "tpu.trace_stop"() : () -> ()
    %73 = tpu.reciprocal %70 {approx = true} : vector<2x8x1xf32> -> vector<2x8x1xf32>
    %74 = vector.broadcast %73 : vector<2x8x1xf32> to vector<2x8x16xf32>
    %75 = arith.mulf %72, %74 : vector<2x8x16xf32>
    %76 = vector.shape_cast %75 : vector<2x8x16xf32> to vector<16x16xf32>
    %77 = arith.truncf %76 : vector<16x16xf32> to vector<16x16xbf16>
    %78 = tpu.concatenate %56, %77 in 1 : vector<16x16xbf16>, vector<16x16xbf16> -> vector<16x32xbf16>
    %c0_25 = arith.constant 0 : index
    %c0_26 = arith.constant 0 : index
    %c0_27 = arith.constant 0 : index
    %79 = vector.load %arg6[%c0_25, %c0_26, %c0_27] : memref<1x32x32xbf16, #tpu.memory_space<vmem>>, vector<1x32x32xbf16>
    %80 = vector.shape_cast %79 : vector<1x32x32xbf16> to vector<32x32xbf16>
    %cst_28 = arith.constant dense<0.000000e+00> : vector<16x32xf32>
    %81 = tpu.matmul %78, %80, %cst_28 {dimension_numbers = #tpu.dot_dimension_numbers<[1], [0], [0], [1], [0, 0, 1, 1], [], []>} : vector<16x32xbf16>, vector<32x32xbf16>, vector<16x32xf32> -> vector<16x32xf32>
    %82 = arith.addf %4, %81 : vector<16x32xf32>
    %c0_29 = arith.constant 0 : index
    %c0_30 = arith.constant 0 : index
    %c0_31 = arith.constant 0 : index
    %83 = vector.load %arg7[%c0_29, %c0_30, %c0_31] : memref<1x1x32xf32, #tpu.memory_space<vmem>>, vector<1x1x32xf32>
    %84 = vector.shape_cast %83 : vector<1x1x32xf32> to vector<1x32xf32>
    %85 = vector.broadcast %84 : vector<1x32xf32> to vector<16x32xf32>
    %86 = arith.addf %82, %85 : vector<16x32xf32>
    %c0_32 = arith.constant 0 : index
    %c0_33 = arith.constant 0 : index
    %c0_34 = arith.constant 0 : index
    %87 = vector.load %arg8[%c0_32, %c0_33, %c0_34] : memref<1x1x32xf32, #tpu.memory_space<vmem>>, vector<1x1x32xf32>
    %88 = vector.shape_cast %87 : vector<1x1x32xf32> to vector<1x32xf32>
    %c0_35 = arith.constant 0 : index
    %c0_36 = arith.constant 0 : index
    %c0_37 = arith.constant 0 : index
    %89 = vector.load %arg9[%c0_35, %c0_36, %c0_37] : memref<1x1x32xf32, #tpu.memory_space<vmem>>, vector<1x1x32xf32>
    %90 = vector.shape_cast %89 : vector<1x1x32xf32> to vector<1x32xf32>
    %cst_38 = arith.constant dense<0.000000e+00> : vector<16xf32>
    %91 = vector.multi_reduction <add>, %86, %cst_38 [1] : vector<16x32xf32> to vector<16xf32>
    %92 = vector.shape_cast %91 : vector<16xf32> to vector<16x1xf32>
    %cst_39 = arith.constant 3.200000e+01 : f32
    %93 = vector.broadcast %cst_39 : f32 to vector<16x1xf32>
    %94 = arith.divf %92, %93 : vector<16x1xf32>
    %95 = vector.broadcast %94 : vector<16x1xf32> to vector<16x32xf32>
    %96 = arith.subf %86, %95 : vector<16x32xf32>
    %97 = arith.mulf %96, %96 : vector<16x32xf32>
    %cst_40 = arith.constant dense<0.000000e+00> : vector<16xf32>
    %98 = vector.multi_reduction <add>, %97, %cst_40 [1] : vector<16x32xf32> to vector<16xf32>
    %99 = vector.shape_cast %98 : vector<16xf32> to vector<16x1xf32>
    %cst_41 = arith.constant 3.200000e+01 : f32
    %100 = vector.broadcast %cst_41 : f32 to vector<16x1xf32>
    %101 = arith.divf %99, %100 : vector<16x1xf32>
    %102 = vector.broadcast %94 : vector<16x1xf32> to vector<16x32xf32>
    %103 = arith.subf %86, %102 : vector<16x32xf32>
    %cst_42 = arith.constant 9.99999974E-6 : f32
    %104 = vector.broadcast %cst_42 : f32 to vector<16x1xf32>
    %105 = arith.addf %101, %104 : vector<16x1xf32>
    %106 = math.rsqrt %105 : vector<16x1xf32>
    %107 = vector.broadcast %106 : vector<16x1xf32> to vector<16x32xf32>
    %108 = arith.mulf %103, %107 : vector<16x32xf32>
    %109 = vector.broadcast %88 : vector<1x32xf32> to vector<16x32xf32>
    %110 = arith.mulf %108, %109 : vector<16x32xf32>
    %111 = vector.broadcast %90 : vector<1x32xf32> to vector<16x32xf32>
    %112 = arith.addf %110, %111 : vector<16x32xf32>
    %113 = arith.truncf %112 : vector<16x32xf32> to vector<16x32xbf16>
    %c0_43 = arith.constant 0 : index
    %c0_44 = arith.constant 0 : index
    %c0_45 = arith.constant 0 : index
    %114 = vector.load %arg10[%c0_43, %c0_44, %c0_45] : memref<1x32x128xbf16, #tpu.memory_space<vmem>>, vector<1x32x128xbf16>
    %115 = vector.shape_cast %114 : vector<1x32x128xbf16> to vector<32x128xbf16>
    %cst_46 = arith.constant dense<0.000000e+00> : vector<16x128xf32>
    %116 = tpu.matmul %113, %115, %cst_46 {dimension_numbers = #tpu.dot_dimension_numbers<[1], [0], [0], [1], [0, 0, 1, 1], [], []>} : vector<16x32xbf16>, vector<32x128xbf16>, vector<16x128xf32> -> vector<16x128xf32>
    %c0_47 = arith.constant 0 : index
    %c0_48 = arith.constant 0 : index
    %c0_49 = arith.constant 0 : index
    %117 = vector.load %arg11[%c0_47, %c0_48, %c0_49] : memref<1x1x128xf32, #tpu.memory_space<vmem>>, vector<1x1x128xf32>
    %118 = vector.shape_cast %117 : vector<1x1x128xf32> to vector<1x128xf32>
    %119 = vector.broadcast %118 : vector<1x128xf32> to vector<16x128xf32>
    %120 = arith.addf %116, %119 : vector<16x128xf32>
    %c0_50 = arith.constant 0 : index
    %c0_51 = arith.constant 0 : index
    %c0_52 = arith.constant 0 : index
    %121 = vector.load %arg12[%c0_50, %c0_51, %c0_52] : memref<1x32x128xbf16, #tpu.memory_space<vmem>>, vector<1x32x128xbf16>
    %122 = vector.shape_cast %121 : vector<1x32x128xbf16> to vector<32x128xbf16>
    %cst_53 = arith.constant dense<0.000000e+00> : vector<16x128xf32>
    %123 = tpu.matmul %113, %122, %cst_53 {dimension_numbers = #tpu.dot_dimension_numbers<[1], [0], [0], [1], [0, 0, 1, 1], [], []>} : vector<16x32xbf16>, vector<32x128xbf16>, vector<16x128xf32> -> vector<16x128xf32>
    %c0_54 = arith.constant 0 : index
    %c0_55 = arith.constant 0 : index
    %c0_56 = arith.constant 0 : index
    %124 = vector.load %arg13[%c0_54, %c0_55, %c0_56] : memref<1x1x128xf32, #tpu.memory_space<vmem>>, vector<1x1x128xf32>
    %125 = vector.shape_cast %124 : vector<1x1x128xf32> to vector<1x128xf32>
    %126 = vector.broadcast %125 : vector<1x128xf32> to vector<16x128xf32>
    %127 = arith.addf %123, %126 : vector<16x128xf32>
    %cst_57 = arith.constant 5.000000e-01 : f32
    %128 = vector.broadcast %cst_57 : f32 to vector<16x128xf32>
    %129 = arith.mulf %128, %127 : vector<16x128xf32>
    %cst_58 = arith.constant 2.000000e+00 : f32
    %130 = math.sqrt %cst_58 : f32
    %cst_59 = arith.constant 1.000000e+00 : f32
    %131 = arith.divf %cst_59, %130 : f32
    %132 = vector.broadcast %131 : f32 to vector<16x128xf32>
    %133 = arith.mulf %127, %132 : vector<16x128xf32>
    %134 = math.erf %133 : vector<16x128xf32>
    %cst_60 = arith.constant 1.000000e+00 : f32
    %135 = vector.broadcast %cst_60 : f32 to vector<16x128xf32>
    %136 = arith.addf %135, %134 : vector<16x128xf32>
    %137 = arith.mulf %129, %136 : vector<16x128xf32>
    %138 = arith.mulf %120, %137 : vector<16x128xf32>
    %139 = arith.truncf %138 : vector<16x128xf32> to vector<16x128xbf16>
    %c0_61 = arith.constant 0 : index
    %c0_62 = arith.constant 0 : index
    %c0_63 = arith.constant 0 : index
    %140 = vector.load %arg14[%c0_61, %c0_62, %c0_63] : memref<1x128x32xbf16, #tpu.memory_space<vmem>>, vector<1x128x32xbf16>
    %141 = vector.shape_cast %140 : vector<1x128x32xbf16> to vector<128x32xbf16>
    %cst_64 = arith.constant dense<0.000000e+00> : vector<16x32xf32>
    %142 = tpu.matmul %139, %141, %cst_64 {dimension_numbers = #tpu.dot_dimension_numbers<[1], [0], [0], [1], [0, 0, 1, 1], [], []>} : vector<16x128xbf16>, vector<128x32xbf16>, vector<16x32xf32> -> vector<16x32xf32>
    %143 = arith.addf %86, %142 : vector<16x32xf32>
    %c0_65 = arith.constant 0 : index
    %c0_66 = arith.constant 0 : index
    %c0_67 = arith.constant 0 : index
    %144 = vector.load %arg15[%c0_65, %c0_66, %c0_67] : memref<1x1x32xf32, #tpu.memory_space<vmem>>, vector<1x1x32xf32>
    %145 = vector.shape_cast %144 : vector<1x1x32xf32> to vector<1x32xf32>
    %146 = vector.broadcast %145 : vector<1x32xf32> to vector<16x32xf32>
    %147 = arith.addf %143, %146 : vector<16x32xf32>
    %148 = vector.shape_cast %147 : vector<16x32xf32> to vector<2x8x32xf32>
    %c0_68 = arith.constant 0 : index
    %c0_69 = arith.constant 0 : index
    %c0_70 = arith.constant 0 : index
    %149 = vector.load %arg17[%c0_68, %c0_69, %c0_70] : memref<2x8x32xf32, #tpu.memory_space<vmem>>, vector<2x8x32xf32>
    tpu.vector_store %arg17[%c0_68, %c0_69, %c0_70], %148 {strides = array<i32>} : memref<2x8x32xf32, #tpu.memory_space<vmem>>, vector<2x8x32xf32>,
    %c1_i32 = arith.constant 1 : i32
    %150 = arith.cmpi eq, %arg1, %c1_i32 : i32
    %151 = arith.extui %150 : i1 to i32
    %c0_i32_71 = arith.constant 0 : i32
    %152 = arith.cmpi ne, %151, %c0_i32_71 : i32
    scf.if %152 {
      %153 = vector.shape_cast %147 : vector<16x32xf32> to vector<2x8x32xf32>
      %c0_72 = arith.constant 0 : index
      %c0_73 = arith.constant 0 : index
      %c0_74 = arith.constant 0 : index
      %154 = vector.load %arg16[%c0_72, %c0_73, %c0_74] : memref<2x8x32xf32, #tpu.memory_space<vmem>>, vector<2x8x32xf32>
      tpu.vector_store %arg16[%c0_72, %c0_73, %c0_74], %153 {strides = array<i32>} : memref<2x8x32xf32, #tpu.memory_space<vmem>>, vector<2x8x32xf32>,
    } else {
    }
    return
  }
  func.func @transform_0(%arg0: i32, %arg1: i32) -> (i32, i32, i32) {
    %c0_i32 = arith.constant 0 : i32
    %c0_i32_0 = arith.constant 0 : i32
    %c0_i32_1 = arith.constant 0 : i32
    return %arg0, %c0_i32, %c0_i32_0 : i32, i32, i32
  }
  func.func @transform_1(%arg0: i32, %arg1: i32) -> (i32, i32, i32) {
    %c0_i32 = arith.constant 0 : i32
    %c0_i32_0 = arith.constant 0 : i32
    %c0_i32_1 = arith.constant 0 : i32
    return %arg1, %c0_i32, %c0_i32_0 : i32, i32, i32
  }
  func.func @transform_2(%arg0: i32, %arg1: i32) -> (i32, i32, i32) {
    %c0_i32 = arith.constant 0 : i32
    %c0_i32_0 = arith.constant 0 : i32
    %c0_i32_1 = arith.constant 0 : i32
    return %arg1, %c0_i32, %c0_i32_0 : i32, i32, i32
  }
  func.func @transform_3(%arg0: i32, %arg1: i32) -> (i32, i32, i32) {
    %c0_i32 = arith.constant 0 : i32
    %c0_i32_0 = arith.constant 0 : i32
    %c0_i32_1 = arith.constant 0 : i32
    return %arg1, %c0_i32, %c0_i32_0 : i32, i32, i32
  }
  func.func @transform_4(%arg0: i32, %arg1: i32) -> (i32, i32, i32) {
    %c0_i32 = arith.constant 0 : i32
    %c0_i32_0 = arith.constant 0 : i32
    %c0_i32_1 = arith.constant 0 : i32
    return %arg1, %c0_i32, %c0_i32_0 : i32, i32, i32
  }
  func.func @transform_5(%arg0: i32, %arg1: i32) -> (i32, i32, i32) {
    %c0_i32 = arith.constant 0 : i32
    %c0_i32_0 = arith.constant 0 : i32
    %c0_i32_1 = arith.constant 0 : i32
    return %arg1, %c0_i32, %c0_i32_0 : i32, i32, i32
  }
  func.func @transform_6(%arg0: i32, %arg1: i32) -> (i32, i32, i32) {
    %c0_i32 = arith.constant 0 : i32
    %c0_i32_0 = arith.constant 0 : i32
    %c0_i32_1 = arith.constant 0 : i32
    return %arg1, %c0_i32, %c0_i32_0 : i32, i32, i32
  }
  func.func @transform_7(%arg0: i32, %arg1: i32) -> (i32, i32, i32) {
    %c0_i32 = arith.constant 0 : i32
    %c0_i32_0 = arith.constant 0 : i32
    %c0_i32_1 = arith.constant 0 : i32
    return %arg1, %c0_i32, %c0_i32_0 : i32, i32, i32
  }
  func.func @transform_8(%arg0: i32, %arg1: i32) -> (i32, i32, i32) {
    %c0_i32 = arith.constant 0 : i32
    %c0_i32_0 = arith.constant 0 : i32
    %c0_i32_1 = arith.constant 0 : i32
    return %arg1, %c0_i32, %c0_i32_0 : i32, i32, i32
  }
  func.func @transform_9(%arg0: i32, %arg1: i32) -> (i32, i32, i32) {
    %c0_i32 = arith.constant 0 : i32
    %c0_i32_0 = arith.constant 0 : i32
    %c0_i32_1 = arith.constant 0 : i32
    return %arg1, %c0_i32, %c0_i32_0 : i32, i32, i32
  }
  func.func @transform_10(%arg0: i32, %arg1: i32) -> (i32, i32, i32) {
    %c0_i32 = arith.constant 0 : i32
    %c0_i32_0 = arith.constant 0 : i32
    %c0_i32_1 = arith.constant 0 : i32
    return %arg1, %c0_i32, %c0_i32_0 : i32, i32, i32
  }
  func.func @transform_11(%arg0: i32, %arg1: i32) -> (i32, i32, i32) {
    %c0_i32 = arith.constant 0 : i32
    %c0_i32_0 = arith.constant 0 : i32
    %c0_i32_1 = arith.constant 0 : i32
    return %arg1, %c0_i32, %c0_i32_0 : i32, i32, i32
  }
  func.func @transform_12(%arg0: i32, %arg1: i32) -> (i32, i32, i32) {
    %c0_i32 = arith.constant 0 : i32
    %c0_i32_0 = arith.constant 0 : i32
    %c0_i32_1 = arith.constant 0 : i32
    return %arg1, %c0_i32, %c0_i32_0 : i32, i32, i32
  }
  func.func @transform_13(%arg0: i32, %arg1: i32) -> (i32, i32, i32) {
    %c0_i32 = arith.constant 0 : i32
    %c0_i32_0 = arith.constant 0 : i32
    %c0_i32_1 = arith.constant 0 : i32
    return %arg1, %c0_i32, %c0_i32_0 : i32, i32, i32
  }
  func.func @transform_14(%arg0: i32, %arg1: i32) -> (i32, i32, i32) {
    %c0_i32 = arith.constant 0 : i32
    %c0_i32_0 = arith.constant 0 : i32
    %c0_i32_1 = arith.constant 0 : i32
    return %arg0, %c0_i32, %c0_i32_0 : i32, i32, i32
  }
}

</mosaic_0001>

<bundles_post_ra>
// kernel: _lambda_.2
= control target key start
LH: loop header
LB: loop body
LE: loop exit
PB: predicated region body
PF: predicated region fallthrough
CT: control target
= control target key end

     0   :  { %s2043_s0 = inlined_call_operand.hbm [shape: bf16[8,16], index: 0, kind: input, shape index: {}]   ;;  %s2044_s1 = inlined_call_operand.hbm [shape: f32[8,32], index: 1, kind: input, shape index: {}]   ;;  %s2045_s2 = inlined_call_operand.vmem [shape: bf16[4,16,32], index: 2, kind: input, shape index: {}]   ;;  %s2046_s3 = inlined_call_operand.hbm [shape: f32[1,32], index: 3, kind: input, shape index: {}]   ;;  %s2047_s4 = inlined_call_operand.vmem [shape: f32[1,32], index: 4, kind: input, shape index: {}]   ;;  %s2048_s5 = inlined_call_operand.vmem [shape: bf16[32,32], index: 5, kind: input, shape index: {}]   ;;  %s2049_s6 = inlined_call_operand.vmem [shape: bf16[16,32], index: 6, kind: input, shape index: {}]   ;;  %s2050_s7 = inlined_call_operand.vmem [shape: f32[1,32], index: 7, kind: input, shape index: {}]   ;;  %s2051_s8 = inlined_call_operand.vmem [shape: f32[1,32], index: 8, kind: input, shape index: {}]   ;;  %s2052_s9 = inlined_call_operand.vmem [shape: f32[1,32], index: 9, kind: input, shape index: {}]   ;;  %s2053_s10 = inlined_call_operand.vmem [shape: bf16[32,128], index: 10, kind: input, shape index: {}]   ;;  %s2054_s11 = inlined_call_operand.vmem [shape: f32[1,128], index: 11, kind: input, shape index: {}]   ;;  %s2055_s12 = inlined_call_operand.vmem [shape: bf16[32,128], index: 12, kind: input, shape index: {}]   ;;  %s2056_s13 = inlined_call_operand.vmem [shape: f32[1,128], index: 13, kind: input, shape index: {}]   ;;  %s2057_s14 = inlined_call_operand.vmem [shape: bf16[128,32], index: 14, kind: input, shape index: {}]   ;;  %s2058_s15 = inlined_call_operand.vmem [shape: f32[1,32], index: 15, kind: input, shape index: {}]   ;;  %s2059_s16 = inlined_call_operand.vmem [shape: f32[4,8,32], index: 16, kind: output, shape index: {}]  }
   0x1   :  { %2066 = sst [smem:[#allocation14_spill]] %s2043_s0 }
   0x2   :  { %2067 = sst [smem:[#allocation15_spill]] %s2054_s11 }
   0x3   :  { %2068 = sst [smem:[#allocation16_spill]] %s2056_s13 }
   0x4   :  { %2069 = sst [smem:[#allocation17_spill]] %s2058_s15 }
   0x5   :  { %2070 = sst [smem:[#allocation18_spill]] %s2059_s16 }
   0x6   :  { %21 = vsyncpa [#allocation6], 0 }
   0x7   :  { %22 = vsyncpa [#allocation8], 0  ;;  %s1773_s21 = smov 0   ;;  %s1775_s22 = smov 0  }
   0x8   :  { %s1777_s23 = smov 0  }
   0x9 LB: > { %2071 = sst [smem:[#allocation12_spill]] %s1674_s22  ;;  %s1680_s24 = smov [#allocation7]   ;;  %s1678_s23 = sphi %s1777_s23, %s28_s23   ;;  %s1674_s22 = sphi %s1775_s22, %s2088_s22   ;;  %s1670_s21 = sphi %s1773_s21, %s2087_s21  }
   0xa   : > { %2072 = sst [smem:[#allocation13_spill]] %s1678_s23  ;;  %s461_s25 = sshll.u32 %s1680_s24, 4  ;;  %s462_s25 = int_to_ptr.vmem [resolvable:$true] %s461_s25 }
   0xb   : > { %s1337_s26 = sadd.s32 4294967295, %s1678_s23   ;;  %p1339_p0 = scmp.ge.s32.totalorder %s1678_s23, 1 }
   0xc   : > { %p433_p1 = scmp.lt.s32.totalorder %s1678_s23, 5  ;;  %p1791_p2 = scmp.eq.s32.totalorder %s1337_s26, 0 }
   0xd   : > { %s47_s29 = sadd.s32 1, %s1674_s22  ;;  %s1681_s17 = smov [#allocation5]  }
   0xe   : > { %s2073_s27 = scalar_select %p1791_p2, 1, 0 }
   0xf   : > { %p1795_p3 = pnand %p1339_p0, %p433_p1  ;;  %p1808_p6 = scmp.ge.s32.totalorder %s47_s29, 4 }
  0x10   : > { %s448_s18 = sshll.u32 %s1681_s17, 4  ;;  %s1564_s24 = scalar_lea.hbm %s2044_s1, 128  ;;  %s1812_s18 = int_to_ptr.vmem [resolvable:$true] %s448_s18 }
  0x11   : > { %s2074_s28 = scalar_select %p1795_p3, 1, 0 }
  0x12   : > { %p1485_p4 = pneg %p1795_p3  ;;  %p1565_p7 = scmp.ne.s32.totalorder %s2044_s1, %s1564_s24 }
  0x13   : > { %s2076_s0 = scalar_select %p1808_p6, 1, 0 }
  0x14   : > { %p1804_p5 = pnand %p1791_p2, %p1485_p4  ;;  %p1571_p11 = scmp.lt.u32.totalorder %s1564_s24, %s2044_s1 }
  0x16   : > { %p1822_p8 = pneg %p1804_p5 }
  0x18   : > { %p1567_p9 = pnand %p1822_p8, %p1565_p7 }
  0x1a   : > { %p1568_p10 = pneg %p1567_p9 }
  0x1c   : > { %p1573_p12 = pnand %p1571_p11, %p1568_p10 }
  0x1e   : > { %1576 = shalt.err (!%p1573_p12)
}
  0x1f   : > { %s1577_s19 = scalar_lea.vmem %s462_s25, 128  ;;  %p1585_p4 = scmp.lt.s32.totalorder %s462_s25, %s462_s25 }
  0x20   : > { %p1578_p13 = scmp.ne.s32.totalorder %s462_s25, %s1577_s19  ;;  %p1586_p2 = scmp.lt.s32.totalorder %s1577_s19, %s1577_s19 }
  0x22   : > { %p1580_p0 = pnand %p1578_p13, %p1822_p8  ;;  %p1587_p3 = por %p1586_p2, %p1585_p4 }
  0x24   : > { %p1581_p1 = pneg %p1580_p0 }
  0x26   : > { %p1588_p6 = pnand %p1587_p3, %p1581_p1 }
  0x28   : > { %1591 = shalt.err (!%p1588_p6)
}
  0x29   : > { %1491 = dma.hbm_to_vmem [thread:$0]  (!%p1804_p5), %s2044_s1, 128, %s462_s25, [#allocation8]  }
  0x2a   : > { %p2078_p7 = scmp.ne.s32.totalorder %s2076_s0, 0  ;;  %s2079_s26 = sld [smem:[#allocation14_spill]] }
  0x2c   : > { %s2090_s29 = smov (%p2078_p7, %s47_s29), 0 }
  0x30   : > { %s1592_s17 = scalar_lea.hbm %s2079_s26, 64 }
  0x31   : > { %p1593_p2 = scmp.ne.s32.totalorder %s2079_s26, %s1592_s17  ;;  %p1599_p9 = scmp.lt.u32.totalorder %s1592_s17, %s2079_s26 }
  0x33   : > { %p1595_p3 = pnand %p1593_p2, %p1822_p8 }
  0x35   : > { %p1596_p6 = pneg %p1595_p3 }
  0x37   : > { %p1601_p10 = pnand %p1599_p9, %p1596_p6 }
  0x39   : > { %1604 = shalt.err (!%p1601_p10)
}
  0x3a   : > { %s1605_s25 = scalar_lea.vmem %s1812_s18, 64  ;;  %p1613_p0 = scmp.lt.s32.totalorder %s1812_s18, %s1812_s18 }
  0x3b   : > { %p1606_p11 = scmp.ne.s32.totalorder %s1812_s18, %s1605_s25  ;;  %p1614_p1 = scmp.lt.s32.totalorder %s1605_s25, %s1605_s25 }
  0x3d   : > { %p1608_p12 = pnand %p1606_p11, %p1822_p8  ;;  %p1615_p4 = por %p1614_p1, %p1613_p0 }
  0x3f   : > { %p1609_p13 = pneg %p1608_p12 }
  0x41   : > { %p1616_p7 = pnand %p1615_p4, %p1609_p13 }
  0x43   : > { %1619 = shalt.err (!%p1616_p7)
}
  0x44   : > { %1488 = dma.hbm_to_vmem [thread:$0]  (!%p1804_p5), %s2079_s26, 64, %s1812_s18, [#allocation6]  }
  0x45   : > { %s1682_s15 = smov [#allocation9]   ;;  %s1620_s16 = scalar_lea.hbm %s2046_s3, 16 }
  0x46   : > { %s472_s0 = sshll.u32 %s1682_s15, 4  ;;  %p1621_p2 = scmp.ne.s32.totalorder %s2046_s3, %s1620_s16  ;;  %s473_s0 = int_to_ptr.vmem [resolvable:$true] %s472_s0 }
  0x47   : > { %p1627_p9 = scmp.lt.u32.totalorder %s1620_s16, %s2046_s3 }
  0x48   : > { %p1623_p3 = pnand %p1621_p2, %p1822_p8 }
  0x4a   : > { %p1624_p6 = pneg %p1623_p3 }
  0x4c   : > { %p1629_p10 = pnand %p1627_p9, %p1624_p6 }
  0x4e   : > { %1632 = shalt.err (!%p1629_p10)
}
  0x4f   : > { %s1633_s18 = scalar_lea.vmem %s473_s0, 16  ;;  %s1640_s11 = scalar_lea.vmem %s473_s0, 32 }
  0x50   : > { %p1634_p11 = scmp.ne.s32.totalorder %s473_s0, %s1633_s18  ;;  %p1641_p0 = scmp.lt.s32.totalorder %s473_s0, %s473_s0 }
  0x51   : > { %p1642_p1 = scmp.lt.s32.totalorder %s1640_s11, %s1633_s18 }
  0x52   : > { %p1636_p12 = pnand %p1634_p11, %p1822_p8 }
  0x53   : > { %p1643_p4 = por %p1642_p1, %p1641_p0 }
  0x54   : > { %p1637_p13 = pneg %p1636_p12 }
  0x56   : > { %p1644_p7 = pnand %p1643_p4, %p1637_p13 }
  0x58   : > { %1647 = shalt.err (!%p1644_p7)
}
  0x59   : > { %1494 = dma.hbm_to_vmem [thread:$0]  (!%p1804_p5), %s2046_s3, 16, %s473_s0, [#allocation8]  }
  0x5a   : > { %p2080_p2 = scmp.ne.s32.totalorder %s2074_s28, 0 }
  0x5b   : > { %p2081_p3 = scmp.ne.s32.totalorder (!%p2080_p2), %s2073_s27, 0 }
  0x5c   : > { %534 = sbr.rel (%p2080_p2) target bundleno = 2432 (0x980), region = 84 }
  0x63   : > { %1661 = dma.done.wait (%p2081_p3), [#allocation6], 64  }
  0x64   : > { %1663 = vsyncadd (%p2081_p3), [#allocation6], 4294967232 }
  0x65   : > { %1665 = dma.done.wait (%p2081_p3), [#allocation8], 144  }
  0x66   : > { %1667 = vsyncadd (%p2081_p3), [#allocation8], 4294967152  ;;  %p599_p8 = scmp.lt.s32.totalorder %s1670_s21, 3  ;;  %vm631_vm0 = vcmask 261120   ;;  %v1535_v15 = vld [vmem:[%s2048_s5] sm:$0xff]   ;;  %v1683_v16 = vmov 0.0  }
  0x67   : > { %1411 = vmatprep.subr.bf16.mxu1 %v1683_v16  ;;  %1437 = vmatprep.subr.bf16.mxu0 %v1683_v16  ;;  %v1536_v17 = vld [vmem:[%s2048_s5 + $0x8] sm:$0xff]   ;;  %vm1684_vm1 = vmmov 0   ;;  %v1351_v26 = vld [vmem:[#allocation9] ss:$0 sm:$0xff]  ;;  %v1352_v30 = vld [vmem:[%s2047_s4] ss:$0 sm:$0xff] }
  0x68   : > { %s2092_s21 = smov (!%p599_p8, %s1670_s21), 3  ;;  %1412 = vmatpush3.bf16.msra.mxu1 %v1535_v15  ;;  %1415 = vmatprep.mubr.msk.bf16.mxu1 %vm1684_vm1, %v1683_v16  ;;  %vm623_vm2 = vcmask 130048   ;;  %v736_v41 = vld [vmem:[#allocation5] sm:$0xf]  ;;  %vm620_vm3 = vcmask 7168   ;;  %v1685_v42 = vmov -inf  }
  0x69   : > { %s1382_s23 = sshll.u32 %s2092_s21, 3  ;;  %1413 = vmatprep.subr.bf16.mxu1 %v1683_v16  ;;  %1441 = vmatprep.mubr.msk.bf16.mxu0 %vm1684_vm1, %v1683_v16  ;;  %624 = vst.msk [vmem:[#allocation4] sm:$0xff] %vm623_vm2, %v1683_v16  ;;  %v1686_v48 = vmov 0   ;;  %s1687_s19 = smov 112   ;;  %v1537_v62 = vld [vmem:[%s2049_s6] sm:$0xff]  }
  0x6a   : > { %s606_s0 = scalar_lea.vmem %s2045_s2, %s1382_s23  ;;  %621 = vst.msk [vmem:[#allocation2] sm:$0xff] %vm620_vm3, %v1685_v42  ;;  %622 = vst.msk [vmem:[#allocation3] sm:$0xff] %vm620_vm3, %v1683_v16  ;;  %1533 = vset.pattern.permute.xlu1 %v1686_v48  ;;  %1534 = vset.pattern.permute.xlu0 %v1686_v48  ;;  %v1362_v42 = vld [vmem:[%s2052_s9] ss:$0 sm:$0xff]  ;;  %v1544_v48 = vld [vmem:[%s2057_s14 + $0x10] sm:$0xff]   ;;  %s2082_s15 = sld [smem:[#allocation16_spill]] }
  0x6b   : > { %v1384_v0 = vld [vmem:[%s606_s0] sm:$0xff]   ;;  %s2083_s0 = sld [smem:[#allocation15_spill]]  ;;  %s2084_s20 = sld [smem:[#allocation17_spill]] }
  0x6c   : > { %v1385_v1 = vunpack.c.l.bf16 %v1384_v0  ;;  %v1386_v2 = vunpack.c.h.bf16 %v1384_v0  ;;  %1414 = vmatpush3.bf16.msra.mxu1 %v1536_v17  ;;  %s2085_s17 = sld [smem:[#allocation18_spill]] }
  0x6d   : > { %1419 = vmatprep.subr.bf16.mxu1 %v1683_v16 }
  0x6e   : > { %v632_v3 = vsel %vm631_vm0, %v1385_v1, 0.0  ;;  %v635_v4 = vsel %vm631_vm0, %v1386_v2, 0.0 }
  0x6f   : > { %633 = vadd.xlane.f32.xlu0 %v632_v3 }
  0x71   : > { %v785_v49 = vld [vmem:[#allocation2] sm:$0xff]  ;;  %v801_v63 = vld [vmem:[#allocation3] sm:$0xff] }
  0x73   : > { %636 = vadd.xlane.f32.xlu0 %v635_v4 }
  0xfc   : > { %v634_v5 = vpop.xlane.xlu0 %633 }
  0xfd   : > { %v639_v6 = vmul.f32 0.03125, %v634_v5  ;;  %v809_v5 = vld [vmem:[#allocation4] sm:$0xff] }
  0xff   : > { %v641_v7 = vsub.f32 %v1385_v1, %v639_v6 }
 0x100   : > { %v637_v8 = vpop.xlane.xlu0 %636 }
 0x101   : > { %v640_v9 = vmul.f32 0.03125, %v637_v8  ;;  %v643_v10 = vmul.f32 %v641_v7, %v641_v7 }
 0x103   : > { %v642_v11 = vsub.f32 %v1386_v2, %v640_v9  ;;  %v645_v12 = vsel %vm631_vm0, %v643_v10, 0.0 }
 0x104   : > { %646 = vadd.xlane.f32.xlu1 %v645_v12 }
 0x105   : > { %v644_v13 = vmul.f32 %v642_v11, %v642_v11 }
 0x107   : > { %v648_v14 = vsel %vm631_vm0, %v644_v13, 0.0 }
 0x108   : > { %649 = vadd.xlane.f32.xlu1 %v648_v14 }
 0x191   : > { %v647_v18 = vpop.xlane.xlu1 %646 }
 0x192   : > { %v651_v19 = vmul.f32 0.03125, %v647_v18  ;;  %v870_v18 = vld [vmem:[#allocation7] sm:$0xff] }
 0x194   : > { %v653_v20 = vadd.f32 1e-05, %v651_v19 }
 0x195   : > { %v650_v21 = vpop.xlane.xlu1 %649 }
 0x196   : > { %1550 = vrsqrt.f32 %v653_v20  ;;  %v652_v22 = vmul.f32 0.03125, %v650_v21  ;;  %v1360_v20 = vld [vmem:[%s2050_s7] ss:$0 sm:$0xff] }
 0x198   : > { %v654_v23 = vadd.f32 1e-05, %v652_v22 }
 0x19a   : > { %1552 = vrsqrt.f32 %v654_v23 }
 0x1a0   : > { %v1551_v24 = vpop.eup %1550 }
 0x1a1   : > { %v657_v25 = vmul.f32 %v1551_v24, %v641_v7 }
 0x1a3   : > { %v665_v29 = vmul.f32 %v1351_v26, %v657_v25 }
 0x1a4   : > { %v1553_v27 = vpop.eup %1552 }
 0x1a5   : > { %v658_v28 = vmul.f32 %v1553_v27, %v642_v11  ;;  %v673_v32 = vadd.f32 %v1352_v30, %v665_v29 }
 0x1a7   : > { %v666_v31 = vmul.f32 %v1351_v26, %v658_v28 }
 0x1a9   : > { %v674_v33 = vadd.f32 %v1352_v30, %v666_v31 }
 0x1ab   : > { %v675_v34 = vpack.c.bf16 %v674_v33, %v673_v32  ;;  %v1538_v32 = vld [vmem:[%s2053_s10] sm:$0xff]  }
 0x1ac   : > { %v1539_v33 = vld [vmem:[%s2055_s12] sm:$0xff]   ;;  %1438 = vmatpush3.bf16.msra.mxu0 %v1538_v32 }
 0x1ad   : > { %1416 = vmatmul.mubr.msk.bf16.vlgmr.msra.gmra.mrb[0].mxu1 %vm631_vm0, %v675_v34  ;;  %v1540_v34 = vld [vmem:[%s2053_s10 + $0x8] sm:$0xff]   ;;  %1439 = vmatprep.subr.bf16.mxu0 %v1683_v16 }
 0x1ae   : > { %1421 = vmatprep.mubr.msk.bf16.mxu1 %vm1684_vm1, %v1683_v16 }
 0x1b0   : > { %1440 = vmatpush3.bf16.msra.mxu0 %v1540_v34 }
 0x1b1   : > { %1453 = vmatprep.subr.bf16.mxu0 %v1683_v16 }
 0x280   : > { %v729_v35 = vpop.f32.mrb[0].mxu1 }
 0x281   : > { %v1417_v36 = vpop.f32.mrb[1].mxu1 }
 0x282   : > { %v732_v37 = vpop.f32.mrb[2].mxu1 }
 0x283   : > { %v737_v38 = vpack.c.bf16 %v732_v37, %v729_v35  ;;  %v1418_v39 = vpop.f32.mrb[3].mxu1  ;;  %v1541_v35 = vld [vmem:[%s2055_s12 + $0x8] sm:$0xff]  }
 0x285   : > { %v743_v40 = vsel %vm623_vm2, %v737_v38, 0 }
 0x286   : > { %1420 = vmatpush3.bf16.xpose.msra.mxu1 %v743_v40  ;;  %v1361_v40 = vld [vmem:[%s2051_s8] ss:$0 sm:$0xff] }
 0x287   : > { %1425 = vmatprep.subr.bf16.mxu1 %v1683_v16 }
 0x28d   : > { %1422 = vmatmul.mubr.msk.bf16.vlgmr.msra.gmra.mrb[4].mxu1 %vm623_vm2, %v736_v41 }
 0x28e   : > { %1427 = vmatprep.mubr.msk.bf16.mxu1 %vm1684_vm1, %v1683_v16 }
 0x360   : > { %v779_v43 = vpop.f32.mrb[4].mxu1 }
 0x361   : > { %v1423_v44 = vpop.f32.mrb[5].mxu1  ;;  %v786_v45 = vsel %vm623_vm2, %v779_v43, -inf }
 0x362   : > { %787 = vmax.xlane.f32.xlu0 %v786_v45  ;;  %v782_v46 = vpop.f32.mrb[6].mxu1  ;;  %v1542_v45 = vld [vmem:[%s2057_s14] sm:$0xff]  }
 0x363   : > { %v1424_v47 = vpop.f32.mrb[7].mxu1 }
 0x364   : > { %v1543_v47 = vld [vmem:[%s2057_s14 + $0x8] sm:$0xff]  }
 0x378   : > { %818 = vrot.lane.b32.xlu0 %v737_v38, %s1687_s19  ;;  %s614_s19 = scalar_lea.vmem %s2085_s17, %s1382_s23 }
 0x3ef   : > { %v788_v50 = vpop.xlane.xlu0 %787 }
 0x3f0   : > { %v789_v51 = vmax.f32 %v785_v49, %v788_v50  ;;  %v1546_v50 = vld [vmem:[%s2057_s14 + $0x20] sm:$0xff]  }
 0x3f2   : > { %v790_v52 = vsub.f32 %v785_v49, %v789_v51  ;;  %866 = vst.msk [vmem:[#allocation2] sm:$0xff] %vm620_vm3, %v789_v51  ;;  %795 = vperm.xlu1 %1533, %v789_v51   ;;  %v1545_v49 = vld [vmem:[%s2057_s14 + $0x18] sm:$0xff]   ;;  %v1547_v51 = vld [vmem:[%s2057_s14 + $0x28] sm:$0xff]  }
 0x3f3   : > { %v819_v53 = vpop.permute.xlu0 %818 }
 0x3f4   : > { %v791_v54 = vmul.f32 1.442695, %v790_v52  ;;  %1426 = vmatpush3.bf16.msra.mxu1 %v819_v53  ;;  %v1548_v52 = vld [vmem:[%s2057_s14 + $0x30] sm:$0xff]   ;;  %v1549_v53 = vld [vmem:[%s2057_s14 + $0x38] sm:$0xff]  }
 0x3f5   : > { %1431 = vmatprep.subr.bf16.mxu1 %v1683_v16 }
 0x3f6   : > { %1554 = vpow2.f32 %v791_v54  ;;  %v1367_v54 = vld [vmem:[%s2082_s15] ss:$0 sm:$0xff] }
 0x400   : > { %v1555_v55 = vpop.eup %1554 }
 0x401   : > { %812 = vperm.xlu0 %1534, %v1555_v55   ;;  %v802_v0 = vmul.f32 %v1555_v55, %v801_v63 }
 0x471   : > { %v796_v56 = vpop.permute.xlu1 %795 }
 0x472   : > { %v798_v57 = vsub.f32 %v779_v43, %v796_v56 }
 0x474   : > { %v799_v58 = vmul.f32 1.442695, %v798_v57 }
 0x476   : > { %1556 = vpow2.f32 %v799_v58 }
 0x480   : > { %v1557_v59 = vpop.eup %1556  ;;  %v813_v6 = vpop.permute.xlu0 %812 }
 0x481   : > { %v803_v60 = vsel %vm623_vm2, %v1557_v59, 0.0  ;;  %v816_v61 = vpack.c.bf16 %v1557_v59, %v1557_v59  ;;  %v815_v7 = vmul.f32 %v813_v6, %v809_v5 }
 0x482   : > { %804 = vadd.xlane.f32.xlu1 %v803_v60 }
 0x483   : > { %1428 = vmatmul.mubr.msk.bf16.vlgmr.msra.gmra.mrb[8].mxu1 %vm623_vm2, %v816_v61 }
 0x484   : > { %1433 = vmatprep.mubr.msk.bf16.mxu1 %vm1684_vm1, %v1683_v16  ;;  %1432 = vmatpush3.bf16.msra.mxu1 %v1537_v62 }
 0x485   : > { %1445 = vmatprep.subr.bf16.mxu1 %v1683_v16 }
 0x50f   : > { %v805_v1 = vpop.xlane.xlu1 %804 }
 0x510   : > { %v806_v2 = vadd.f32 %v805_v1, %v802_v0  ;;  %v1363_v1 = vld [vmem:[%s2083_s0] ss:$0 sm:$0xff] }
 0x512   : > { %808 = vst.msk [vmem:[#allocation3] sm:$0xff] %vm620_vm3, %v806_v2 }
 0x519   : > { %v871_v3 = vld [vmem:[#allocation3] sm:$0xff] }
 0x51a   : > { %1558 = vrcp.f32 %v871_v3 }
 0x524   : > { %v1559_v4 = vpop.eup %1558 }
 0x525   : > { %876 = vperm.xlu0 %1534, %v1559_v4  }
 0x556   : > { %v858_v8 = vpop.f32.mrb[8].mxu1 }
 0x557   : > { %v864_v9 = vadd.f32 %v858_v8, %v815_v7  ;;  %v1429_v10 = vpop.f32.mrb[9].mxu1 }
 0x558   : > { %v861_v11 = vpop.f32.mrb[10].mxu1 }
 0x559   : > { %865 = vst.msk [vmem:[#allocation4] sm:$0xff] %vm623_vm2, %v864_v9  ;;  %v1430_v12 = vpop.f32.mrb[11].mxu1  ;;  %v1379_v9 = vld [vmem:[%s2084_s20] ss:$0 sm:$0xff] }
 0x560   : > { %v873_v13 = vld [vmem:[#allocation4] sm:$0xff] }
 0x5a4   : > { %v877_v14 = vpop.permute.xlu0 %876 }
 0x5a5   : > { %v879_v15 = vmul.f32 %v877_v14, %v873_v13 }
 0x5a7   : > { %v880_v17 = vpack.c.bf16 %v879_v15, %v879_v15 }
 0x5a9   : > { %1434 = vmatmul.mubr.msk.bf16.vlgmr.msra.gmra.mrb[12].mxu1 %vm623_vm2, %v880_v17 }
 0x5aa   : > { %1449 = vmatprep.mubr.msk.bf16.mxu1 %vm1684_vm1, %v1683_v16  ;;  %1446 = vmatpush3.bf16.msra.mxu1 %v1539_v33 }
 0x5ab   : > { %1447 = vmatprep.subr.bf16.mxu1 %v1683_v16 }
 0x5ae   : > { %1448 = vmatpush3.bf16.msra.mxu1 %v1541_v35 }
 0x67c   : > { %v926_v19 = vpop.f32.mrb[12].mxu1 }
 0x67d   : > { %v932_v21 = vadd.f32 %v926_v19, %v870_v18  ;;  %v1435_v22 = vpop.f32.mrb[13].mxu1 }
 0x67e   : > { %v929_v23 = vpop.f32.mrb[14].mxu1 }
 0x67f   : > { %v1956_v24 = vadd.f32 %v1360_v20, %v932_v21  ;;  %v1436_v25 = vpop.f32.mrb[15].mxu1 }
 0x681   : > { %v943_v26 = vsel %vm631_vm0, %v1956_v24, 0.0 }
 0x682   : > { %944 = vadd.xlane.f32.xlu0 %v943_v26 }
 0x70f   : > { %v945_v27 = vpop.xlane.xlu0 %944 }
 0x710   : > { %v946_v28 = vmul.f32 0.03125, %v945_v27 }
 0x712   : > { %v947_v29 = vsub.f32 %v1956_v24, %v946_v28 }
 0x714   : > { %v948_v30 = vmul.f32 %v947_v29, %v947_v29 }
 0x716   : > { %v949_v31 = vsel %vm631_vm0, %v948_v30, 0.0 }
 0x717   : > { %950 = vadd.xlane.f32.xlu1 %v949_v31 }
 0x7a4   : > { %v951_v36 = vpop.xlane.xlu1 %950 }
 0x7a5   : > { %v952_v37 = vmul.f32 0.03125, %v951_v36 }
 0x7a7   : > { %v953_v38 = vadd.f32 1e-05, %v952_v37 }
 0x7a9   : > { %1560 = vrsqrt.f32 %v953_v38 }
 0x7b3   : > { %v1561_v39 = vpop.eup %1560 }
 0x7b4   : > { %v955_v41 = vmul.f32 %v1561_v39, %v947_v29 }
 0x7b6   : > { %v962_v43 = vmul.f32 %v1361_v40, %v955_v41 }
 0x7b8   : > { %v969_v44 = vadd.f32 %v1362_v42, %v962_v43 }
 0x7ba   : > { %v970_v46 = vpack.c.bf16 %v969_v44, %v969_v44 }
 0x7bc   : > { %1442 = vmatmul.mubr.msk.bf16.vlgmr.msra.gmra.mrb[0].mxu0 %vm631_vm0, %v970_v46  ;;  %1450 = vmatmul.mubr.msk.bf16.vlgmr.msra.gmra.mrb[16].mxu1 %vm631_vm0, %v970_v46 }
 0x7bd   : > { %1454 = vmatpush3.bf16.msra.mxu0 %v1542_v45  ;;  %1469 = vmatprep.mubr.msk.bf16.mxu0 %vm1684_vm1, %v1683_v16 }
 0x7be   : > { %1455 = vmatprep.subr.bf16.mxu0 %v1683_v16 }
 0x7c1   : > { %1456 = vmatpush3.bf16.msra.mxu0 %v1543_v47 }
 0x7c2   : > { %1457 = vmatprep.subr.bf16.mxu0 %v1683_v16 }
 0x7c5   : > { %1458 = vmatpush3.bf16.msra.mxu0 %v1544_v48 }
 0x7c6   : > { %1459 = vmatprep.subr.bf16.mxu0 %v1683_v16 }
 0x7c9   : > { %1460 = vmatpush3.bf16.msra.mxu0 %v1545_v49 }
 0x7ca   : > { %1461 = vmatprep.subr.bf16.mxu0 %v1683_v16 }
 0x7cd   : > { %1462 = vmatpush3.bf16.msra.mxu0 %v1546_v50 }
 0x7ce   : > { %1463 = vmatprep.subr.bf16.mxu0 %v1683_v16 }
 0x7d1   : > { %1464 = vmatpush3.bf16.msra.mxu0 %v1547_v51 }
 0x7d2   : > { %1465 = vmatprep.subr.bf16.mxu0 %v1683_v16 }
 0x7d5   : > { %1466 = vmatpush3.bf16.msra.mxu0 %v1548_v52 }
 0x7d6   : > { %1467 = vmatprep.subr.bf16.mxu0 %v1683_v16 }
 0x7d9   : > { %1468 = vmatpush3.bf16.msra.mxu0 %v1549_v53 }
 0x88f   : > { %v1031_v55 = vpop.f32.mrb[0].mxu0  ;;  %v1094_v56 = vpop.f32.mrb[16].mxu1 }
 0x890   : > { %v1095_v57 = vadd.f32 %v1367_v54, %v1094_v56  ;;  %v1443_v58 = vpop.f32.mrb[1].mxu0  ;;  %v1451_v59 = vpop.f32.mrb[17].mxu1  ;;  %v1032_v4 = vadd.f32 %v1363_v1, %v1031_v55 }
 0x891   : > { %v1034_v60 = vpop.f32.mrb[2].mxu0  ;;  %v1097_v61 = vpop.f32.mrb[18].mxu1 }
 0x892   : > { %v1101_v62 = vmul.f32 0.70710677, %v1095_v57  ;;  %v1444_v63 = vpop.f32.mrb[3].mxu0  ;;  %v1452_v16 = vpop.f32.mrb[19].mxu1  ;;  %v1100_v2 = vmul.f32 0.5, %v1095_v57 }
 0x894   : > { %1562 = verf.f32 %v1101_v62 }
 0x89e   : > { %v1563_v0 = vpop.eup %1562 }
 0x89f   : > { %v1103_v3 = vadd.f32 1.0, %v1563_v0 }
 0x8a1   : > { %v1104_v5 = vmul.f32 %v1103_v3, %v1100_v2 }
 0x8a3   : > { %v1105_v6 = vmul.f32 %v1104_v5, %v1032_v4 }
 0x8a5   : > { %v1106_v7 = vpack.c.bf16 %v1105_v6, %v1105_v6 }
 0x8a7   : > { %1470 = vmatmul.mubr.bf16.vlgmr.msra.gmra.mrb[4].mxu0 %v1106_v7 }
 0x97a   : > { %v1205_v8 = vpop.f32.mrb[4].mxu0 }
 0x97b   : > { %v1211_v10 = vadd.f32 %v1205_v8, %v1956_v24  ;;  %v1471_v11 = vpop.f32.mrb[5].mxu0 }
 0x97c   : > { %v1208_v12 = vpop.f32.mrb[6].mxu0 }
 0x97d   : > { %v1219_v13 = vadd.f32 %v1379_v9, %v1211_v10  ;;  %v1472_v14 = vpop.f32.mrb[7].mxu0 }
 0x97f   : > { %1220 = vst.msk [vmem:[%s614_s19] sm:$0xff] %vm631_vm0, %v1219_v13 }
 0x980 PF: > { %s2086_s25 = sld [smem:[#allocation13_spill]]  ;;  %s2087_s21 = sld [smem:[#allocation12_spill]] }
 0x981   : > { %s2088_s22 = smov %s2090_s29 }
 0x986   : > { %s28_s23 = sadd.s32 1, %s2086_s25  }
 0x987   : > { %p25_p5 = scmp.ge.s32.totalorder %s28_s23, 6  }
 0x989   :  { %27 = sbr.rel (!%p25_p5) target bundleno = 9 (0x9), region = 137 }
 0x990   :  { %1246 = vsyncpa [#allocation6], 1 }
 0x991   :  { %1248 = vsyncpa [#allocation6 + $0x1], 1 }
 0x992   :  { %1249 = vsyncpa [#allocation8], 1 }

// kernel: _lambda_.3
= control target key start
LH: loop header
LB: loop body
LE: loop exit
PB: predicated region body
PF: predicated region fallthrough
CT: control target
= control target key end

     0   :  { %s3650_s0 = inlined_call_operand.vmem [shape: f32[4,8,32], index: 0, kind: input, shape index: {}]   ;;  %s3651_s1 = inlined_call_operand.hbm [shape: f32[2,1,32], index: 1, kind: input, shape index: {}]   ;;  %s3652_s2 = inlined_call_operand.hbm [shape: f32[2,1,32], index: 2, kind: input, shape index: {}]   ;;  %s3653_s3 = inlined_call_operand.vmem [shape: bf16[2,32,96], index: 3, kind: input, shape index: {}]   ;;  %s3654_s4 = inlined_call_operand.vmem [shape: bf16[2,32,32], index: 4, kind: input, shape index: {}]   ;;  %s3655_s5 = inlined_call_operand.hbm [shape: f32[2,1,32], index: 5, kind: input, shape index: {}]   ;;  %s3656_s6 = inlined_call_operand.hbm [shape: f32[2,1,32], index: 6, kind: input, shape index: {}]   ;;  %s3657_s7 = inlined_call_operand.hbm [shape: f32[2,1,32], index: 7, kind: input, shape index: {}]   ;;  %s3658_s8 = inlined_call_operand.vmem [shape: bf16[2,32,128], index: 8, kind: input, shape index: {}]   ;;  %s3659_s9 = inlined_call_operand.hbm [shape: f32[2,1,128], index: 9, kind: input, shape index: {}]   ;;  %s3660_s10 = inlined_call_operand.vmem [shape: bf16[2,32,128], index: 10, kind: input, shape index: {}]   ;;  %s3661_s11 = inlined_call_operand.hbm [shape: f32[2,1,128], index: 11, kind: input, shape index: {}]   ;;  %s3662_s12 = inlined_call_operand.vmem [shape: bf16[2,128,32], index: 12, kind: input, shape index: {}]   ;;  %s3663_s13 = inlined_call_operand.hbm [shape: f32[2,1,32], index: 13, kind: input, shape index: {}]   ;;  %s3664_s14 = inlined_call_operand.hbm [shape: f32[4,8,32], index: 14, kind: output, shape index: {}]  }
   0x1   :  { %3684 = sst [smem:[#allocation36_spill]] %s3650_s0 }
   0x2   :  { %3685 = sst [smem:[#allocation37_spill]] %s3651_s1 }
   0x3   :  { %3686 = sst [smem:[#allocation38_spill]] %s3652_s2 }
   0x4   :  { %3687 = sst [smem:[#allocation39_spill]] %s3653_s3 }
   0x5   :  { %3688 = sst [smem:[#allocation40_spill]] %s3654_s4 }
   0x6   :  { %3689 = sst [smem:[#allocation41_spill]] %s3655_s5 }
   0x7   :  { %3690 = sst [smem:[#allocation42_spill]] %s3656_s6 }
   0x8   :  { %3691 = sst [smem:[#allocation43_spill]] %s3658_s8 }
   0x9   :  { %3692 = sst [smem:[#allocation44_spill]] %s3659_s9 }
   0xa   :  { %3693 = sst [smem:[#allocation45_spill]] %s3660_s10 }
   0xb   :  { %3694 = sst [smem:[#allocation46_spill]] %s3662_s12 }
   0xc   :  { %3695 = sst [smem:[#allocation47_spill]] %s3664_s14 }
   0xd   :  { %19 = vsyncpa [#allocation4], 0 }
   0xe   :  { %21 = vsyncpa [#allocation4 + $0x1], 0 }
   0xf   :  { %22 = vsyncpa [#allocation7], 0 }
  0x10   :  { %24 = vsyncpa [#allocation7 + $0x1], 0 }
  0x11   :  { %25 = vsyncpa [#allocation10], 0 }
  0x12   :  { %27 = vsyncpa [#allocation10 + $0x1], 0 }
  0x13   :  { %28 = vsyncpa [#allocation13], 0 }
  0x14   :  { %30 = vsyncpa [#allocation13 + $0x1], 0 }
  0x15   :  { %31 = vsyncpa [#allocation16], 0 }
  0x16   :  { %33 = vsyncpa [#allocation16 + $0x1], 0 }
  0x17   :  { %34 = vsyncpa [#allocation5], 0 }
  0x18   :  { %36 = vsyncpa [#allocation5 + $0x1], 0  ;;  %s2972_s29 = smov 0   ;;  %s2974_s30 = smov 0  }
  0x19   :  { %s2976_s15 = smov 0   ;;  %s2978_s16 = smov 0  }
  0x1a   :  { %s2980_s17 = smov 0   ;;  %s2982_s18 = smov 0  }
  0x1b   :  { %s2984_s19 = smov 0   ;;  %s2986_s20 = smov 0  }
  0x1c   :  { %s2988_s21 = smov 0   ;;  %s2990_s22 = smov 0  }
  0x1d   :  { %s2992_s23 = smov 0  }
  0x1e LB: > { %3696 = sst [smem:[#allocation24_spill]] %s2836_s29  ;;  %s3026_s24 = sadd.s32 4294967295, %s2876_s23   ;;  %s2876_s23 = sphi %s2992_s23, %s42_s23   ;;  %s2872_s22 = sphi %s2990_s22, %s3766_s22   ;;  %s2868_s21 = sphi %s2988_s21, %s3765_s21   ;;  %s2864_s20 = sphi %s2986_s20, %s3764_s20   ;;  %s2860_s19 = sphi %s2984_s19, %s3763_s19   ;;  %s2856_s18 = sphi %s2982_s18, %s3762_s18   ;;  %s2852_s17 = sphi %s2980_s17, %s3770_s17   ;;  %s2848_s16 = sphi %s2978_s16, %s3769_s16   ;;  %s2844_s15 = sphi %s2976_s15, %s3760_s15   ;;  %s2840_s30 = sphi %s2974_s30, %s3768_s30   ;;  %s2836_s29 = sphi %s2972_s29, %s3767_s29  }
  0x1f   : > { %3697 = sst [smem:[#allocation25_spill]] %s2844_s15  ;;  %s2096_s25 = sadd.s32 4294967294, %s2876_s23  }
  0x20   : > { %3698 = sst [smem:[#allocation26_spill]] %s2856_s18  ;;  %s51_s26 = sadd.s32 1, %s2868_s21 }
  0x21   : > { %3699 = sst [smem:[#allocation27_spill]] %s2868_s21  ;;  %s54_s27 = sadd.s32 1, %s2872_s22 }
  0x22   : > { %3700 = sst [smem:[#allocation28_spill]] %s2872_s22  ;;  %p52_p0 = scmp.ge.s32.totalorder %s51_s26, 2 }
  0x23   : > { %3701 = sst [smem:[#allocation29_spill]] %s2876_s23  ;;  %s87_s28 = sadd.s32 1, %s2856_s18 }
  0x24   : > { %p94_p1 = scmp.ne.s32.totalorder %s2856_s18, %s2852_s17  ;;  %p95_p2 = scmp.eq.s32.totalorder %s2876_s23, 0 }
  0x25   : > { %s3772_s26 = smov (%p52_p0, %s51_s26), 0  ;;  %s3774_s27 = smov (!%p52_p0, %s54_s27), %s2872_s22 }
  0x26   : > { %3702 = sst [smem:[#allocation30_spill]] %s3772_s26  ;;  %s84_s14 = ssub.s32 %s2868_s21, %s3772_s26 }
  0x27   : > { %p3040_p3 = por %p95_p2, %p94_p1  ;;  %p56_p4 = scmp.ge.s32.totalorder %s3774_s27, 2 }
  0x28   : > { %p85_p5 = scmp.eq.s32.totalorder %s84_s14, 0  ;;  %p100_p6 = scmp.ne.s32.totalorder %s2852_s17, %s2848_s16 }
  0x29   : > { %p101_p7 = scmp.eq.s32.totalorder %s3026_s24, 0  ;;  %s3776_s27 = smov (%p56_p4, %s3774_s27), 0 }
  0x2a   : > { %3704 = sst [smem:[#allocation31_spill]] %s3776_s27  ;;  %s422_s8 = ssub.s32 %s2872_s22, %s3776_s27 }
  0x2b   : > { %s3049_s10 = scalar_select %p85_p5, %s2856_s18, %s87_s28  }
  0x2c   : > { %p3051_p8 = por %p101_p7, %p100_p6  ;;  %p423_p9 = scmp.eq.s32.totalorder %s422_s8, 0 }
  0x2d   : > { %3705 = sst [smem:[#allocation32_spill]] %s3049_s10  ;;  %s425_s4 = sadd.s32 1, %s2844_s15 }
  0x2e   : > { %s3706_s26 = scalar_select %p3051_p8, 1, 0 }
  0x2f   : > { %p435_p10 = scmp.ne.s32.totalorder %s2844_s15, %s2840_s30  ;;  %p436_p11 = scmp.eq.s32.totalorder %s3026_s24, 3 }
  0x30   : > { %s3062_s14 = scalar_select %p423_p9, %s2844_s15, %s425_s4  }
  0x31   : > { %p3064_p12 = por %p436_p11, %p435_p10  ;;  %p441_p13 = scmp.ne.s32.totalorder %s2840_s30, %s2836_s29 }
  0x32   : > { %3707 = sst [smem:[#allocation33_spill]] %s3062_s14  ;;  %p442_p0 = scmp.eq.s32.totalorder %s2096_s25, 3 }
  0x33   : > { %s3708_s16 = scalar_select %p3064_p12, 1, 0 }
  0x34   : > { %p2354_p1 = scmp.lt.s32.totalorder %s2876_s23, 4  ;;  %s3072_s28 = sand.u32 1, %s2856_s18  }
  0x35   : > { %3709 = sst [smem:[#allocation34_spill]] %s3708_s16  ;;  %p3074_p2 = por %p442_p0, %p441_p13 }
  0x36   : > { %s3079_s8 = sshll.u32 %s2868_s21, 4  ;;  %p3083_p4 = pnand %p2354_p1, %p3040_p3 }
  0x37   : > { %s3710_s27 = scalar_select %p3074_p2, 1, 0 }
  0x38   : > { %s3712_s4 = scalar_select %p3083_p4, 1, 0 }
  0x39   : > { %3711 = sst [smem:[#allocation35_spill]] %s3710_s27  ;;  %s3088_s22 = sand.u32 1, %s2876_s23  }
  0x3a   : > { %s3713_s2 = sld [smem:[#allocation38_spill]]  ;;  %s491_s21 = scalar_lea.vmem [#allocation6], %s3072_s28 }
  0x3b   : > { %s498_s12 = sshll.u32 %s491_s21, 4  ;;  %p3106_p7 = pneg %p3083_p4  ;;  %s3098_s12 = int_to_ptr.vmem [resolvable:$true] %s498_s12 }
  0x40   : > { %s3094_s18 = scalar_lea.hbm %s3713_s2, %s3079_s8  ;;  %s2503_s21 = scalar_lea.hbm %s3713_s2, 32 }
  0x41   : > { %s2498_s15 = scalar_lea.hbm %s3094_s18, 16  ;;  %p2504_p11 = scmp.lt.u32.totalorder %s3094_s18, %s3713_s2 }
  0x42   : > { %p2499_p6 = scmp.ne.s32.totalorder %s3094_s18, %s2498_s15  ;;  %p2505_p13 = scmp.lt.u32.totalorder %s2503_s21, %s2498_s15 }
  0x43   : > { %p2507_p1 = scmp.lt.u32.totalorder %s2498_s15, %s3094_s18 }
  0x44   : > { %p2501_p9 = pnand %p3106_p7, %p2499_p6  ;;  %p2506_p0 = por %p2505_p13, %p2504_p11 }
  0x46   : > { %p2502_p10 = pneg %p2501_p9  ;;  %p2508_p5 = por %p2507_p1, %p2506_p0 }
  0x48   : > { %p2509_p3 = pnand %p2508_p5, %p2502_p10 }
  0x4a   : > { %2512 = shalt.err (!%p2509_p3)
}
  0x4b   : > { %s2513_s14 = scalar_lea.vmem %s3098_s12, 16  ;;  %s2878_s10 = smov [#allocation6]  }
  0x4c   : > { %p2514_p6 = scmp.ne.s32.totalorder %s3098_s12, %s2513_s14  ;;  %s2518_s25 = sshll.u32 %s2878_s10, 4  ;;  %s2519_s25 = int_to_ptr.vmem [resolvable:$false] %s2518_s25 }
  0x4d   : > { %s2520_s29 = scalar_lea.vmem %s2519_s25, 32  ;;  %p2521_p12 = scmp.lt.s32.totalorder %s3098_s12, %s2519_s25 }
  0x4e   : > { %p2516_p9 = pnand %p2514_p6, %p3106_p7  ;;  %p2522_p8 = scmp.lt.s32.totalorder %s2520_s29, %s2513_s14 }
  0x50   : > { %p2517_p2 = pneg %p2516_p9  ;;  %p2523_p11 = por %p2522_p8, %p2521_p12 }
  0x52   : > { %p2524_p13 = pnand %p2523_p11, %p2517_p2 }
  0x54   : > { %2527 = shalt.err (!%p2524_p13)
}
  0x55   : > { %s3715_s15 = scalar_lea.sflag [#allocation7], %s3088_s22  ;;  %p3716_p5 = scmp.lt.s32.totalorder %s2876_s23, 5 }
  0x56   : > { %2331 = dma.hbm_to_vmem [thread:$0]  (!%p3083_p4), %s3094_s18, 16, %s3098_s12, %s3715_s15  }
  0x57   : > { %p3717_p3 = scmp.ge.s32.totalorder %s2876_s23, 1  ;;  %s3719_s6 = sld [smem:[#allocation42_spill]] }
  0x58   : > { %s541_s25 = scalar_lea.vmem [#allocation9], %s3072_s28 }
  0x59   : > { %p3135_p10 = pnand %p3717_p3, %p3716_p5  ;;  %s548_s29 = sshll.u32 %s541_s25, 4  ;;  %s549_s29 = int_to_ptr.vmem [resolvable:$true] %s548_s29 }
  0x5b   : > { %s3718_s14 = scalar_select %p3135_p10, 1, 0 }
  0x5d   : > { %s3143_s10 = scalar_lea.hbm %s3719_s6, %s3079_s8  ;;  %s2533_s23 = scalar_lea.hbm %s3719_s6, 32 }
  0x5e   : > { %s2528_s18 = scalar_lea.hbm %s3143_s10, 16  ;;  %p2534_p0 = scmp.lt.u32.totalorder %s3143_s10, %s3719_s6 }
  0x5f   : > { %p2529_p8 = scmp.ne.s32.totalorder %s3143_s10, %s2528_s18  ;;  %p2535_p1 = scmp.lt.u32.totalorder %s2533_s23, %s2528_s18 }
  0x60   : > { %p2537_p9 = scmp.lt.u32.totalorder %s2528_s18, %s3143_s10 }
  0x61   : > { %p2531_p12 = pnand %p2529_p8, %p3106_p7  ;;  %p2536_p6 = por %p2535_p1, %p2534_p0 }
  0x63   : > { %p2532_p2 = pneg %p2531_p12  ;;  %p2538_p11 = por %p2537_p9, %p2536_p6 }
  0x65   : > { %p2539_p13 = pnand %p2538_p11, %p2532_p2 }
  0x67   : > { %2542 = shalt.err (!%p2539_p13)
}
  0x68   : > { %s2543_s25 = scalar_lea.vmem %s549_s29, 16  ;;  %s2879_s2 = smov [#allocation9]  }
  0x69   : > { %p2544_p5 = scmp.ne.s32.totalorder %s549_s29, %s2543_s25  ;;  %s2548_s3 = sshll.u32 %s2879_s2, 4  ;;  %s2549_s3 = int_to_ptr.vmem [resolvable:$false] %s2548_s3 }
  0x6a   : > { %s2550_s12 = scalar_lea.vmem %s2549_s3, 32  ;;  %p2551_p12 = scmp.lt.s32.totalorder %s549_s29, %s2549_s3 }
  0x6b   : > { %p2546_p3 = pnand %p2544_p5, %p3106_p7  ;;  %p2552_p10 = scmp.lt.s32.totalorder %s2550_s12, %s2543_s25 }
  0x6d   : > { %p2547_p8 = pneg %p2546_p3  ;;  %p2553_p4 = por %p2552_p10, %p2551_p12 }
  0x6f   : > { %p2554_p0 = pnand %p2553_p4, %p2547_p8 }
  0x71   : > { %2557 = shalt.err (!%p2554_p0)
}
  0x72   : > { %p3720_p1 = scmp.ne.s32.totalorder %s3712_s4, 0  ;;  %s3721_s23 = scalar_lea.sflag [#allocation10], %s3088_s22 }
  0x73   : > { %s3722_s9 = sld [smem:[#allocation44_spill]]  ;;  %s583_s3 = scalar_lea.vmem [#allocation12], %s3072_s28 }
  0x74   : > { %2337 = dma.hbm_to_vmem [thread:$0]  (!%p3720_p1), %s3143_s10, 16, %s549_s29, %s3721_s23  }
  0x75   : > { %s590_s16 = sshll.u32 %s583_s3, 4  ;;  %s591_s16 = int_to_ptr.vmem [resolvable:$true] %s590_s16 }
  0x79   : > { %s3170_s2 = scalar_lea.hbm %s3722_s9, %s3079_s8  ;;  %s2563_s29 = scalar_lea.hbm %s3722_s9, 32 }
  0x7a   : > { %s2558_s25 = scalar_lea.hbm %s3170_s2, 16  ;;  %p2564_p6 = scmp.lt.u32.totalorder %s3170_s2, %s3722_s9 }
  0x7b   : > { %p2559_p4 = scmp.ne.s32.totalorder %s3170_s2, %s2558_s25  ;;  %p2565_p9 = scmp.lt.u32.totalorder %s2563_s29, %s2558_s25 }
  0x7c   : > { %p2567_p13 = scmp.lt.u32.totalorder %s2558_s25, %s3170_s2 }
  0x7d   : > { %p2561_p10 = pnand %p2559_p4, %p3106_p7  ;;  %p2566_p11 = por %p2565_p9, %p2564_p6 }
  0x7f   : > { %p2562_p2 = pneg %p2561_p10  ;;  %p2568_p5 = por %p2567_p13, %p2566_p11 }
  0x81   : > { %p2569_p3 = pnand %p2568_p5, %p2562_p2 }
  0x83   : > { %2572 = shalt.err (!%p2569_p3)
}
  0x84   : > { %s2573_s15 = scalar_lea.vmem %s591_s16, 16  ;;  %s2880_s3 = smov [#allocation12]  }
  0x85   : > { %p2574_p8 = scmp.ne.s32.totalorder %s591_s16, %s2573_s15  ;;  %s2578_s21 = sshll.u32 %s2880_s3, 4  ;;  %s2579_s21 = int_to_ptr.vmem [resolvable:$false] %s2578_s21 }
  0x86   : > { %s2580_s12 = scalar_lea.vmem %s2579_s21, 32  ;;  %p2581_p4 = scmp.lt.s32.totalorder %s591_s16, %s2579_s21 }
  0x87   : > { %p2576_p12 = pnand %p2574_p8, %p3106_p7  ;;  %p2582_p10 = scmp.lt.s32.totalorder %s2580_s12, %s2573_s15 }
  0x89   : > { %p2577_p0 = pneg %p2576_p12  ;;  %p2583_p1 = por %p2582_p10, %p2581_p4 }
  0x8b   : > { %p2584_p6 = pnand %p2583_p1, %p2577_p0 }
  0x8d   : > { %2587 = shalt.err (!%p2584_p6)
}
  0x8e   : > { %p3723_p9 = scmp.ne.s32.totalorder %s3712_s4, 0  ;;  %s3724_s25 = scalar_lea.sflag [#allocation13], %s3088_s22 }
  0x8f   : > { %s3725_s1 = sld [smem:[#allocation37_spill]]  ;;  %s474_s21 = scalar_lea.vmem [#allocation3], %s3072_s28 }
  0x90   : > { %2343 = dma.hbm_to_vmem [thread:$0]  (!%p3723_p9), %s3170_s2, 16, %s591_s16, %s3724_s25  }
  0x91   : > { %s481_s18 = sshll.u32 %s474_s21, 4  ;;  %s3726_s5 = sld [smem:[#allocation41_spill]]  ;;  %s3200_s18 = int_to_ptr.vmem [resolvable:$true] %s481_s18 }
  0x92   : > { %s472_s6 = scalar_lea.sflag [#allocation4], %s3072_s28 }
  0x95   : > { %s3197_s23 = scalar_lea.hbm %s3725_s1, %s3079_s8  ;;  %s2593_s10 = scalar_lea.hbm %s3725_s1, 32 }
  0x96   : > { %s2588_s2 = scalar_lea.hbm %s3197_s23, 16  ;;  %p2594_p13 = scmp.lt.u32.totalorder %s3197_s23, %s3725_s1 }
  0x97   : > { %s3206_s12 = scalar_lea.hbm %s3726_s5, %s3079_s8  ;;  %p2589_p1 = scmp.ne.s32.totalorder %s3197_s23, %s2588_s2 }
  0x98   : > { %p2595_p5 = scmp.lt.u32.totalorder %s2593_s10, %s2588_s2  ;;  %p2597_p8 = scmp.lt.u32.totalorder %s2588_s2, %s3197_s23 }
  0x99   : > { %p2591_p2 = pnand %p2589_p1, %p3106_p7 }
  0x9a   : > { %p2596_p3 = por %p2595_p5, %p2594_p13 }
  0x9b   : > { %p2592_p11 = pneg %p2591_p2 }
  0x9c   : > { %p2598_p12 = por %p2597_p8, %p2596_p3 }
  0x9e   : > { %p2599_p0 = pnand %p2598_p12, %p2592_p11 }
  0xa0   : > { %2602 = shalt.err (!%p2599_p0)
}
  0xa1   : > { %s2603_s21 = scalar_lea.vmem %s3200_s18, 16  ;;  %s2881_s15 = smov [#allocation3]  }
  0xa2   : > { %p2604_p4 = scmp.ne.s32.totalorder %s3200_s18, %s2603_s21  ;;  %s2608_s3 = sshll.u32 %s2881_s15, 4  ;;  %s2609_s3 = int_to_ptr.vmem [resolvable:$false] %s2608_s3 }
  0xa3   : > { %s2610_s9 = scalar_lea.vmem %s2609_s3, 32  ;;  %p2611_p1 = scmp.lt.s32.totalorder %s3200_s18, %s2609_s3 }
  0xa4   : > { %p2606_p10 = pnand %p2604_p4, %p3106_p7  ;;  %p2612_p2 = scmp.lt.s32.totalorder %s2610_s9, %s2603_s21 }
  0xa6   : > { %p2607_p6 = pneg %p2606_p10  ;;  %p2613_p13 = por %p2612_p2, %p2611_p1 }
  0xa8   : > { %p2614_p5 = pnand %p2613_p13, %p2607_p6 }
  0xaa   : > { %2617 = shalt.err (!%p2614_p5)
}
  0xab   : > { %2328 = dma.hbm_to_vmem [thread:$0]  (!%p3723_p9), %s3197_s23, 16, %s3200_s18, %s472_s6  }
  0xac   : > { %s524_s2 = scalar_lea.vmem [#allocation8], %s3072_s28  ;;  %s3235_s29 = scalar_lea.hbm %s3657_s7, %s3079_s8 }
  0xad   : > { %s531_s16 = sshll.u32 %s524_s2, 4  ;;  %s2618_s21 = scalar_lea.hbm %s3206_s12, 16  ;;  %s532_s16 = int_to_ptr.vmem [resolvable:$true] %s531_s16 }
  0xae   : > { %p2619_p11 = scmp.ne.s32.totalorder %s3206_s12, %s2618_s21  ;;  %s2623_s9 = scalar_lea.hbm %s3726_s5, 32 }
  0xaf   : > { %p2624_p12 = scmp.lt.u32.totalorder %s3206_s12, %s3726_s5  ;;  %p2625_p0 = scmp.lt.u32.totalorder %s2623_s9, %s2618_s21 }
  0xb0   : > { %p2621_p3 = pnand %p2619_p11, %p3106_p7  ;;  %p2627_p10 = scmp.lt.u32.totalorder %s2618_s21, %s3206_s12 }
  0xb1   : > { %p2626_p4 = por %p2625_p0, %p2624_p12 }
  0xb2   : > { %p2622_p8 = pneg %p2621_p3 }
  0xb3   : > { %p2628_p6 = por %p2627_p10, %p2626_p4 }
  0xb5   : > { %p2629_p1 = pnand %p2628_p6, %p2622_p8 }
  0xb7   : > { %2632 = shalt.err (!%p2629_p1)
}
  0xb8   : > { %s2633_s6 = scalar_lea.vmem %s532_s16, 16  ;;  %s2882_s23 = smov [#allocation8]  }
  0xb9   : > { %p2634_p2 = scmp.ne.s32.totalorder %s532_s16, %s2633_s6  ;;  %s2638_s18 = sshll.u32 %s2882_s23, 4  ;;  %s2639_s18 = int_to_ptr.vmem [resolvable:$false] %s2638_s18 }
  0xba   : > { %s2640_s2 = scalar_lea.vmem %s2639_s18, 32  ;;  %p2641_p11 = scmp.lt.s32.totalorder %s532_s16, %s2639_s18 }
  0xbb   : > { %p2636_p13 = pnand %p2634_p2, %p3106_p7  ;;  %p2642_p3 = scmp.lt.s32.totalorder %s2640_s2, %s2633_s6 }
  0xbd   : > { %p2637_p5 = pneg %p2636_p13  ;;  %p2643_p9 = por %p2642_p3, %p2641_p11 }
  0xbf   : > { %p2644_p0 = pnand %p2643_p9, %p2637_p5 }
  0xc1   : > { %2647 = shalt.err (!%p2644_p0)
}
  0xc2   : > { %p3727_p12 = scmp.ne.s32.totalorder %s3712_s4, 0  ;;  %s3728_s0 = scalar_lea.sflag [#allocation7], %s3088_s22 }
  0xc3   : > { %s558_s1 = scalar_lea.vmem [#allocation11], %s3072_s28  ;;  %s3261_s15 = scalar_lea.hbm %s3661_s11, %s3079_s8 }
  0xc4   : > { %2334 = dma.hbm_to_vmem [thread:$0]  (!%p3727_p12), %s3206_s12, 16, %s532_s16, %s3728_s0  }
  0xc5   : > { %s565_s25 = sshll.u32 %s558_s1, 4  ;;  %s2648_s3 = scalar_lea.hbm %s3235_s29, 16  ;;  %s566_s25 = int_to_ptr.vmem [resolvable:$true] %s565_s25 }
  0xc6   : > { %p2649_p9 = scmp.ne.s32.totalorder %s3235_s29, %s2648_s3  ;;  %s2653_s23 = scalar_lea.hbm %s3657_s7, 32 }
  0xc7   : > { %p2654_p10 = scmp.lt.u32.totalorder %s3235_s29, %s3657_s7  ;;  %p2655_p6 = scmp.lt.u32.totalorder %s2653_s23, %s2648_s3 }
  0xc8   : > { %p2651_p8 = pnand %p2649_p9, %p3106_p7  ;;  %p2657_p2 = scmp.lt.u32.totalorder %s2648_s3, %s3235_s29 }
  0xc9   : > { %p2656_p1 = por %p2655_p6, %p2654_p10 }
  0xca   : > { %p2652_p4 = pneg %p2651_p8 }
  0xcb   : > { %p2658_p13 = por %p2657_p2, %p2656_p1 }
  0xcd   : > { %p2659_p5 = pnand %p2658_p13, %p2652_p4 }
  0xcf   : > { %2662 = shalt.err (!%p2659_p5)
}
  0xd0   : > { %s2663_s12 = scalar_lea.vmem %s566_s25, 16  ;;  %s2883_s16 = smov [#allocation11]  }
  0xd1   : > { %p2664_p11 = scmp.ne.s32.totalorder %s566_s25, %s2663_s12  ;;  %s2668_s0 = sshll.u32 %s2883_s16, 4  ;;  %s2669_s0 = int_to_ptr.vmem [resolvable:$false] %s2668_s0 }
  0xd2   : > { %s2670_s1 = scalar_lea.vmem %s2669_s0, 32  ;;  %p2671_p9 = scmp.lt.s32.totalorder %s566_s25, %s2669_s0 }
  0xd3   : > { %p2666_p3 = pnand %p2664_p11, %p3106_p7  ;;  %p2672_p8 = scmp.lt.s32.totalorder %s2670_s1, %s2663_s12 }
  0xd5   : > { %p2667_p0 = pneg %p2666_p3  ;;  %p2673_p12 = por %p2672_p8, %p2671_p9 }
  0xd7   : > { %p2674_p6 = pnand %p2673_p12, %p2667_p0 }
  0xd9   : > { %2677 = shalt.err (!%p2674_p6)
}
  0xda   : > { %p3729_p10 = scmp.ne.s32.totalorder %s3712_s4, 0  ;;  %s3730_s10 = scalar_lea.sflag [#allocation10], %s3088_s22 }
  0xdb   : > { %s608_s21 = scalar_lea.vmem [#allocation14], %s3072_s28  ;;  %s2678_s9 = scalar_lea.hbm %s3261_s15, 16 }
  0xdc   : > { %2340 = dma.hbm_to_vmem [thread:$0]  (!%p3729_p10), %s3235_s29, 16, %s566_s25, %s3730_s10  }
  0xdd   : > { %s615_s3 = sshll.u32 %s608_s21, 4  ;;  %p2679_p4 = scmp.ne.s32.totalorder %s3261_s15, %s2678_s9  ;;  %s616_s3 = int_to_ptr.vmem [resolvable:$true] %s615_s3 }
  0xde   : > { %s2683_s18 = scalar_lea.hbm %s3661_s11, 32  ;;  %p2684_p2 = scmp.lt.u32.totalorder %s3261_s15, %s3661_s11 }
  0xdf   : > { %p2681_p12 = pnand %p2679_p4, %p3106_p7  ;;  %p2685_p13 = scmp.lt.u32.totalorder %s2683_s18, %s2678_s9 }
  0xe0   : > { %p2687_p11 = scmp.lt.u32.totalorder %s2678_s9, %s3261_s15 }
  0xe1   : > { %p2682_p1 = pneg %p2681_p12  ;;  %p2686_p5 = por %p2685_p13, %p2684_p2 }
  0xe3   : > { %p2688_p3 = por %p2687_p11, %p2686_p5 }
  0xe5   : > { %p2689_p0 = pnand %p2688_p3, %p2682_p1 }
  0xe7   : > { %2692 = shalt.err (!%p2689_p0)
}
  0xe8   : > { %s2693_s29 = scalar_lea.vmem %s616_s3, 16  ;;  %s2884_s25 = smov [#allocation14]  }
  0xe9   : > { %p2694_p9 = scmp.ne.s32.totalorder %s616_s3, %s2693_s29  ;;  %s2698_s16 = sshll.u32 %s2884_s25, 4  ;;  %s2699_s16 = int_to_ptr.vmem [resolvable:$false] %s2698_s16 }
  0xea   : > { %s2700_s0 = scalar_lea.vmem %s2699_s16, 32  ;;  %p2701_p4 = scmp.lt.s32.totalorder %s616_s3, %s2699_s16 }
  0xeb   : > { %p2696_p8 = pnand %p2694_p9, %p3106_p7  ;;  %p2702_p12 = scmp.lt.s32.totalorder %s2700_s0, %s2693_s29 }
  0xed   : > { %p2697_p6 = pneg %p2696_p8  ;;  %p2703_p10 = por %p2702_p12, %p2701_p4 }
  0xef   : > { %p2704_p2 = pnand %p2703_p10, %p2697_p6 }
  0xf1   : > { %2707 = shalt.err (!%p2704_p2)
}
  0xf2   : > { %p3731_p13 = scmp.ne.s32.totalorder %s3712_s4, 0  ;;  %s3732_s1 = scalar_lea.sflag [#allocation13], %s3088_s22 }
  0xf3   : > { %s3306_s9 = scalar_lea.hbm %s3663_s13, %s3079_s8  ;;  %s633_s6 = scalar_lea.vmem [#allocation15], %s3072_s28 }
  0xf4   : > { %2346 = dma.hbm_to_vmem [thread:$0]  (!%p3731_p13), %s3261_s15, 16, %s616_s3, %s3732_s1  }
  0xf5   : > { %s640_s23 = sshll.u32 %s633_s6, 4  ;;  %s631_s18 = scalar_lea.sflag [#allocation16], %s3072_s28  ;;  %s641_s23 = int_to_ptr.vmem [resolvable:$true] %s640_s23 }
  0xf6   : > { %s2708_s22 = scalar_lea.hbm %s3306_s9, 16  ;;  %s2713_s3 = scalar_lea.hbm %s3663_s13, 32 }
  0xf7   : > { %p2709_p10 = scmp.ne.s32.totalorder %s3306_s9, %s2708_s22  ;;  %p2714_p11 = scmp.lt.u32.totalorder %s3306_s9, %s3663_s13 }
  0xf8   : > { %p2715_p3 = scmp.lt.u32.totalorder %s2713_s3, %s2708_s22  ;;  %p2717_p9 = scmp.lt.u32.totalorder %s2708_s22, %s3306_s9 }
  0xf9   : > { %p2711_p1 = pnand %p2709_p10, %p3106_p7 }
  0xfa   : > { %p2716_p0 = por %p2715_p3, %p2714_p11 }
  0xfb   : > { %p2712_p5 = pneg %p2711_p1 }
  0xfc   : > { %p2718_p8 = por %p2717_p9, %p2716_p0 }
  0xfe   : > { %p2719_p6 = pnand %p2718_p8, %p2712_p5 }
 0x100   : > { %2722 = shalt.err (!%p2719_p6)
}
 0x101   : > { %s2723_s28 = scalar_lea.vmem %s641_s23, 16  ;;  %s2885_s29 = smov [#allocation15]  }
 0x102   : > { %p2724_p4 = scmp.ne.s32.totalorder %s641_s23, %s2723_s28  ;;  %s2728_s25 = sshll.u32 %s2885_s29, 4  ;;  %s2729_s25 = int_to_ptr.vmem [resolvable:$false] %s2728_s25 }
 0x103   : > { %s2730_s16 = scalar_lea.vmem %s2729_s25, 32  ;;  %p2731_p10 = scmp.lt.s32.totalorder %s641_s23, %s2729_s25 }
 0x104   : > { %p2726_p12 = pnand %p2724_p4, %p3106_p7  ;;  %p2732_p1 = scmp.lt.s32.totalorder %s2730_s16, %s2723_s28 }
 0x106   : > { %p2727_p2 = pneg %p2726_p12  ;;  %p2733_p13 = por %p2732_p1, %p2731_p10 }
 0x108   : > { %p2734_p3 = pnand %p2733_p13, %p2727_p2 }
 0x10a   : > { %2737 = shalt.err (!%p2734_p3)
}
 0x10b   : > { %p3733_p11 = scmp.ne.s32.totalorder %s3712_s4, 0  ;;  %p3734_p5 = scmp.ne.s32.totalorder %s3718_s14, 0 }
 0x10c   : > { %s3330_s27 = sand.u32 (!%p3734_p5), 1, %s2852_s17   ;;  %p3735_p7 = scmp.ne.s32.totalorder (!%p3734_p5), %s3706_s26, 0 }
 0x10d   : > { %2349 = dma.hbm_to_vmem [thread:$0]  (!%p3733_p11), %s3306_s9, 16, %s641_s23, %s631_s18  }
 0x10e   : > { %649 = sbr.rel (%p3734_p5) target bundleno = 3075 (0xc03), region = 76  ;;  %s652_s0 = scalar_lea.sflag (!%p3734_p5), [#allocation4], %s3330_s27 }
 0x115   : > { %2811 = dma.done.wait (%p3735_p7), %s652_s0, 16  }
 0x116   : > { %2813 = vsyncadd (%p3735_p7), %s652_s0, 4294967280  ;;  %s659_s4 = sand.u32 1, %s3026_s24  }
 0x117   : > { %s660_s10 = scalar_lea.sflag [#allocation7], %s659_s4 }
 0x118   : > { %2815 = dma.done.wait (%p3735_p7), %s660_s10, 32  }
 0x119   : > { %2817 = vsyncadd (%p3735_p7), %s660_s10, 4294967264  ;;  %s676_s9 = scalar_lea.sflag [#allocation10], %s659_s4 }
 0x11a   : > { %2819 = dma.done.wait (%p3735_p7), %s676_s9, 32  }
 0x11b   : > { %2821 = vsyncadd (%p3735_p7), %s676_s9, 4294967264  ;;  %s692_s23 = scalar_lea.sflag [#allocation13], %s659_s4 }
 0x11c   : > { %2823 = dma.done.wait (%p3735_p7), %s692_s23, 32  }
 0x11d   : > { %2825 = vsyncadd (%p3735_p7), %s692_s23, 4294967264  ;;  %s708_s2 = scalar_lea.sflag [#allocation16], %s3330_s27 }
 0x11e   : > { %2827 = dma.done.wait (%p3735_p7), %s708_s2, 16  }
 0x11f   : > { %2829 = vsyncadd (%p3735_p7), %s708_s2, 4294967280  ;;  %s3683_s3 = sand.u32 1, %s2840_s30   ;;  %s2109_s12 = sshll.u32 %s2864_s20, 1 }
 0x120   : > { %s2108_s8 = sshll.u32 %s3683_s3, 4  ;;  %p813_p13 = scmp.lt.s32.totalorder %s2109_s12, 3 }
 0x121   : > { %p818_p0 = scmp.lt.s32.totalorder %s2860_s19, 1  ;;  %s3736_s0 = sld [smem:[#allocation36_spill]] }
 0x122   : > { %s3778_s12 = smov (!%p813_p13, %s2109_s12), 3  ;;  %s3737_s23 = sld [smem:[#allocation39_spill]] }
 0x123   : > { %s819_s28 = scalar_select %p818_p0, %s2860_s19, 1 }
 0x124   : > { %s2110_s29 = sshll.u32 %s3778_s12, 3  ;;  %s3738_s22 = sld [smem:[#allocation40_spill]] }
 0x125   : > { %s2164_s26 = sshll.u32 %s819_s28, 4  ;;  %s3739_s21 = sld [smem:[#allocation43_spill]] }
 0x126   : > { %s3740_s25 = sld [smem:[#allocation45_spill]]  ;;  %s2168_s16 = sshll.u32 %s819_s28, 6 }
 0x127   : > { %s816_s4 = scalar_lea.vmem %s3736_s0, %s2110_s29  ;;  %s3741_s9 = sld [smem:[#allocation46_spill]] }
 0x128   : > { %s3375_s2 = scalar_lea.vmem %s3737_s23, %s2164_s26  ;;  %s3397_s5 = scalar_lea.vmem [#allocation17], %s2108_s8 }
 0x129   : > { %p2121_p9 = scmp.ne.s32.totalorder %s2860_s19, 0 }
 0x12a   : > { %s3380_s24 = scalar_lea.vmem %s3738_s22, %s2164_s26  ;;  %v849_v0 = vld [vmem:[%s816_s4] sm:$0xff] (!%p2121_p9)  ;;  %vm851_vm0 = vcmask (!%p2121_p9), 261120   ;;  %v850_v1 = vld [vmem:[%s816_s4 + $0x8] sm:$0xff] (!%p2121_p9) }
 0x12b   : > { %s3385_s14 = scalar_lea.vmem %s3739_s21, %s2164_s26  ;;  %848 = sbr.rel (%p2121_p9) target bundleno = 306 (0x132), region = 112  ;;  %852 = vst.msk [vmem:[#allocation2] sm:$0xff] (!%p2121_p9), %vm851_vm0, %v849_v0  ;;  %853 = vst.msk [vmem:[#allocation2 + $0x8] sm:$0xff] (!%p2121_p9), %vm851_vm0, %v850_v1 }
 0x12c   : > { %s3390_s29 = scalar_lea.vmem %s3740_s25, %s2164_s26 }
 0x12d   : > { %s3395_s23 = scalar_lea.vmem %s3741_s9, %s2168_s16 }
 0x132 PF: > { %v3400_v2 = vld [vmem:[#allocation2] sm:$0xff]  ;;  %vm858_vm1 = vcmask 261120   ;;  %v3402_v3 = vld [vmem:[#allocation2 + $0x8] sm:$0xff]  ;;  %v2886_v17 = vmov 0.0   ;;  %vm2887_vm2 = vmmov 0   ;;  %s3742_s1 = scalar_lea.vmem [#allocation3], %s3330_s27 }
 0x133   : > { %v859_v4 = vsel %vm858_vm1, %v3400_v2, 0.0  ;;  %v862_v5 = vsel %vm858_vm1, %v3402_v3, 0.0  ;;  %v2454_v16 = vld [vmem:[%s3375_s2] sm:$0xff]   ;;  %2207 = vmatprep.subr.bf16.mxu1 %v2886_v17  ;;  %2233 = vmatprep.subr.bf16.mxu0 %v2886_v17  ;;  %v2455_v18 = vld [vmem:[%s3375_s2 + $0x8] sm:$0xff]   ;;  %s3743_s21 = scalar_lea.vmem [#allocation6], %s3330_s27  ;;  %s2888_s6 = smov 96  }
 0x134   : > { %860 = vadd.xlane.f32.xlu0 %v859_v4  ;;  %2208 = vmatpush3.bf16.msra.mxu1 %v2454_v16  ;;  %v2122_v27 = vld [vmem:[%s3742_s1] ss:$0 sm:$0xff]  ;;  %vm968_vm3 = vcmask 130048   ;;  %vm1064_vm4 = vcmask 64512   ;;  %s2889_s18 = smov 64   ;;  %s2890_s22 = smov 80  }
 0x135   : > { %2211 = vmatprep.mubr.msk.bf16.mxu1 %vm2887_vm2, %v2886_v17  ;;  %2209 = vmatprep.subr.bf16.mxu1 %v2886_v17  ;;  %v2123_v31 = vld [vmem:[%s3743_s21] ss:$0 sm:$0xff]  ;;  %s2891_s15 = smov 112   ;;  %vm1090_vm5 = vcmask 1043456   ;;  %s2892_s3 = smov 48  }
 0x136   : > { %2235 = vmatprep.mubr.msk.bf16.mxu0 %vm2887_vm2, %v2886_v17  ;;  %s3744_s8 = scalar_lea.vmem [#allocation8], %s3330_s27  ;;  %s3746_s28 = scalar_lea.vmem [#allocation11], %s3330_s27 }
 0x137   : > { %s3747_s4 = scalar_lea.vmem [#allocation14], %s3330_s27  ;;  %s3748_s26 = scalar_lea.vmem [#allocation12], %s3330_s27 }
 0x138   : > { %863 = vadd.xlane.f32.xlu0 %v862_v5  ;;  %2210 = vmatpush3.bf16.msra.mxu1 %v2455_v18  ;;  %s3749_s2 = scalar_lea.vmem [#allocation15], %s3330_s27  ;;  %p2158_p8 = scmp.ne.s32.totalorder %s2860_s19, 1 }
 0x139   : > { %2215 = vmatprep.subr.bf16.mxu1 %v2886_v17 }
 0x1c1   : > { %v861_v6 = vpop.xlane.xlu0 %860 }
 0x1c2   : > { %v866_v7 = vmul.f32 0.03125, %v861_v6 }
 0x1c4   : > { %v868_v8 = vsub.f32 %v3400_v2, %v866_v7 }
 0x1c5   : > { %v864_v9 = vpop.xlane.xlu0 %863 }
 0x1c6   : > { %v867_v10 = vmul.f32 0.03125, %v864_v9  ;;  %v870_v11 = vmul.f32 %v868_v8, %v868_v8 }
 0x1c8   : > { %v869_v12 = vsub.f32 %v3402_v3, %v867_v10  ;;  %v872_v13 = vsel %vm858_vm1, %v870_v11, 0.0 }
 0x1c9   : > { %873 = vadd.xlane.f32.xlu1 %v872_v13 }
 0x1ca   : > { %v871_v14 = vmul.f32 %v869_v12, %v869_v12 }
 0x1cc   : > { %v875_v15 = vsel %vm858_vm1, %v871_v14, 0.0 }
 0x1cd   : > { %876 = vadd.xlane.f32.xlu1 %v875_v15 }
 0x256   : > { %v874_v19 = vpop.xlane.xlu1 %873 }
 0x257   : > { %v878_v20 = vmul.f32 0.03125, %v874_v19 }
 0x259   : > { %v880_v21 = vadd.f32 1e-05, %v878_v20 }
 0x25a   : > { %v877_v22 = vpop.xlane.xlu1 %876 }
 0x25b   : > { %2470 = vrsqrt.f32 %v880_v21  ;;  %v879_v23 = vmul.f32 0.03125, %v877_v22 }
 0x25d   : > { %v881_v24 = vadd.f32 1e-05, %v879_v23 }
 0x25f   : > { %2472 = vrsqrt.f32 %v881_v24 }
 0x265   : > { %v2471_v25 = vpop.eup %2470 }
 0x266   : > { %v884_v26 = vmul.f32 %v2471_v25, %v868_v8 }
 0x268   : > { %v892_v30 = vmul.f32 %v2122_v27, %v884_v26 }
 0x269   : > { %v2473_v28 = vpop.eup %2472 }
 0x26a   : > { %v885_v29 = vmul.f32 %v2473_v28, %v869_v12  ;;  %v900_v33 = vadd.f32 %v2123_v31, %v892_v30 }
 0x26c   : > { %v893_v32 = vmul.f32 %v2122_v27, %v885_v29 }
 0x26e   : > { %v901_v34 = vadd.f32 %v2123_v31, %v893_v32 }
 0x270   : > { %v902_v35 = vpack.c.bf16 %v901_v34, %v900_v33 }
 0x272   : > { %2212 = vmatmul.mubr.msk.bf16.vlgmr.msra.gmra.mrb[0].mxu1 %vm858_vm1, %v902_v35 }
 0x273   : > { %2217 = vmatprep.mubr.msk.bf16.mxu1 %vm2887_vm2, %v2886_v17 }
 0x345   : > { %v956_v36 = vpop.f32.mrb[0].mxu1 }
 0x346   : > { %v3429_v37 = vpack.c.bf16 %v956_v36, %v956_v36  ;;  %v2213_v38 = vpop.f32.mrb[1].mxu1 }
 0x347   : > { %v959_v39 = vpop.f32.mrb[2].mxu1 }
 0x348   : > { %v3431_v40 = vpack.c.bf16 %v959_v39, %v959_v39  ;;  %966 = vrot.lane.b32.xlu0 %v3429_v37, %s2888_s6  ;;  %v2214_v41 = vpop.f32.mrb[3].mxu1 }
 0x34a   : > { %1016 = vrot.lane.b32.xlu1 %v3431_v40, %s2888_s6 }
 0x3ba   : > { %v967_v42 = vpop.permute.xlu0 %966 }
 0x3bb   : > { %v973_v43 = vsel %vm968_vm3, %v967_v42, 0 }
 0x3bc   : > { %2216 = vmatpush3.bf16.xpose.msra.mxu1 %v973_v43  ;;  %v1017_v44 = vpop.permute.xlu1 %1016 }
 0x3bd   : > { %2221 = vmatprep.subr.bf16.mxu1 %v2886_v17  ;;  %v1022_v45 = vsel %vm968_vm3, %v1017_v44, 0 }
 0x3c3   : > { %2218 = vmatmul.mubr.msk.bf16.vlgmr.msra.gmra.mrb[4].mxu1 %vm968_vm3, %v3429_v37 }
 0x3c4   : > { %2222 = vmatpush3.bf16.xpose.msra.mxu1 %v1022_v45  ;;  %2223 = vmatprep.mubr.msk.bf16.mxu1 %vm2887_vm2, %v2886_v17 }
 0x3c5   : > { %2227 = vmatprep.subr.bf16.mxu1 %v2886_v17 }
 0x3cb   : > { %2224 = vmatmul.mubr.msk.bf16.vlgmr.msra.gmra.mrb[8].mxu1 %vm968_vm3, %v3431_v40 }
 0x3cc   : > { %2229 = vmatprep.mubr.msk.bf16.mxu1 %vm2887_vm2, %v2886_v17 }
 0x496   : > { %v1009_v46 = vpop.f32.mrb[4].mxu1 }
 0x497   : > { %v2219_v47 = vpop.f32.mrb[5].mxu1  ;;  %v1065_v48 = vsel %vm1064_vm4, %v1009_v46, -inf }
 0x498   : > { %1066 = vmax.xlane.f32.xlu1 %v1065_v48  ;;  %v1012_v49 = vpop.f32.mrb[6].mxu1 }
 0x499   : > { %v2220_v50 = vpop.f32.mrb[7].mxu1 }
 0x49e   : > { %v1058_v51 = vpop.f32.mrb[8].mxu1 }
 0x49f   : > { %v2225_v52 = vpop.f32.mrb[9].mxu1  ;;  %v1068_v53 = vsel %vm1064_vm4, %v1058_v51, -inf }
 0x4a0   : > { %1069 = vmax.xlane.f32.xlu0 %v1068_v53  ;;  %v1061_v54 = vpop.f32.mrb[10].mxu1  ;;  %v2457_v52 = vld [vmem:[%s3380_s24 + $0x8] sm:$0xff]  }
 0x4a1   : > { %v2226_v55 = vpop.f32.mrb[11].mxu1 }
 0x4a9   : > { %1134 = vrot.lane.b32.xlu1 %v3431_v40, %s2889_s18 }
 0x4ad   : > { %1189 = vrot.lane.b32.xlu1 %v3429_v37, %s2890_s22 }
 0x4b1   : > { %1239 = vrot.lane.b32.xlu1 %v3431_v40, %s2890_s22 }
 0x4b5   : > { %1237 = vrot.lane.b32.xlu1 %v3431_v40, %s2891_s15 }
 0x4b6   : > { %1085 = vrot.lane.b32.xlu0 %v3429_v37, %s2889_s18 }
 0x4ba   : > { %1187 = vrot.lane.b32.xlu0 %v3429_v37, %s2891_s15 }
 0x525   : > { %v1067_v56 = vpop.xlane.xlu1 %1066 }
 0x526   : > { %v1071_v57 = vsub.f32 %v1009_v46, %v1067_v56 }
 0x528   : > { %v1073_v58 = vmul.f32 1.442695, %v1071_v57 }
 0x529   : > { %v1135_v59 = vpop.permute.xlu1 %1134 }
 0x52a   : > { %2474 = vpow2.f32 %v1073_v58  ;;  %v1140_v60 = vsel %vm1090_vm5, %v1135_v59, 0 }
 0x52b   : > { %2234 = vmatpush3.bf16.msra.mxu0 %v1140_v60 }
 0x52c   : > { %2245 = vmatprep.subr.bf16.mxu0 %v2886_v17 }
 0x52d   : > { %v1070_v61 = vpop.xlane.xlu0 %1069  ;;  %v1190_v6 = vpop.permute.xlu1 %1189 }
 0x52e   : > { %v1072_v62 = vsub.f32 %v1058_v51, %v1070_v61  ;;  %v1195_v7 = vsel %vm968_vm3, %v1190_v6, 0  ;;  %v2456_v51 = vld [vmem:[%s3380_s24] sm:$0xff]   ;;  %s2893_s24 = smov 16  }
 0x530   : > { %v1075_v63 = vmul.f32 1.442695, %v1072_v62 }
 0x531   : > { %v1086_v0 = vpop.permute.xlu0 %1085  ;;  %v1240_v9 = vpop.permute.xlu1 %1239 }
 0x532   : > { %2476 = vpow2.f32 %v1075_v63  ;;  %v1092_v1 = vsel %vm1090_vm5, %v1086_v0, 0  ;;  %v1245_v11 = vsel %vm968_vm3, %v1240_v9, 0 }
 0x533   : > { %2228 = vmatpush3.bf16.msra.mxu1 %v1092_v1 }
 0x534   : > { %v3458_v4 = vpop.eup %2474  ;;  %2239 = vmatprep.subr.bf16.mxu1 %v2886_v17 }
 0x535   : > { %v1083_v5 = vpack.c.bf16 %v3458_v4, %v3458_v4  ;;  %v1188_v12 = vpop.permute.xlu0 %1187  ;;  %v1238_v13 = vpop.permute.xlu1 %1237  ;;  %v1077_v48 = vsel %vm1064_vm4, %v3458_v4, 0.0 }
 0x537   : > { %2230 = vmatmul.mubr.msk.bf16.vlgmr.msra.gmra.mrb[12].mxu1 %vm1064_vm4, %v1083_v5 }
 0x538   : > { %2241 = vmatprep.mubr.msk.bf16.mxu1 %vm2887_vm2, %v2886_v17 }
 0x53c   : > { %v3467_v8 = vpop.eup %2476  ;;  %2240 = vmatpush3.bf16.xpose.msra.mxu1 %v1195_v7 }
 0x53d   : > { %v1084_v10 = vpack.c.bf16 %v3467_v8, %v3467_v8  ;;  %2251 = vmatprep.subr.bf16.mxu1 %v2886_v17  ;;  %v1080_v50 = vsel %vm1064_vm4, %v3467_v8, 0.0 }
 0x53f   : > { %2236 = vmatmul.mubr.msk.bf16.vlgmr.msra.gmra.mrb[0].mxu0 %vm1064_vm4, %v1084_v10 }
 0x540   : > { %2246 = vmatpush3.bf16.xpose.msra.mxu0 %v1245_v11  ;;  %2247 = vmatprep.mubr.msk.bf16.mxu0 %vm2887_vm2, %v2886_v17 }
 0x541   : > { %2257 = vmatprep.subr.bf16.mxu0 %v2886_v17 }
 0x543   : > { %2242 = vmatmul.mubr.msk.bf16.vlgmr.msra.gmra.mrb[16].mxu1 %vm968_vm3, %v1188_v12 }
 0x544   : > { %2253 = vmatprep.mubr.msk.bf16.mxu1 %vm2887_vm2, %v2886_v17 }
 0x547   : > { %2248 = vmatmul.mubr.msk.bf16.vlgmr.msra.gmra.mrb[4].mxu0 %vm968_vm3, %v1238_v13 }
 0x548   : > { %2259 = vmatprep.mubr.msk.bf16.mxu0 %vm2887_vm2, %v2886_v17 }
 0x60a   : > { %v3483_v14 = vpop.f32.mrb[12].mxu1 }
 0x60b   : > { %v2231_v15 = vpop.f32.mrb[13].mxu1 }
 0x60c   : > { %v1131_v16 = vpop.f32.mrb[14].mxu1 }
 0x60d   : > { %v2232_v18 = vpop.f32.mrb[15].mxu1  ;;  %v2138_v16 = vld [vmem:[%s3744_s8] ss:$0 sm:$0xff] }
 0x612   : > { %v3485_v19 = vpop.f32.mrb[0].mxu0 }
 0x613   : > { %v2237_v20 = vpop.f32.mrb[1].mxu0 }
 0x614   : > { %v1179_v21 = vpop.f32.mrb[2].mxu0 }
 0x615   : > { %v2238_v22 = vpop.f32.mrb[3].mxu0 }
 0x616   : > { %v1231_v23 = vpop.f32.mrb[16].mxu1 }
 0x617   : > { %v2243_v24 = vpop.f32.mrb[17].mxu1  ;;  %v1287_v25 = vsel %vm1064_vm4, %v1231_v23, -inf }
 0x618   : > { %1288 = vmax.xlane.f32.xlu0 %v1287_v25  ;;  %v1234_v26 = vpop.f32.mrb[18].mxu1 }
 0x619   : > { %v2244_v27 = vpop.f32.mrb[19].mxu1 }
 0x61a   : > { %v1281_v28 = vpop.f32.mrb[4].mxu0 }
 0x61b   : > { %v2249_v29 = vpop.f32.mrb[5].mxu0  ;;  %v1290_v30 = vsel %vm1064_vm4, %v1281_v28, -inf }
 0x61c   : > { %1291 = vmax.xlane.f32.xlu1 %v1290_v30  ;;  %v1284_v31 = vpop.f32.mrb[6].mxu0 }
 0x61d   : > { %v2250_v32 = vpop.f32.mrb[7].mxu0 }
 0x62d   : > { %1355 = vrot.lane.b32.xlu1 %v3431_v40, %s2892_s3 }
 0x62e   : > { %1307 = vrot.lane.b32.xlu0 %v3429_v37, %s2892_s3 }
 0x6a5   : > { %v1289_v33 = vpop.xlane.xlu0 %1288 }
 0x6a6   : > { %v1293_v34 = vsub.f32 %v1231_v23, %v1289_v33 }
 0x6a8   : > { %v1295_v35 = vmul.f32 1.442695, %v1293_v34 }
 0x6a9   : > { %v1292_v36 = vpop.xlane.xlu1 %1291  ;;  %v1308_v38 = vpop.permute.xlu0 %1307 }
 0x6aa   : > { %2478 = vpow2.f32 %v1295_v35  ;;  %v1294_v39 = vsub.f32 %v1281_v28, %v1292_v36  ;;  %v1313_v41 = vsel %vm1090_vm5, %v1308_v38, 0  ;;  %v2458_v35 = vld [vmem:[%s3385_s14] sm:$0xff]   ;;  %v2460_v38 = vld [vmem:[%s3385_s14 + $0x8] sm:$0xff]   ;;  %s3745_s14 = scalar_lea.vmem [#allocation9], %s3330_s27 }
 0x6ab   : > { %2252 = vmatpush3.bf16.msra.mxu1 %v1313_v41  ;;  %v2459_v36 = vld [vmem:[%s3390_s29] sm:$0xff]  }
 0x6ac   : > { %v1297_v42 = vmul.f32 1.442695, %v1294_v39  ;;  %2263 = vmatprep.subr.bf16.mxu1 %v2886_v17  ;;  %v2461_v39 = vld [vmem:[%s3390_s29 + $0x8] sm:$0xff]  }
 0x6ad   : > { %v1356_v43 = vpop.permute.xlu1 %1355 }
 0x6ae   : > { %2480 = vpow2.f32 %v1297_v42  ;;  %v1361_v44 = vsel %vm1090_vm5, %v1356_v43, 0 }
 0x6af   : > { %2258 = vmatpush3.bf16.msra.mxu0 %v1361_v44 }
 0x6b0   : > { %2271 = vmatprep.subr.bf16.mxu0 %v2886_v17 }
 0x6b4   : > { %v2479_v37 = vpop.eup %2478 }
 0x6b5   : > { %v1299_v40 = vsel %vm1064_vm4, %v2479_v37, 0.0  ;;  %v1305_v45 = vpack.c.bf16 %v2479_v37, %v2479_v37 }
 0x6b6   : > { %1300 = vadd.xlane.f32.xlu0 %v1299_v40 }
 0x6b7   : > { %2254 = vmatmul.mubr.msk.bf16.vlgmr.msra.gmra.mrb[20].mxu1 %vm1064_vm4, %v1305_v45 }
 0x6b8   : > { %v2481_v46 = vpop.eup %2480  ;;  %2267 = vmatprep.mubr.msk.bf16.mxu1 %vm2887_vm2, %v2886_v17  ;;  %2264 = vmatpush3.bf16.msra.mxu1 %v2456_v51  ;;  %v2140_v51 = vld [vmem:[%s3746_s28] ss:$0 sm:$0xff] }
 0x6b9   : > { %v1302_v47 = vsel %vm1064_vm4, %v2481_v46, 0.0  ;;  %v1306_v49 = vpack.c.bf16 %v2481_v46, %v2481_v46  ;;  %2265 = vmatprep.subr.bf16.mxu1 %v2886_v17 }
 0x6ba   : > { %1303 = vadd.xlane.f32.xlu1 %v1302_v47  ;;  %1078 = vadd.xlane.f32.xlu0 %v1077_v48  ;;  %v2139_v47 = vld [vmem:[%s3745_s14] ss:$0 sm:$0xff] }
 0x6bb   : > { %2260 = vmatmul.mubr.msk.bf16.vlgmr.msra.gmra.mrb[8].mxu0 %vm1064_vm4, %v1306_v49 }
 0x6bc   : > { %2275 = vmatprep.mubr.msk.bf16.mxu0 %vm2887_vm2, %v2886_v17  ;;  %2266 = vmatpush3.bf16.msra.mxu1 %v2457_v52 }
 0x6bd   : > { %2279 = vmatprep.subr.bf16.mxu1 %v2886_v17  ;;  %2272 = vmatpush3.bf16.msra.mxu0 %v2458_v35 }
 0x6be   : > { %1081 = vadd.xlane.f32.xlu0 %v1080_v50  ;;  %2273 = vmatprep.subr.bf16.mxu0 %v2886_v17 }
 0x6c1   : > { %2274 = vmatpush3.bf16.msra.mxu0 %v2460_v38 }
 0x6c2   : > { %2287 = vmatprep.subr.bf16.mxu0 %v2886_v17 }
 0x743   : > { %v1301_v53 = vpop.xlane.xlu0 %1300 }
 0x747   : > { %v1079_v54 = vpop.xlane.xlu0 %1078  ;;  %v1304_v61 = vpop.xlane.xlu1 %1303 }
 0x748   : > { %2482 = vrcp.f32 %v1079_v54 }
 0x74b   : > { %v1082_v55 = vpop.xlane.xlu0 %1081 }
 0x74c   : > { %2484 = vrcp.f32 %v1082_v55  ;;  %v2462_v55 = vld [vmem:[%s3395_s23] sm:$0xff]  }
 0x74d   : > { %2486 = vrcp.f32 %v1301_v53 }
 0x74e   : > { %2488 = vrcp.f32 %v1304_v61  ;;  %v2467_v61 = vld [vmem:[%s3395_s23 + $0x28] sm:$0xff]  }
 0x752   : > { %v2483_v56 = vpop.eup %2482 }
 0x753   : > { %v1184_v58 = vmul.f32 %v2483_v56, %v3483_v14 }
 0x756   : > { %v2485_v57 = vpop.eup %2484 }
 0x757   : > { %v1185_v59 = vmul.f32 %v2485_v57, %v3485_v19  ;;  %v2487_v1 = vpop.eup %2486  ;;  %v2463_v57 = vld [vmem:[%s3395_s23 + $0x8] sm:$0xff]  }
 0x758   : > { %v2489_v5 = vpop.eup %2488 }
 0x759   : > { %v1186_v60 = vpack.c.bf16 %v1185_v59, %v1184_v58  ;;  %v2464_v58 = vld [vmem:[%s3395_s23 + $0x10] sm:$0xff]   ;;  %v2465_v59 = vld [vmem:[%s3395_s23 + $0x18] sm:$0xff]  }
 0x78a   : > { %v1349_v62 = vpop.f32.mrb[20].mxu1 }
 0x78b   : > { %v2255_v63 = vpop.f32.mrb[21].mxu1  ;;  %v1405_v7 = vmul.f32 %v2487_v1, %v1349_v62  ;;  %v2468_v62 = vld [vmem:[%s3395_s23 + $0x30] sm:$0xff]  }
 0x78c   : > { %v1352_v0 = vpop.f32.mrb[22].mxu1  ;;  %v2469_v63 = vld [vmem:[%s3395_s23 + $0x38] sm:$0xff]  }
 0x78d   : > { %v2256_v4 = vpop.f32.mrb[23].mxu1  ;;  %v2145_v0 = vld [vmem:[%s3747_s4] ss:$0 sm:$0xff] }
 0x78e   : > { %v1397_v6 = vpop.f32.mrb[8].mxu0 }
 0x78f   : > { %v1406_v8 = vmul.f32 %v2489_v5, %v1397_v6  ;;  %v2261_v9 = vpop.f32.mrb[9].mxu0 }
 0x790   : > { %v1400_v10 = vpop.f32.mrb[10].mxu0 }
 0x791   : > { %v1407_v11 = vpack.c.bf16 %v1406_v8, %v1405_v7  ;;  %v2262_v12 = vpop.f32.mrb[11].mxu0 }
 0x793   : > { %1409 = vrot.lane.b32.xlu0 %v1407_v11, %s2893_s24 }
 0x805   : > { %v1410_v13 = vpop.permute.xlu0 %1409 }
 0x806   : > { %v1413_v14 = vsel %vm968_vm3, %v1186_v60, %v1410_v13  ;;  %v2466_v60 = vld [vmem:[%s3395_s23 + $0x20] sm:$0xff]  }
 0x807   : > { %2268 = vmatmul.mubr.msk.bf16.vlgmr.msra.gmra.mrb[24].mxu1 %vm858_vm1, %v1413_v14 }
 0x808   : > { %2283 = vmatprep.mubr.msk.bf16.mxu1 %vm2887_vm2, %v2886_v17  ;;  %2280 = vmatpush3.bf16.msra.mxu1 %v2459_v36 }
 0x809   : > { %2281 = vmatprep.subr.bf16.mxu1 %v2886_v17 }
 0x80c   : > { %2282 = vmatpush3.bf16.msra.mxu1 %v2461_v39 }
 0x8da   : > { %v1466_v15 = vpop.f32.mrb[24].mxu1 }
 0x8db   : > { %v1473_v18 = vadd.f32 %v1466_v15, %v3400_v2  ;;  %v2269_v19 = vpop.f32.mrb[25].mxu1  ;;  %v2141_v15 = vld [vmem:[%s3748_s26] ss:$0 sm:$0xff] }
 0x8dc   : > { %v1469_v20 = vpop.f32.mrb[26].mxu1 }
 0x8dd   : > { %v3520_v21 = vadd.f32 %v2138_v16, %v1473_v18  ;;  %v1474_v22 = vadd.f32 %v1469_v20, %v3402_v3  ;;  %v2270_v23 = vpop.f32.mrb[27].mxu1 }
 0x8df   : > { %v3523_v24 = vadd.f32 %v2138_v16, %v1474_v22  ;;  %v1486_v25 = vsel %vm858_vm1, %v3520_v21, 0.0 }
 0x8e0   : > { %1487 = vadd.xlane.f32.xlu1 %v1486_v25 }
 0x8e1   : > { %v1489_v26 = vsel %vm858_vm1, %v3523_v24, 0.0 }
 0x8e4   : > { %1490 = vadd.xlane.f32.xlu1 %v1489_v26 }
 0x96d   : > { %v1488_v2 = vpop.xlane.xlu1 %1487 }
 0x96e   : > { %v1492_v27 = vmul.f32 0.03125, %v1488_v2 }
 0x970   : > { %v1494_v28 = vsub.f32 %v3520_v21, %v1492_v27 }
 0x971   : > { %v1491_v3 = vpop.xlane.xlu1 %1490 }
 0x972   : > { %v1493_v29 = vmul.f32 0.03125, %v1491_v3  ;;  %v1496_v30 = vmul.f32 %v1494_v28, %v1494_v28 }
 0x974   : > { %v1495_v31 = vsub.f32 %v3523_v24, %v1493_v29  ;;  %v1498_v32 = vsel %vm858_vm1, %v1496_v30, 0.0  ;;  %v2157_v30 = vld [vmem:[%s3749_s2] ss:$0 sm:$0xff] }
 0x975   : > { %1499 = vadd.xlane.f32.xlu1 %v1498_v32 }
 0x976   : > { %v1497_v33 = vmul.f32 %v1495_v31, %v1495_v31 }
 0x978   : > { %v1501_v34 = vsel %vm858_vm1, %v1497_v33, 0.0 }
 0x979   : > { %1502 = vadd.xlane.f32.xlu1 %v1501_v34 }
 0xa02   : > { %v1500_v41 = vpop.xlane.xlu1 %1499 }
 0xa03   : > { %v1504_v42 = vmul.f32 0.03125, %v1500_v41 }
 0xa05   : > { %v1506_v43 = vadd.f32 1e-05, %v1504_v42 }
 0xa06   : > { %v1503_v44 = vpop.xlane.xlu1 %1502 }
 0xa07   : > { %2490 = vrsqrt.f32 %v1506_v43  ;;  %v1505_v37 = vmul.f32 0.03125, %v1503_v44 }
 0xa09   : > { %v1507_v40 = vadd.f32 1e-05, %v1505_v37 }
 0xa0b   : > { %2492 = vrsqrt.f32 %v1507_v40 }
 0xa11   : > { %v2491_v45 = vpop.eup %2490 }
 0xa12   : > { %v1510_v46 = vmul.f32 %v2491_v45, %v1494_v28 }
 0xa14   : > { %v1518_v49 = vmul.f32 %v2139_v47, %v1510_v46 }
 0xa15   : > { %v2493_v48 = vpop.eup %2492 }
 0xa16   : > { %v1511_v50 = vmul.f32 %v2493_v48, %v1495_v31  ;;  %v1526_v53 = vadd.f32 %v2140_v51, %v1518_v49 }
 0xa18   : > { %v1519_v52 = vmul.f32 %v2139_v47, %v1511_v50 }
 0xa1a   : > { %v1527_v54 = vadd.f32 %v2140_v51, %v1519_v52 }
 0xa1c   : > { %v1528_v56 = vpack.c.bf16 %v1527_v54, %v1526_v53 }
 0xa1e   : > { %2276 = vmatmul.mubr.msk.bf16.vlgmr.msra.gmra.mrb[12].mxu0 %vm858_vm1, %v1528_v56  ;;  %2284 = vmatmul.mubr.msk.bf16.vlgmr.msra.gmra.mrb[28].mxu1 %vm858_vm1, %v1528_v56 }
 0xa1f   : > { %2288 = vmatpush3.bf16.msra.mxu0 %v2462_v55  ;;  %2303 = vmatprep.mubr.msk.bf16.mxu0 %vm2887_vm2, %v2886_v17 }
 0xa20   : > { %2289 = vmatprep.subr.bf16.mxu0 %v2886_v17 }
 0xa23   : > { %2290 = vmatpush3.bf16.msra.mxu0 %v2463_v57 }
 0xa24   : > { %2291 = vmatprep.subr.bf16.mxu0 %v2886_v17 }
 0xa27   : > { %2292 = vmatpush3.bf16.msra.mxu0 %v2464_v58 }
 0xa28   : > { %2293 = vmatprep.subr.bf16.mxu0 %v2886_v17 }
 0xa2b   : > { %2294 = vmatpush3.bf16.msra.mxu0 %v2465_v59 }
 0xa2c   : > { %2295 = vmatprep.subr.bf16.mxu0 %v2886_v17 }
 0xa2f   : > { %2296 = vmatpush3.bf16.msra.mxu0 %v2466_v60 }
 0xa30   : > { %2297 = vmatprep.subr.bf16.mxu0 %v2886_v17 }
 0xa33   : > { %2298 = vmatpush3.bf16.msra.mxu0 %v2467_v61 }
 0xa34   : > { %2299 = vmatprep.subr.bf16.mxu0 %v2886_v17 }
 0xa37   : > { %2300 = vmatpush3.bf16.msra.mxu0 %v2468_v62 }
 0xa38   : > { %2301 = vmatprep.subr.bf16.mxu0 %v2886_v17 }
 0xa3b   : > { %2302 = vmatpush3.bf16.msra.mxu0 %v2469_v63 }
 0xaf1   : > { %v1589_v1 = vpop.f32.mrb[12].mxu0  ;;  %v1653_v4 = vpop.f32.mrb[28].mxu1 }
 0xaf2   : > { %v1654_v5 = vadd.f32 %v2145_v0, %v1653_v4  ;;  %v2277_v6 = vpop.f32.mrb[13].mxu0  ;;  %v2285_v7 = vpop.f32.mrb[29].mxu1  ;;  %v1590_v20 = vadd.f32 %v2141_v15, %v1589_v1 }
 0xaf3   : > { %v1592_v8 = vpop.f32.mrb[14].mxu0  ;;  %v1656_v9 = vpop.f32.mrb[30].mxu1 }
 0xaf4   : > { %v1662_v10 = vmul.f32 0.70710677, %v1654_v5  ;;  %v1657_v11 = vadd.f32 %v2145_v0, %v1656_v9  ;;  %v2278_v12 = vpop.f32.mrb[15].mxu0  ;;  %v2286_v13 = vpop.f32.mrb[31].mxu1  ;;  %v1660_v16 = vmul.f32 0.5, %v1654_v5  ;;  %v1593_v2 = vadd.f32 %v2141_v15, %v1592_v8 }
 0xaf6   : > { %2494 = verf.f32 %v1662_v10  ;;  %v1663_v14 = vmul.f32 0.70710677, %v1657_v11  ;;  %v1661_v23 = vmul.f32 0.5, %v1657_v11 }
 0xaf8   : > { %2496 = verf.f32 %v1663_v14 }
 0xb00   : > { %v2495_v17 = vpop.eup %2494 }
 0xb01   : > { %v1666_v18 = vadd.f32 1.0, %v2495_v17 }
 0xb02   : > { %v2497_v19 = vpop.eup %2496 }
 0xb03   : > { %v1668_v22 = vmul.f32 %v1666_v18, %v1660_v16  ;;  %v1667_v25 = vadd.f32 1.0, %v2497_v19 }
 0xb05   : > { %v1670_v26 = vmul.f32 %v1668_v22, %v1590_v20  ;;  %v1669_v27 = vmul.f32 %v1667_v25, %v1661_v23 }
 0xb07   : > { %v1671_v28 = vmul.f32 %v1669_v27, %v1593_v2 }
 0xb09   : > { %v1672_v3 = vpack.c.bf16 %v1671_v28, %v1670_v26 }
 0xb0b   : > { %2304 = vmatmul.mubr.bf16.vlgmr.msra.gmra.mrb[16].mxu0 %v1672_v3 }
 0xbde   : > { %v1771_v29 = vpop.f32.mrb[16].mxu0 }
 0xbdf   : > { %v1778_v31 = vadd.f32 %v1771_v29, %v3520_v21  ;;  %v2305_v32 = vpop.f32.mrb[17].mxu0  ;;  %1794 = sbr.rel (%p2158_p8) target bundleno = 3046 (0xbe6), region = 116 }
 0xbe0   : > { %v1774_v33 = vpop.f32.mrb[18].mxu0 }
 0xbe1   : > { %v1787_v34 = vadd.f32 %v2157_v30, %v1778_v31  ;;  %v1779_v35 = vadd.f32 %v1774_v33, %v3523_v24  ;;  %v2306_v36 = vpop.f32.mrb[19].mxu0 }
 0xbe3   : > { %1789 = vst.msk [vmem:[#allocation2] sm:$0xff] %vm858_vm1, %v1787_v34  ;;  %v1788_v38 = vadd.f32 %v2157_v30, %v1779_v35  ;;  %1795 = vst.msk [vmem:[%s3397_s5] sm:$0xff] (!%p2158_p8), %vm858_vm1, %v1787_v34 }
 0xbe5   : > { %1790 = vst.msk [vmem:[#allocation2 + $0x8] sm:$0xff] %vm858_vm1, %v1788_v38  ;;  %1796 = vst.msk [vmem:[%s3397_s5 + $0x8] sm:$0xff] (!%p2158_p8), %vm858_vm1, %v1788_v38 }
 0xbe6 PF: > { %s3750_s27 = sld [smem:[#allocation34_spill]]  ;;  %s2169_s12 = sshll.u32 %s2864_s20, 8 }
 0xbe7   : > { %s3751_s16 = sld [smem:[#allocation47_spill]]  ;;  %s1811_s9 = sshll.u32 %s3397_s5, 4  ;;  %s3585_s9 = int_to_ptr.vmem [resolvable:$true] %s1811_s9 }
 0xbe8   : > { %s3753_s19 = sand.u32 1, %s2840_s30   ;;  %s2738_s1 = scalar_lea.vmem %s3585_s9, 256 }
 0xbe9   : > { %s3589_s23 = scalar_lea.sflag [#allocation5], %s3753_s19  ;;  %p2739_p6 = scmp.ne.s32.totalorder %s3585_s9, %s2738_s1 }
 0xbea   : > { %s2894_s20 = smov [#allocation17]  }
 0xbeb   : > { %s2742_s21 = sshll.u32 %s2894_s20, 4  ;;  %s2743_s21 = int_to_ptr.vmem [resolvable:$false] %s2742_s21 }
 0xbec   : > { %p3754_p4 = scmp.ne.s32.totalorder %s3750_s27, 0  ;;  %s2744_s6 = scalar_lea.vmem %s2743_s21, 512 }
 0xbed   : > { %s3752_s0 = smov %s3751_s16  ;;  %s3582_s10 = scalar_lea.hbm %s3751_s16, %s2169_s12 }
 0xbee   : > { %p2740_p12 = pnand %p2739_p6, %p3754_p4  ;;  %p2745_p10 = scmp.lt.s32.totalorder %s3585_s9, %s2743_s21 }
 0xbef   : > { %p2746_p1 = scmp.lt.s32.totalorder %s2744_s6, %s2738_s1 }
 0xbf0   : > { %p2741_p2 = pneg %p2740_p12 }
 0xbf1   : > { %p2747_p3 = por %p2746_p1, %p2745_p10 }
 0xbf3   : > { %p2748_p11 = pnand %p2747_p3, %p2741_p2 }
 0xbf5   : > { %2751 = shalt.err (!%p2748_p11)
}
 0xbf6   : > { %s2752_s5 = scalar_lea.hbm %s3582_s10, 256  ;;  %s2756_s15 = scalar_lea.hbm %s3752_s0, 512 }
 0xbf7   : > { %p2753_p5 = scmp.ne.s32.totalorder %s3582_s10, %s2752_s5  ;;  %p2757_p0 = scmp.lt.u32.totalorder %s3582_s10, %s3752_s0 }
 0xbf8   : > { %p2758_p9 = scmp.lt.u32.totalorder %s2756_s15, %s2752_s5  ;;  %p2760_p6 = scmp.lt.u32.totalorder %s2752_s5, %s3582_s10 }
 0xbf9   : > { %p2754_p7 = pnand %p2753_p5, %p3754_p4 }
 0xbfa   : > { %p2759_p8 = por %p2758_p9, %p2757_p0 }
 0xbfb   : > { %p2755_p13 = pneg %p2754_p7 }
 0xbfc   : > { %p2761_p12 = por %p2760_p6, %p2759_p8 }
 0xbfe   : > { %p2762_p2 = pnand %p2761_p12, %p2755_p13 }
 0xc00   : > { %2765 = shalt.err (!%p2762_p2)
}
 0xc01   : > { %s2895_s8 = smov 128   ;;  %s2896_s14 = smov 8  }
 0xc02   : > { %2323 = dma.vmem_to_hbm [thread:$0]  (%p3754_p4), %s3585_s9, 256, %s3582_s10, %s3589_s23, %s2895_s8, %s2895_s8, %s2896_s14  }
 0xc03 PF: > { %s3755_s28 = sld [smem:[#allocation29_spill]]  ;;  %s3756_s4 = sld [smem:[#allocation24_spill]] }
 0xc04   : > { %s3757_s26 = sld [smem:[#allocation35_spill]] }
 0xc09   : > { %p2355_p10 = scmp.ge.s32.totalorder %s3755_s28, 2  ;;  %s1826_s2 = sand.u32 1, %s3756_s4  }
 0xc0a   : > { %p3758_p1 = scmp.ne.s32.totalorder %s3757_s26, 0  ;;  %s1827_s12 = scalar_lea.sflag [#allocation5], %s1826_s2 }
 0xc0c   : > { %p2351_p3 = pnand %p2355_p10, %p3758_p1 }
 0xc0e   : > { %2831 = dma.done.wait (!%p2351_p3), %s1827_s12, 256  }
 0xc0f   : > { %2833 = vsyncadd (!%p2351_p3), %s1827_s12, 4294967040  ;;  %s42_s23 = sadd.s32 1, %s3755_s28   ;;  %s3759_s25 = sld [smem:[#allocation25_spill]] }
 0xc10   : > { %p39_p11 = scmp.ge.s32.totalorder %s42_s23, 6   ;;  %s3760_s15 = sld [smem:[#allocation33_spill]] }
 0xc11   : > { %s3761_s27 = sld [smem:[#allocation26_spill]]  ;;  %s3762_s18 = sld [smem:[#allocation32_spill]] }
 0xc12   : > { %s3763_s19 = sld [smem:[#allocation27_spill]]  ;;  %s3764_s20 = sld [smem:[#allocation28_spill]] }
 0xc13   : > { %s3765_s21 = sld [smem:[#allocation30_spill]]  ;;  %s3766_s22 = sld [smem:[#allocation31_spill]] }
 0xc14   : > { %s3767_s29 = smov %s2840_s30  ;;  %s3769_s16 = smov %s2852_s17 }
 0xc15   : > { %s3768_s30 = smov %s3759_s25  ;;  %41 = sbr.rel (!%p39_p11) target bundleno = 30 (0x1e), region = 232 }
 0xc17   : > { %s3770_s17 = smov %s3761_s27 }
 0xc1c   :  { %1832 = vsyncpa [#allocation4], 1 }
 0xc1d   :  { %1834 = vsyncpa [#allocation4 + $0x1], 1 }
 0xc1e   :  { %1835 = vsyncpa [#allocation7], 1 }
 0xc1f   :  { %1837 = vsyncpa [#allocation7 + $0x1], 1 }
 0xc20   :  { %1838 = vsyncpa [#allocation10], 1 }
 0xc21   :  { %1840 = vsyncpa [#allocation10 + $0x1], 1 }
 0xc22   :  { %1841 = vsyncpa [#allocation13], 1 }
 0xc23   :  { %1843 = vsyncpa [#allocation13 + $0x1], 1 }
 0xc24   :  { %1844 = vsyncpa [#allocation16], 1 }
 0xc25   :  { %1846 = vsyncpa [#allocation16 + $0x1], 1 }
 0xc26   :  { %1847 = vsyncpa [#allocation5], 1 }
 0xc27   :  { %1849 = vsyncpa [#allocation5 + $0x1], 1 }

</bundles_post_ra>
